<compile_context>
chip_gen: v7x
topology: tpu7x:2x2x1
jax: 0.10.0
libtpu: 0.0.40
codegen_flags: <defaults>
</compile_context>

<pallas_src>
import functools

import jax
import jax.numpy as jnp
from jax.experimental import pallas as pl
from jax.experimental.pallas import tpu as pltpu


# ----------------------------------------------------------------------------
# Fused double-conv kernel (one batch image per grid step).
# ----------------------------------------------------------------------------
def _double_conv_kernel(x_ref, w1_ref, b1_ref, w2_ref, b2_ref, mask_ref,
                        o_ref, mid_ref, *, H, W):
    """x_ref:   (Hp*Wp, Cin)  f32   zero-padded input, flattened (padded width)
       w1_ref:  (9, Cin, Cout) bf16  conv1 weights, tap-major (ky*3+kx)
       b1_ref:  (1, Cout)      f32
       w2_ref:  (9, Cout, Cout) bf16 conv2 weights
       b2_ref:  (1, Cout)      f32
       mask_ref:(Mc, 1)        f32   1.0 on interior columns, 0.0 on the ring
       o_ref:   (Mc, Cout)     f32   conv2 output over the contiguous span
       mid_ref: (Hp*Wp, Cout)  f32   VMEM scratch: zero-padded relu(conv1)
    """
    Wp = W + 2
    Mc = (H - 1) * Wp + W          # contiguous flat span covering the interior
    base = Wp + 1                  # flat index of interior pixel (1, 1)
    cout = o_ref.shape[-1]

    # ---- conv1 + bias + ReLU : implicit im2col via 9 shifted flat slices ----
    acc = jnp.zeros((Mc, cout), jnp.float32)
    for t in range(9):
        dy, dx = divmod(t, 3)
        start = base + (dy - 1) * Wp + (dx - 1)          # static, in-bounds
        a = x_ref[pl.ds(start, Mc), :].astype(jnp.bfloat16)
        acc += jnp.dot(a, w1_ref[t], preferred_element_type=jnp.float32)
    r1 = jnp.maximum(acc + b1_ref[...], 0.0) * mask_ref[...]

    # stage relu(conv1) into a zero-initialized padded flat scratch buffer so
    # conv2 sees the correct zero padding ring (stays in VMEM, no HBM trip).
    mid_ref[...] = jnp.zeros_like(mid_ref)
    mid_ref[pl.ds(base, Mc), :] = r1

    # ---- conv2 + bias + ReLU on the VMEM-resident intermediate --------------
    acc2 = jnp.zeros((Mc, cout), jnp.float32)
    for t in range(9):
        dy, dx = divmod(t, 3)
        start = base + (dy - 1) * Wp + (dx - 1)
        a = mid_ref[pl.ds(start, Mc), :].astype(jnp.bfloat16)
        acc2 += jnp.dot(a, w2_ref[t], preferred_element_type=jnp.float32)
    o_ref[...] = jnp.maximum(acc2 + b2_ref[...], 0.0)


# ----------------------------------------------------------------------------
# Wrapper: layout plumbing around the Pallas call (NHWC in / NHWC out).
# ----------------------------------------------------------------------------
def double_conv_nhwc(x, params):
    """x: (N, H, W, Cin) float32.  Returns (N, H, W, Cout) float32."""
    N, H, W, Cin = x.shape
    Cout = params["b1"].shape[-1]
    Hp, Wp = H + 2, W + 2
    Mc = (H - 1) * Wp + W
    base = Wp + 1

    # zero-pad once and flatten spatially (padded-width flat layout).
    xp = jnp.pad(x, ((0, 0), (1, 1), (1, 1), (0, 0)))
    x_flat = xp.reshape(N, Hp * Wp, Cin).astype(jnp.float32)

    # mask that zeroes the wrap-around (ring) columns of the contiguous span.
    cols = (jnp.arange(Mc, dtype=jnp.int32) + base) % Wp
    mask = ((cols >= 1) & (cols <= W)).astype(jnp.float32).reshape(Mc, 1)

    kernel = functools.partial(_double_conv_kernel, H=H, W=W)

    out_flat = pl.pallas_call(
        kernel,
        out_shape=jax.ShapeDtypeStruct((N, Mc, Cout), jnp.float32),
        grid_spec=pltpu.PrefetchScalarGridSpec(
            num_scalar_prefetch=0,
            grid=(N,),
            in_specs=[
                pl.BlockSpec((None, Hp * Wp, Cin), lambda n: (n, 0, 0)),
                pl.BlockSpec((9, Cin, Cout), lambda n: (0, 0, 0)),   # resident
                pl.BlockSpec((1, Cout), lambda n: (0, 0)),           # resident
                pl.BlockSpec((9, Cout, Cout), lambda n: (0, 0, 0)),  # resident
                pl.BlockSpec((1, Cout), lambda n: (0, 0)),           # resident
                pl.BlockSpec((Mc, 1), lambda n: (0, 0)),             # resident
            ],
            out_specs=pl.BlockSpec((None, Mc, Cout), lambda n: (n, 0, 0)),
            scratch_shapes=[pltpu.VMEM((Hp * Wp, Cout), jnp.float32)],
        ),
        compiler_params=pltpu.CompilerParams(
            dimension_semantics=("parallel",)),
    )(x_flat, params["w1"], params["b1"], params["w2"], params["b2"], mask)

    # recover (N, H, W, Cout) from the padded-width flat layout (ring columns
    # computed by the kernel are garbage by construction and sliced off here).
    out_full = jnp.pad(out_flat, ((0, 0), (base, base), (0, 0)))
    return out_full.reshape(N, Hp, Wp, Cout)[:, 1:H + 1, 1:W + 1, :]


@jax.jit
def double_conv_nchw(x_nchw, params):
    """PyTorch-style interface: NCHW in, NCHW out."""
    x = jnp.transpose(x_nchw, (0, 2, 3, 1))        # NCHW -> NHWC
    y = double_conv_nhwc(x, params)
    return jnp.transpose(y, (0, 3, 1, 2))          # NHWC -> NCHW


def prepare_double_conv_params(w1, b1, w2, b2):
    """HWIO f32 weights -> kernel layout.  Done ONCE (not per forward call):
    tap-major reshape + bf16 cast for the MXU.  (A torch OIHW weight maps to
    HWIO via w.permute(2, 3, 1, 0).)"""
    cin, cout = w1.shape[2], w1.shape[3]
    return {
        "w1": jnp.asarray(w1.reshape(9, cin, cout), jnp.bfloat16),
        "b1": jnp.asarray(b1.reshape(1, cout), jnp.float32),
        "w2": jnp.asarray(w2.reshape(9, cout, cout), jnp.bfloat16),
        "b2": jnp.asarray(b2.reshape(1, cout), jnp.float32),
    }


# ----------------------------------------------------------------------------
# Pure-JAX reference (f32) for a sanity check.
# ----------------------------------------------------------------------------
def double_conv_reference(x_nhwc, w1, b1, w2, b2):
    dn = ("NHWC", "HWIO", "NHWC")
    y = jax.lax.conv_general_dilated(x_nhwc, w1, (1, 1), "SAME",
                                     dimension_numbers=dn)
    y = jnp.maximum(y + b1[None, None, None, :], 0.0)
    y = jax.lax.conv_general_dilated(y, w2, (1, 1), "SAME",
                                     dimension_numbers=dn)
    return jnp.maximum(y + b2[None, None, None, :], 0.0)


if __name__ == "__main__":
    N, in_ch, out_ch, H, W = 2, 4, 8, 16, 16

    key = jax.random.PRNGKey(0)
    kx, k1, k2, k3, k4 = jax.random.split(key, 5)
    x = jax.random.normal(kx, (N, in_ch, H, W), jnp.float32)          # NCHW
    w1 = jax.random.normal(k1, (3, 3, in_ch, out_ch), jnp.float32) * (2.0 / (9 * in_ch)) ** 0.5
    b1 = jax.random.normal(k2, (out_ch,), jnp.float32) * 0.01
    w2 = jax.random.normal(k3, (3, 3, out_ch, out_ch), jnp.float32) * (2.0 / (9 * out_ch)) ** 0.5
    b2 = jax.random.normal(k4, (out_ch,), jnp.float32) * 0.01

    params = prepare_double_conv_params(w1, b1, w2, b2)

    out = double_conv_nchw(x, params)
    out = jax.block_until_ready(out)

    assert out.shape == (N, out_ch, H, W), out.shape
    assert jnp.all(jnp.isfinite(out))

    # loose tolerance: kernel feeds bf16 to the MXU, accumulates in f32.
    ref = double_conv_reference(jnp.transpose(x, (0, 2, 3, 1)), w1, b1, w2, b2)
    ref = jnp.transpose(ref, (0, 3, 1, 2))
    max_err = float(jnp.max(jnp.abs(out - ref)))
    assert jnp.allclose(out, ref, rtol=5e-2, atol=5e-2), max_err

    print("KERNEL_OK")
</pallas_src>

<mosaic_0001>
module attributes {stable_mosaic.version = 11 : i64} {
  func.func @_double_conv_kernel(%arg0: i32, %arg1: memref<1x324x4xf32, #tpu.memory_space<vmem>>, %arg2: memref<9x4x8xbf16, #tpu.memory_space<vmem>>, %arg3: memref<1x8xf32, #tpu.memory_space<vmem>>, %arg4: memref<9x8x8xbf16, #tpu.memory_space<vmem>>, %arg5: memref<1x8xf32, #tpu.memory_space<vmem>>, %arg6: memref<286x1xf32, #tpu.memory_space<vmem>>, %arg7: memref<1x286x8xf32, #tpu.memory_space<vmem>>, %arg8: memref<324x8xf32, #tpu.memory_space<vmem>>) attributes {dimension_semantics = [#tpu.dimension_semantics<parallel>], iteration_bounds = array<i64: 2>, scalar_prefetch = 0 : i64, scratch_operands = 1 : i64, tpu.core_type = #tpu.core_type<tc>, window_params = [{transform_indices = @transform_0, window_bounds = array<i64: 1, 324, 4>}, {pipeline_mode = #tpu.pipeline_mode<synchronous>, transform_indices = @transform_1, window_bounds = array<i64: 9, 4, 8>}, {pipeline_mode = #tpu.pipeline_mode<synchronous>, transform_indices = @transform_2, window_bounds = array<i64: 1, 8>}, {pipeline_mode = #tpu.pipeline_mode<synchronous>, transform_indices = @transform_3, window_bounds = array<i64: 9, 8, 8>}, {pipeline_mode = #tpu.pipeline_mode<synchronous>, transform_indices = @transform_4, window_bounds = array<i64: 1, 8>}, {pipeline_mode = #tpu.pipeline_mode<synchronous>, transform_indices = @transform_5, window_bounds = array<i64: 286, 1>}, {transform_indices = @transform_6, window_bounds = array<i64: 1, 286, 8>}]} {
    %cst = arith.constant 0.000000e+00 : f32
    %0 = vector.broadcast %cst : f32 to vector<286x8xf32>
    %c0 = arith.constant 0 : index
    %c0_0 = arith.constant 0 : index
    %c0_1 = arith.constant 0 : index
    %1 = vector.load %arg1[%c0, %c0_0, %c0_1] : memref<1x324x4xf32, #tpu.memory_space<vmem>>, vector<1x286x4xf32>
    %2 = vector.shape_cast %1 : vector<1x286x4xf32> to vector<286x4xf32>
    %3 = arith.truncf %2 : vector<286x4xf32> to vector<286x4xbf16>
    %c0_2 = arith.constant 0 : index
    %c0_3 = arith.constant 0 : index
    %c0_4 = arith.constant 0 : index
    %4 = vector.load %arg2[%c0_2, %c0_3, %c0_4] : memref<9x4x8xbf16, #tpu.memory_space<vmem>>, vector<1x4x8xbf16>
    %5 = vector.shape_cast %4 : vector<1x4x8xbf16> to vector<4x8xbf16>
    %cst_5 = arith.constant dense<0.000000e+00> : vector<286x8xf32>
    %6 = tpu.matmul %3, %5, %cst_5 {dimension_numbers = #tpu.dot_dimension_numbers<[1], [0], [0], [1], [0, 0, 1, 1], [], []>} : vector<286x4xbf16>, vector<4x8xbf16>, vector<286x8xf32> -> vector<286x8xf32>
    %7 = arith.addf %0, %6 : vector<286x8xf32>
    %c0_6 = arith.constant 0 : index
    %c1 = arith.constant 1 : index
    %c0_7 = arith.constant 0 : index
    %8 = vector.load %arg1[%c0_6, %c1, %c0_7] : memref<1x324x4xf32, #tpu.memory_space<vmem>>, vector<1x286x4xf32>
    %9 = vector.shape_cast %8 : vector<1x286x4xf32> to vector<286x4xf32>
    %10 = arith.truncf %9 : vector<286x4xf32> to vector<286x4xbf16>
    %c1_8 = arith.constant 1 : index
    %c0_9 = arith.constant 0 : index
    %c0_10 = arith.constant 0 : index
    %11 = vector.load %arg2[%c1_8, %c0_9, %c0_10] : memref<9x4x8xbf16, #tpu.memory_space<vmem>>, vector<1x4x8xbf16>
    %12 = vector.shape_cast %11 : vector<1x4x8xbf16> to vector<4x8xbf16>
    %cst_11 = arith.constant dense<0.000000e+00> : vector<286x8xf32>
    %13 = tpu.matmul %10, %12, %cst_11 {dimension_numbers = #tpu.dot_dimension_numbers<[1], [0], [0], [1], [0, 0, 1, 1], [], []>} : vector<286x4xbf16>, vector<4x8xbf16>, vector<286x8xf32> -> vector<286x8xf32>
    %14 = arith.addf %7, %13 : vector<286x8xf32>
    %c0_12 = arith.constant 0 : index
    %c2 = arith.constant 2 : index
    %c0_13 = arith.constant 0 : index
    %15 = vector.load %arg1[%c0_12, %c2, %c0_13] : memref<1x324x4xf32, #tpu.memory_space<vmem>>, vector<1x286x4xf32>
    %16 = vector.shape_cast %15 : vector<1x286x4xf32> to vector<286x4xf32>
    %17 = arith.truncf %16 : vector<286x4xf32> to vector<286x4xbf16>
    %c2_14 = arith.constant 2 : index
    %c0_15 = arith.constant 0 : index
    %c0_16 = arith.constant 0 : index
    %18 = vector.load %arg2[%c2_14, %c0_15, %c0_16] : memref<9x4x8xbf16, #tpu.memory_space<vmem>>, vector<1x4x8xbf16>
    %19 = vector.shape_cast %18 : vector<1x4x8xbf16> to vector<4x8xbf16>
    %cst_17 = arith.constant dense<0.000000e+00> : vector<286x8xf32>
    %20 = tpu.matmul %17, %19, %cst_17 {dimension_numbers = #tpu.dot_dimension_numbers<[1], [0], [0], [1], [0, 0, 1, 1], [], []>} : vector<286x4xbf16>, vector<4x8xbf16>, vector<286x8xf32> -> vector<286x8xf32>
    %21 = arith.addf %14, %20 : vector<286x8xf32>
    %c0_18 = arith.constant 0 : index
    %c18 = arith.constant 18 : index
    %c0_19 = arith.constant 0 : index
    %22 = vector.load %arg1[%c0_18, %c18, %c0_19] : memref<1x324x4xf32, #tpu.memory_space<vmem>>, vector<1x286x4xf32>
    %23 = vector.shape_cast %22 : vector<1x286x4xf32> to vector<286x4xf32>
    %24 = arith.truncf %23 : vector<286x4xf32> to vector<286x4xbf16>
    %c3 = arith.constant 3 : index
    %c0_20 = arith.constant 0 : index
    %c0_21 = arith.constant 0 : index
    %25 = vector.load %arg2[%c3, %c0_20, %c0_21] : memref<9x4x8xbf16, #tpu.memory_space<vmem>>, vector<1x4x8xbf16>
    %26 = vector.shape_cast %25 : vector<1x4x8xbf16> to vector<4x8xbf16>
    %cst_22 = arith.constant dense<0.000000e+00> : vector<286x8xf32>
    %27 = tpu.matmul %24, %26, %cst_22 {dimension_numbers = #tpu.dot_dimension_numbers<[1], [0], [0], [1], [0, 0, 1, 1], [], []>} : vector<286x4xbf16>, vector<4x8xbf16>, vector<286x8xf32> -> vector<286x8xf32>
    %28 = arith.addf %21, %27 : vector<286x8xf32>
    %c0_23 = arith.constant 0 : index
    %c19 = arith.constant 19 : index
    %c0_24 = arith.constant 0 : index
    %29 = vector.load %arg1[%c0_23, %c19, %c0_24] : memref<1x324x4xf32, #tpu.memory_space<vmem>>, vector<1x286x4xf32>
    %30 = vector.shape_cast %29 : vector<1x286x4xf32> to vector<286x4xf32>
    %31 = arith.truncf %30 : vector<286x4xf32> to vector<286x4xbf16>
    %c4 = arith.constant 4 : index
    %c0_25 = arith.constant 0 : index
    %c0_26 = arith.constant 0 : index
    %32 = vector.load %arg2[%c4, %c0_25, %c0_26] : memref<9x4x8xbf16, #tpu.memory_space<vmem>>, vector<1x4x8xbf16>
    %33 = vector.shape_cast %32 : vector<1x4x8xbf16> to vector<4x8xbf16>
    %cst_27 = arith.constant dense<0.000000e+00> : vector<286x8xf32>
    %34 = tpu.matmul %31, %33, %cst_27 {dimension_numbers = #tpu.dot_dimension_numbers<[1], [0], [0], [1], [0, 0, 1, 1], [], []>} : vector<286x4xbf16>, vector<4x8xbf16>, vector<286x8xf32> -> vector<286x8xf32>
    %35 = arith.addf %28, %34 : vector<286x8xf32>
    %c0_28 = arith.constant 0 : index
    %c20 = arith.constant 20 : index
    %c0_29 = arith.constant 0 : index
    %36 = vector.load %arg1[%c0_28, %c20, %c0_29] : memref<1x324x4xf32, #tpu.memory_space<vmem>>, vector<1x286x4xf32>
    %37 = vector.shape_cast %36 : vector<1x286x4xf32> to vector<286x4xf32>
    %38 = arith.truncf %37 : vector<286x4xf32> to vector<286x4xbf16>
    %c5 = arith.constant 5 : index
    %c0_30 = arith.constant 0 : index
    %c0_31 = arith.constant 0 : index
    %39 = vector.load %arg2[%c5, %c0_30, %c0_31] : memref<9x4x8xbf16, #tpu.memory_space<vmem>>, vector<1x4x8xbf16>
    %40 = vector.shape_cast %39 : vector<1x4x8xbf16> to vector<4x8xbf16>
    %cst_32 = arith.constant dense<0.000000e+00> : vector<286x8xf32>
    %41 = tpu.matmul %38, %40, %cst_32 {dimension_numbers = #tpu.dot_dimension_numbers<[1], [0], [0], [1], [0, 0, 1, 1], [], []>} : vector<286x4xbf16>, vector<4x8xbf16>, vector<286x8xf32> -> vector<286x8xf32>
    %42 = arith.addf %35, %41 : vector<286x8xf32>
    %c0_33 = arith.constant 0 : index
    %c36 = arith.constant 36 : index
    %c0_34 = arith.constant 0 : index
    %43 = vector.load %arg1[%c0_33, %c36, %c0_34] : memref<1x324x4xf32, #tpu.memory_space<vmem>>, vector<1x286x4xf32>
    %44 = vector.shape_cast %43 : vector<1x286x4xf32> to vector<286x4xf32>
    %45 = arith.truncf %44 : vector<286x4xf32> to vector<286x4xbf16>
    %c6 = arith.constant 6 : index
    %c0_35 = arith.constant 0 : index
    %c0_36 = arith.constant 0 : index
    %46 = vector.load %arg2[%c6, %c0_35, %c0_36] : memref<9x4x8xbf16, #tpu.memory_space<vmem>>, vector<1x4x8xbf16>
    %47 = vector.shape_cast %46 : vector<1x4x8xbf16> to vector<4x8xbf16>
    %cst_37 = arith.constant dense<0.000000e+00> : vector<286x8xf32>
    %48 = tpu.matmul %45, %47, %cst_37 {dimension_numbers = #tpu.dot_dimension_numbers<[1], [0], [0], [1], [0, 0, 1, 1], [], []>} : vector<286x4xbf16>, vector<4x8xbf16>, vector<286x8xf32> -> vector<286x8xf32>
    %49 = arith.addf %42, %48 : vector<286x8xf32>
    %c0_38 = arith.constant 0 : index
    %c37 = arith.constant 37 : index
    %c0_39 = arith.constant 0 : index
    %50 = vector.load %arg1[%c0_38, %c37, %c0_39] : memref<1x324x4xf32, #tpu.memory_space<vmem>>, vector<1x286x4xf32>
    %51 = vector.shape_cast %50 : vector<1x286x4xf32> to vector<286x4xf32>
    %52 = arith.truncf %51 : vector<286x4xf32> to vector<286x4xbf16>
    %c7 = arith.constant 7 : index
    %c0_40 = arith.constant 0 : index
    %c0_41 = arith.constant 0 : index
    %53 = vector.load %arg2[%c7, %c0_40, %c0_41] : memref<9x4x8xbf16, #tpu.memory_space<vmem>>, vector<1x4x8xbf16>
    %54 = vector.shape_cast %53 : vector<1x4x8xbf16> to vector<4x8xbf16>
    %cst_42 = arith.constant dense<0.000000e+00> : vector<286x8xf32>
    %55 = tpu.matmul %52, %54, %cst_42 {dimension_numbers = #tpu.dot_dimension_numbers<[1], [0], [0], [1], [0, 0, 1, 1], [], []>} : vector<286x4xbf16>, vector<4x8xbf16>, vector<286x8xf32> -> vector<286x8xf32>
    %56 = arith.addf %49, %55 : vector<286x8xf32>
    %c0_43 = arith.constant 0 : index
    %c38 = arith.constant 38 : index
    %c0_44 = arith.constant 0 : index
    %57 = vector.load %arg1[%c0_43, %c38, %c0_44] : memref<1x324x4xf32, #tpu.memory_space<vmem>>, vector<1x286x4xf32>
    %58 = vector.shape_cast %57 : vector<1x286x4xf32> to vector<286x4xf32>
    %59 = arith.truncf %58 : vector<286x4xf32> to vector<286x4xbf16>
    %c8 = arith.constant 8 : index
    %c0_45 = arith.constant 0 : index
    %c0_46 = arith.constant 0 : index
    %60 = vector.load %arg2[%c8, %c0_45, %c0_46] : memref<9x4x8xbf16, #tpu.memory_space<vmem>>, vector<1x4x8xbf16>
    %61 = vector.shape_cast %60 : vector<1x4x8xbf16> to vector<4x8xbf16>
    %cst_47 = arith.constant dense<0.000000e+00> : vector<286x8xf32>
    %62 = tpu.matmul %59, %61, %cst_47 {dimension_numbers = #tpu.dot_dimension_numbers<[1], [0], [0], [1], [0, 0, 1, 1], [], []>} : vector<286x4xbf16>, vector<4x8xbf16>, vector<286x8xf32> -> vector<286x8xf32>
    %63 = arith.addf %56, %62 : vector<286x8xf32>
    %c0_48 = arith.constant 0 : index
    %c0_49 = arith.constant 0 : index
    %64 = vector.load %arg3[%c0_48, %c0_49] : memref<1x8xf32, #tpu.memory_space<vmem>>, vector<1x8xf32>
    %65 = vector.broadcast %64 : vector<1x8xf32> to vector<286x8xf32>
    %66 = arith.addf %63, %65 : vector<286x8xf32>
    %cst_50 = arith.constant 0.000000e+00 : f32
    %67 = vector.broadcast %cst_50 : f32 to vector<286x8xf32>
    %68 = arith.maximumf %66, %67 : vector<286x8xf32>
    %c0_51 = arith.constant 0 : index
    %c0_52 = arith.constant 0 : index
    %69 = vector.load %arg6[%c0_51, %c0_52] : memref<286x1xf32, #tpu.memory_space<vmem>>, vector<286x1xf32>
    %70 = vector.broadcast %69 : vector<286x1xf32> to vector<286x8xf32>
    %71 = arith.mulf %68, %70 : vector<286x8xf32>
    %cst_53 = arith.constant 0.000000e+00 : f32
    %72 = vector.broadcast %cst_53 : f32 to vector<324x8xf32>
    %c0_54 = arith.constant 0 : index
    %c0_55 = arith.constant 0 : index
    %73 = vector.load %arg8[%c0_54, %c0_55] : memref<324x8xf32, #tpu.memory_space<vmem>>, vector<324x8xf32>
    tpu.vector_store %arg8[%c0_54, %c0_55], %72 {strides = array<i32>} : memref<324x8xf32, #tpu.memory_space<vmem>>, vector<324x8xf32>,
    %c19_56 = arith.constant 19 : index
    %c0_57 = arith.constant 0 : index
    %74 = vector.load %arg8[%c19_56, %c0_57] : memref<324x8xf32, #tpu.memory_space<vmem>>, vector<286x8xf32>
    tpu.vector_store %arg8[%c19_56, %c0_57], %71 {strides = array<i32>} : memref<324x8xf32, #tpu.memory_space<vmem>>, vector<286x8xf32>,
    %cst_58 = arith.constant 0.000000e+00 : f32
    %75 = vector.broadcast %cst_58 : f32 to vector<286x8xf32>
    %c0_59 = arith.constant 0 : index
    %c0_60 = arith.constant 0 : index
    %76 = vector.load %arg8[%c0_59, %c0_60] : memref<324x8xf32, #tpu.memory_space<vmem>>, vector<286x8xf32>
    %77 = arith.truncf %76 : vector<286x8xf32> to vector<286x8xbf16>
    %c0_61 = arith.constant 0 : index
    %c0_62 = arith.constant 0 : index
    %c0_63 = arith.constant 0 : index
    %78 = vector.load %arg4[%c0_61, %c0_62, %c0_63] : memref<9x8x8xbf16, #tpu.memory_space<vmem>>, vector<1x8x8xbf16>
    %79 = vector.shape_cast %78 : vector<1x8x8xbf16> to vector<8x8xbf16>
    %cst_64 = arith.constant dense<0.000000e+00> : vector<286x8xf32>
    %80 = tpu.matmul %77, %79, %cst_64 {dimension_numbers = #tpu.dot_dimension_numbers<[1], [0], [0], [1], [0, 0, 1, 1], [], []>} : vector<286x8xbf16>, vector<8x8xbf16>, vector<286x8xf32> -> vector<286x8xf32>
    %81 = arith.addf %75, %80 : vector<286x8xf32>
    %c1_65 = arith.constant 1 : index
    %c0_66 = arith.constant 0 : index
    %82 = vector.load %arg8[%c1_65, %c0_66] : memref<324x8xf32, #tpu.memory_space<vmem>>, vector<286x8xf32>
    %83 = arith.truncf %82 : vector<286x8xf32> to vector<286x8xbf16>
    %c1_67 = arith.constant 1 : index
    %c0_68 = arith.constant 0 : index
    %c0_69 = arith.constant 0 : index
    %84 = vector.load %arg4[%c1_67, %c0_68, %c0_69] : memref<9x8x8xbf16, #tpu.memory_space<vmem>>, vector<1x8x8xbf16>
    %85 = vector.shape_cast %84 : vector<1x8x8xbf16> to vector<8x8xbf16>
    %cst_70 = arith.constant dense<0.000000e+00> : vector<286x8xf32>
    %86 = tpu.matmul %83, %85, %cst_70 {dimension_numbers = #tpu.dot_dimension_numbers<[1], [0], [0], [1], [0, 0, 1, 1], [], []>} : vector<286x8xbf16>, vector<8x8xbf16>, vector<286x8xf32> -> vector<286x8xf32>
    %87 = arith.addf %81, %86 : vector<286x8xf32>
    %c2_71 = arith.constant 2 : index
    %c0_72 = arith.constant 0 : index
    %88 = vector.load %arg8[%c2_71, %c0_72] : memref<324x8xf32, #tpu.memory_space<vmem>>, vector<286x8xf32>
    %89 = arith.truncf %88 : vector<286x8xf32> to vector<286x8xbf16>
    %c2_73 = arith.constant 2 : index
    %c0_74 = arith.constant 0 : index
    %c0_75 = arith.constant 0 : index
    %90 = vector.load %arg4[%c2_73, %c0_74, %c0_75] : memref<9x8x8xbf16, #tpu.memory_space<vmem>>, vector<1x8x8xbf16>
    %91 = vector.shape_cast %90 : vector<1x8x8xbf16> to vector<8x8xbf16>
    %cst_76 = arith.constant dense<0.000000e+00> : vector<286x8xf32>
    %92 = tpu.matmul %89, %91, %cst_76 {dimension_numbers = #tpu.dot_dimension_numbers<[1], [0], [0], [1], [0, 0, 1, 1], [], []>} : vector<286x8xbf16>, vector<8x8xbf16>, vector<286x8xf32> -> vector<286x8xf32>
    %93 = arith.addf %87, %92 : vector<286x8xf32>
    %c18_77 = arith.constant 18 : index
    %c0_78 = arith.constant 0 : index
    %94 = vector.load %arg8[%c18_77, %c0_78] : memref<324x8xf32, #tpu.memory_space<vmem>>, vector<286x8xf32>
    %95 = arith.truncf %94 : vector<286x8xf32> to vector<286x8xbf16>
    %c3_79 = arith.constant 3 : index
    %c0_80 = arith.constant 0 : index
    %c0_81 = arith.constant 0 : index
    %96 = vector.load %arg4[%c3_79, %c0_80, %c0_81] : memref<9x8x8xbf16, #tpu.memory_space<vmem>>, vector<1x8x8xbf16>
    %97 = vector.shape_cast %96 : vector<1x8x8xbf16> to vector<8x8xbf16>
    %cst_82 = arith.constant dense<0.000000e+00> : vector<286x8xf32>
    %98 = tpu.matmul %95, %97, %cst_82 {dimension_numbers = #tpu.dot_dimension_numbers<[1], [0], [0], [1], [0, 0, 1, 1], [], []>} : vector<286x8xbf16>, vector<8x8xbf16>, vector<286x8xf32> -> vector<286x8xf32>
    %99 = arith.addf %93, %98 : vector<286x8xf32>
    %c19_83 = arith.constant 19 : index
    %c0_84 = arith.constant 0 : index
    %100 = vector.load %arg8[%c19_83, %c0_84] : memref<324x8xf32, #tpu.memory_space<vmem>>, vector<286x8xf32>
    %101 = arith.truncf %100 : vector<286x8xf32> to vector<286x8xbf16>
    %c4_85 = arith.constant 4 : index
    %c0_86 = arith.constant 0 : index
    %c0_87 = arith.constant 0 : index
    %102 = vector.load %arg4[%c4_85, %c0_86, %c0_87] : memref<9x8x8xbf16, #tpu.memory_space<vmem>>, vector<1x8x8xbf16>
    %103 = vector.shape_cast %102 : vector<1x8x8xbf16> to vector<8x8xbf16>
    %cst_88 = arith.constant dense<0.000000e+00> : vector<286x8xf32>
    %104 = tpu.matmul %101, %103, %cst_88 {dimension_numbers = #tpu.dot_dimension_numbers<[1], [0], [0], [1], [0, 0, 1, 1], [], []>} : vector<286x8xbf16>, vector<8x8xbf16>, vector<286x8xf32> -> vector<286x8xf32>
    %105 = arith.addf %99, %104 : vector<286x8xf32>
    %c20_89 = arith.constant 20 : index
    %c0_90 = arith.constant 0 : index
    %106 = vector.load %arg8[%c20_89, %c0_90] : memref<324x8xf32, #tpu.memory_space<vmem>>, vector<286x8xf32>
    %107 = arith.truncf %106 : vector<286x8xf32> to vector<286x8xbf16>
    %c5_91 = arith.constant 5 : index
    %c0_92 = arith.constant 0 : index
    %c0_93 = arith.constant 0 : index
    %108 = vector.load %arg4[%c5_91, %c0_92, %c0_93] : memref<9x8x8xbf16, #tpu.memory_space<vmem>>, vector<1x8x8xbf16>
    %109 = vector.shape_cast %108 : vector<1x8x8xbf16> to vector<8x8xbf16>
    %cst_94 = arith.constant dense<0.000000e+00> : vector<286x8xf32>
    %110 = tpu.matmul %107, %109, %cst_94 {dimension_numbers = #tpu.dot_dimension_numbers<[1], [0], [0], [1], [0, 0, 1, 1], [], []>} : vector<286x8xbf16>, vector<8x8xbf16>, vector<286x8xf32> -> vector<286x8xf32>
    %111 = arith.addf %105, %110 : vector<286x8xf32>
    %c36_95 = arith.constant 36 : index
    %c0_96 = arith.constant 0 : index
    %112 = vector.load %arg8[%c36_95, %c0_96] : memref<324x8xf32, #tpu.memory_space<vmem>>, vector<286x8xf32>
    %113 = arith.truncf %112 : vector<286x8xf32> to vector<286x8xbf16>
    %c6_97 = arith.constant 6 : index
    %c0_98 = arith.constant 0 : index
    %c0_99 = arith.constant 0 : index
    %114 = vector.load %arg4[%c6_97, %c0_98, %c0_99] : memref<9x8x8xbf16, #tpu.memory_space<vmem>>, vector<1x8x8xbf16>
    %115 = vector.shape_cast %114 : vector<1x8x8xbf16> to vector<8x8xbf16>
    %cst_100 = arith.constant dense<0.000000e+00> : vector<286x8xf32>
    %116 = tpu.matmul %113, %115, %cst_100 {dimension_numbers = #tpu.dot_dimension_numbers<[1], [0], [0], [1], [0, 0, 1, 1], [], []>} : vector<286x8xbf16>, vector<8x8xbf16>, vector<286x8xf32> -> vector<286x8xf32>
    %117 = arith.addf %111, %116 : vector<286x8xf32>
    %c37_101 = arith.constant 37 : index
    %c0_102 = arith.constant 0 : index
    %118 = vector.load %arg8[%c37_101, %c0_102] : memref<324x8xf32, #tpu.memory_space<vmem>>, vector<286x8xf32>
    %119 = arith.truncf %118 : vector<286x8xf32> to vector<286x8xbf16>
    %c7_103 = arith.constant 7 : index
    %c0_104 = arith.constant 0 : index
    %c0_105 = arith.constant 0 : index
    %120 = vector.load %arg4[%c7_103, %c0_104, %c0_105] : memref<9x8x8xbf16, #tpu.memory_space<vmem>>, vector<1x8x8xbf16>
    %121 = vector.shape_cast %120 : vector<1x8x8xbf16> to vector<8x8xbf16>
    %cst_106 = arith.constant dense<0.000000e+00> : vector<286x8xf32>
    %122 = tpu.matmul %119, %121, %cst_106 {dimension_numbers = #tpu.dot_dimension_numbers<[1], [0], [0], [1], [0, 0, 1, 1], [], []>} : vector<286x8xbf16>, vector<8x8xbf16>, vector<286x8xf32> -> vector<286x8xf32>
    %123 = arith.addf %117, %122 : vector<286x8xf32>
    %c38_107 = arith.constant 38 : index
    %c0_108 = arith.constant 0 : index
    %124 = vector.load %arg8[%c38_107, %c0_108] : memref<324x8xf32, #tpu.memory_space<vmem>>, vector<286x8xf32>
    %125 = arith.truncf %124 : vector<286x8xf32> to vector<286x8xbf16>
    %c8_109 = arith.constant 8 : index
    %c0_110 = arith.constant 0 : index
    %c0_111 = arith.constant 0 : index
    %126 = vector.load %arg4[%c8_109, %c0_110, %c0_111] : memref<9x8x8xbf16, #tpu.memory_space<vmem>>, vector<1x8x8xbf16>
    %127 = vector.shape_cast %126 : vector<1x8x8xbf16> to vector<8x8xbf16>
    %cst_112 = arith.constant dense<0.000000e+00> : vector<286x8xf32>
    %128 = tpu.matmul %125, %127, %cst_112 {dimension_numbers = #tpu.dot_dimension_numbers<[1], [0], [0], [1], [0, 0, 1, 1], [], []>} : vector<286x8xbf16>, vector<8x8xbf16>, vector<286x8xf32> -> vector<286x8xf32>
    %129 = arith.addf %123, %128 : vector<286x8xf32>
    %c0_113 = arith.constant 0 : index
    %c0_114 = arith.constant 0 : index
    %130 = vector.load %arg5[%c0_113, %c0_114] : memref<1x8xf32, #tpu.memory_space<vmem>>, vector<1x8xf32>
    %131 = vector.broadcast %130 : vector<1x8xf32> to vector<286x8xf32>
    %132 = arith.addf %129, %131 : vector<286x8xf32>
    %cst_115 = arith.constant 0.000000e+00 : f32
    %133 = vector.broadcast %cst_115 : f32 to vector<286x8xf32>
    %134 = arith.maximumf %132, %133 : vector<286x8xf32>
    %c0_116 = arith.constant 0 : index
    %c0_117 = arith.constant 0 : index
    %c0_118 = arith.constant 0 : index
    %135 = vector.load %arg7[%c0_116, %c0_117, %c0_118] : memref<1x286x8xf32, #tpu.memory_space<vmem>>, vector<1x286x8xf32>
    %136 = vector.shape_cast %135 : vector<1x286x8xf32> to vector<286x8xf32>
    %137 = vector.shape_cast %134 : vector<286x8xf32> to vector<1x286x8xf32>
    tpu.vector_store %arg7[%c0_116, %c0_117, %c0_118], %137 {strides = array<i32>} : memref<1x286x8xf32, #tpu.memory_space<vmem>>, vector<1x286x8xf32>,
    return
  }
  func.func @transform_0(%arg0: i32) -> (i32, i32, i32) {
    %c0_i32 = arith.constant 0 : i32
    %c0_i32_0 = arith.constant 0 : i32
    %c0_i32_1 = arith.constant 0 : i32
    return %arg0, %c0_i32, %c0_i32_0 : i32, i32, i32
  }
  func.func @transform_1(%arg0: i32) -> (i32, i32, i32) {
    %c0_i32 = arith.constant 0 : i32
    %c0_i32_0 = arith.constant 0 : i32
    %c0_i32_1 = arith.constant 0 : i32
    %c0_i32_2 = arith.constant 0 : i32
    return %c0_i32, %c0_i32_0, %c0_i32_1 : i32, i32, i32
  }
  func.func @transform_2(%arg0: i32) -> (i32, i32) {
    %c0_i32 = arith.constant 0 : i32
    %c0_i32_0 = arith.constant 0 : i32
    %c0_i32_1 = arith.constant 0 : i32
    return %c0_i32, %c0_i32_0 : i32, i32
  }
  func.func @transform_3(%arg0: i32) -> (i32, i32, i32) {
    %c0_i32 = arith.constant 0 : i32
    %c0_i32_0 = arith.constant 0 : i32
    %c0_i32_1 = arith.constant 0 : i32
    %c0_i32_2 = arith.constant 0 : i32
    return %c0_i32, %c0_i32_0, %c0_i32_1 : i32, i32, i32
  }
  func.func @transform_4(%arg0: i32) -> (i32, i32) {
    %c0_i32 = arith.constant 0 : i32
    %c0_i32_0 = arith.constant 0 : i32
    %c0_i32_1 = arith.constant 0 : i32
    return %c0_i32, %c0_i32_0 : i32, i32
  }
  func.func @transform_5(%arg0: i32) -> (i32, i32) {
    %c0_i32 = arith.constant 0 : i32
    %c0_i32_0 = arith.constant 0 : i32
    %c0_i32_1 = arith.constant 0 : i32
    return %c0_i32, %c0_i32_0 : i32, i32
  }
  func.func @transform_6(%arg0: i32) -> (i32, i32, i32) {
    %c0_i32 = arith.constant 0 : i32
    %c0_i32_0 = arith.constant 0 : i32
    %c0_i32_1 = arith.constant 0 : i32
    return %arg0, %c0_i32, %c0_i32_0 : i32, i32, i32
  }
}

</mosaic_0001>

<bundles_post_ra>
// kernel: double_conv_nchw.1
= control target key start
LH: loop header
LB: loop body
LE: loop exit
PB: predicated region body
PF: predicated region fallthrough
CT: control target
= control target key end

     0   :  { %s8589_s21 = smov 0   ;;  %s9790_s0 = inlined_call_operand.vmem [shape: f32[2,324,4], index: 0, kind: input, shape index: {}]   ;;  %s9791_s1 = inlined_call_operand.vmem [shape: bf16[9,4,8], index: 1, kind: input, shape index: {}]   ;;  %s9792_s2 = inlined_call_operand.vmem [shape: f32[1,8], index: 2, kind: input, shape index: {}]   ;;  %s9793_s3 = inlined_call_operand.vmem [shape: bf16[9,8,8], index: 3, kind: input, shape index: {}]   ;;  %s9794_s4 = inlined_call_operand.vmem [shape: f32[1,8], index: 4, kind: input, shape index: {}]   ;;  %s9795_s5 = inlined_call_operand.vmem [shape: f32[286,1], index: 5, kind: input, shape index: {}]   ;;  %s9796_s6 = inlined_call_operand.vmem [shape: f32[2,286,8], index: 6, kind: output, shape index: {}]  }
   0x1 LB: > { %s6559_s22 = sadd.s32 4294967295, %s8550_s21   ;;  %p6563_p0 = scmp.ge.s32.totalorder %s8550_s21, 1  ;;  %s8550_s21 = sphi %s8589_s21, %s16_s21  }
   0x2   : > { %p212_p1 = scmp.lt.s32.totalorder %s8550_s21, 3 }
   0x4   : > { %p213_p2 = pnand %p6563_p0, %p212_p1 }
   0x5   : > { %v6566_v0 = vld [vmem:[%s9791_s1 + $0x2] sm:$0x3] (!%p213_p2)  ;;  %vm419_vm0 = vcmask (!%p213_p2), 1041408   ;;  %p242_p3 = scmp.lt.s32.totalorder (!%p213_p2), %s6559_s22, 1  ;;  %v307_v2 = vld [vmem:[%s9791_s1] sm:$0x3] (!%p213_p2) }
   0x6   : > { %216 = sbr.rel (%p213_p2) target bundleno = 1688 (0x698), region = 44  ;;  %8512 = vmatprep.subr.msk.bf16.mxu0 (!%p213_p2), %vm419_vm0, %v6566_v0  ;;  %v421_v1 = vsel (!%p213_p2), %vm419_vm0, %v6566_v0, 0  ;;  %vm364_vm1 = vcmask (!%p213_p2), 31744   ;;  %v655_v11 = vsel (!%p213_p2), %vm419_vm0, %v307_v2, 0  ;;  %v8625_v13 = vld [vmem:[%s9791_s1 + $0x4] sm:$0x3] (!%p213_p2) }
   0x7   : > { %7253 = vmatpush3.bf16.msra.mxu0 (!%p213_p2), %v421_v1  ;;  %vm3447_vm2 = vcmask (!%p213_p2), 64512   ;;  %vm3692_vm3 = vcmask (!%p213_p2), 1043456   ;;  %vm3525_vm4 = vcmask (!%p213_p2), 62464   ;;  %vm3488_vm5 = vcmask (!%p213_p2), 60416  }
   0x8   : > { %8513 = vmatprep.subr.msk.bf16.mxu0 (!%p213_p2), %vm419_vm0, %v307_v2 }
   0xd   : > { %s9798_s22 = smov (!%p242_p3, %s6559_s22), 1 }
   0xe   : > { %s8530_s27 = smul.u32 328, %s9798_s22 }
   0xf   : > { %s8531_s7 = smul.u32 288, %s9798_s22 }
  0x10   : > { %s8612_s30 = scalar_lea.vmem %s9790_s0, %s8530_s27 }
  0x11   : > { %v308_v3 = vld [vmem:[%s8612_s30 + $0x1] sm:$0xff]  ;;  %v309_v4 = vld [vmem:[%s8612_s30 + $0x9] sm:$0xff]  ;;  %v310_v5 = vld [vmem:[%s8612_s30 + $0x11] sm:$0xff]  ;;  %s9678_s11 = scalar_lea.vmem %s9796_s6, %s8531_s7 }
  0x12   : > { %v344_v6 = vpack.c.bf16 %v309_v4, %v308_v3  ;;  %v311_v7 = vld [vmem:[%s8612_s30 + $0x19] sm:$0xff]  ;;  %v312_v8 = vld [vmem:[%s8612_s30 + $0x21] sm:$0xff]  ;;  %v313_v9 = vld [vmem:[%s8612_s30 + $0x29] sm:$0xff]  ;;  %v945_v4 = vsel %vm419_vm0, %v8625_v13, 0 }
  0x13   : > { %v345_v10 = vpack.c.bf16 %v311_v7, %v310_v5  ;;  %v346_v12 = vpack.c.bf16 %v313_v9, %v312_v8  ;;  %v314_v14 = vld [vmem:[%s8612_s30 + $0x31] sm:$0xff]  ;;  %v315_v15 = vld [vmem:[%s8612_s30 + $0x39] sm:$0xff]  ;;  %v316_v16 = vld [vmem:[%s8612_s30 + $0x41] sm:$0xff] }
  0x14   : > { %7254 = vmatprep.mubr.msk.bf16.mxu0 %vm364_vm1, %v344_v6  ;;  %v317_v17 = vld [vmem:[%s8612_s30 + $0x49] sm:$0xff]  ;;  %v347_v18 = vpack.c.bf16 %v315_v15, %v314_v14  ;;  %v318_v20 = vld [vmem:[%s8612_s30 + $0x51] sm:$0xff]  ;;  %v319_v21 = vld [vmem:[%s8612_s30 + $0x59] sm:$0xff] }
  0x15   : > { %7255 = vmatmul.mubr.msk.bf16.vlgmr.msra.gmra.mrb[0].mxu0 %vm364_vm1, %v345_v10  ;;  %v348_v19 = vpack.c.bf16 %v317_v17, %v316_v16  ;;  %v320_v22 = vld [vmem:[%s8612_s30 + $0x61] sm:$0xff]  ;;  %v321_v23 = vld [vmem:[%s8612_s30 + $0x69] sm:$0xff]  ;;  %v349_v24 = vpack.c.bf16 %v319_v21, %v318_v20  ;;  %v322_v26 = vld [vmem:[%s8612_s30 + $0x71] sm:$0xff] }
  0x16   : > { %7291 = vmatpush3.bf16.msra.mxu0 %v655_v11  ;;  %7258 = vmatprep.mubr.msk.bf16.mxu0 %vm364_vm1, %v346_v12  ;;  %v350_v25 = vpack.c.bf16 %v321_v23, %v320_v22  ;;  %v323_v27 = vld [vmem:[%s8612_s30 + $0x79] sm:$0xff]  ;;  %v324_v28 = vld [vmem:[%s8612_s30 + $0x81] sm:$0xff]  ;;  %v325_v29 = vld [vmem:[%s8612_s30 + $0x89] sm:$0xff] }
  0x17   : > { %8514 = vmatprep.subr.msk.bf16.mxu0 %vm419_vm0, %v8625_v13  ;;  %v351_v30 = vpack.c.bf16 %v323_v27, %v322_v26  ;;  %v352_v31 = vpack.c.bf16 %v325_v29, %v324_v28  ;;  %v326_v32 = vld [vmem:[%s8612_s30 + $0x91] sm:$0xff]  ;;  %v327_v33 = vld [vmem:[%s8612_s30 + $0x99] sm:$0xff]  ;;  %v328_v34 = vld [vmem:[%s8612_s30 + $0xa1] sm:$0xff] }
  0x18   : > { %v329_v35 = vld [vmem:[%s8612_s30 + $0xa9] sm:$0xff]  ;;  %v353_v36 = vpack.c.bf16 %v327_v33, %v326_v32  ;;  %v330_v38 = vld [vmem:[%s8612_s30 + $0xb1] sm:$0xff]  ;;  %v331_v39 = vld [vmem:[%s8612_s30 + $0xb9] sm:$0xff] }
  0x19   : > { %v354_v37 = vpack.c.bf16 %v329_v35, %v328_v34  ;;  %v332_v40 = vld [vmem:[%s8612_s30 + $0xc1] sm:$0xff]  ;;  %v333_v41 = vld [vmem:[%s8612_s30 + $0xc9] sm:$0xff]  ;;  %v355_v42 = vpack.c.bf16 %v331_v39, %v330_v38  ;;  %v334_v44 = vld [vmem:[%s8612_s30 + $0xd1] sm:$0xff] }
  0x1a   : > { %v356_v43 = vpack.c.bf16 %v333_v41, %v332_v40  ;;  %v335_v45 = vld [vmem:[%s8612_s30 + $0xd9] sm:$0xff]  ;;  %v336_v46 = vld [vmem:[%s8612_s30 + $0xe1] sm:$0xff]  ;;  %v337_v47 = vld [vmem:[%s8612_s30 + $0xe9] sm:$0xff] }
  0x1b   : > { %v357_v48 = vpack.c.bf16 %v335_v45, %v334_v44  ;;  %v358_v49 = vpack.c.bf16 %v337_v47, %v336_v46  ;;  %v338_v50 = vld [vmem:[%s8612_s30 + $0xf1] sm:$0xff]  ;;  %v339_v51 = vld [vmem:[%s8612_s30 + $0xf9] sm:$0xff]  ;;  %v340_v52 = vld [vmem:[%s8612_s30 + $0x101] sm:$0xff] }
  0x1c   : > { %v341_v53 = vld [vmem:[%s8612_s30 + $0x109] sm:$0xff]  ;;  %v359_v54 = vpack.c.bf16 %v339_v51, %v338_v50  ;;  %v342_v56 = vld [vmem:[%s8612_s30 + $0x111] sm:$0xff]  ;;  %v343_v57 = vld [vmem:[%s8612_s30 + $0x119] sm:$0x3f] }
  0x1d   : > { %7259 = vmatmul.mubr.msk.bf16.gmra.mrb[4].mxu0 %vm364_vm1, %v347_v18  ;;  %v360_v55 = vpack.c.bf16 %v341_v53, %v340_v52  ;;  %v253_v58 = vld [vmem:[%s8612_s30] sm:$0xff]  ;;  %v254_v59 = vld [vmem:[%s8612_s30 + $0x8] sm:$0xff]  ;;  %v361_v60 = vpack.c.bf16 %v343_v57, %v342_v56  ;;  %v255_v62 = vld [vmem:[%s8612_s30 + $0x10] sm:$0xff] }
  0x1e   : > { %7262 = vmatprep.mubr.msk.bf16.mxu0 %vm364_vm1, %v348_v19  ;;  %v289_v61 = vpack.c.bf16 %v254_v59, %v253_v58  ;;  %v256_v63 = vld [vmem:[%s8612_s30 + $0x18] sm:$0xff]  ;;  %v257_v0 = vld [vmem:[%s8612_s30 + $0x20] sm:$0xff]  ;;  %v258_v1 = vld [vmem:[%s8612_s30 + $0x28] sm:$0xff] }
  0x1f   : > { %v290_v2 = vpack.c.bf16 %v256_v63, %v255_v62  ;;  %v291_v3 = vpack.c.bf16 %v258_v1, %v257_v0  ;;  %v8688_v5 = vld [vmem:[%s9791_s1 + $0x6] sm:$0x3]  ;;  %v259_v6 = vld [vmem:[%s8612_s30 + $0x30] sm:$0xff]  ;;  %v260_v7 = vld [vmem:[%s8612_s30 + $0x38] sm:$0xff] }
  0x20   : > { %v261_v8 = vld [vmem:[%s8612_s30 + $0x40] sm:$0xff]  ;;  %v262_v9 = vld [vmem:[%s8612_s30 + $0x48] sm:$0xff]  ;;  %v292_v10 = vpack.c.bf16 %v260_v7, %v259_v6  ;;  %v263_v12 = vld [vmem:[%s8612_s30 + $0x50] sm:$0xff] }
  0x21   : > { %v293_v11 = vpack.c.bf16 %v262_v9, %v261_v8  ;;  %v264_v13 = vld [vmem:[%s8612_s30 + $0x58] sm:$0xff]  ;;  %v265_v14 = vld [vmem:[%s8612_s30 + $0x60] sm:$0xff]  ;;  %v266_v15 = vld [vmem:[%s8612_s30 + $0x68] sm:$0xff] }
  0x22   : > { %v294_v16 = vpack.c.bf16 %v264_v13, %v263_v12  ;;  %v295_v17 = vpack.c.bf16 %v266_v15, %v265_v14  ;;  %v267_v18 = vld [vmem:[%s8612_s30 + $0x70] sm:$0xff]  ;;  %v268_v19 = vld [vmem:[%s8612_s30 + $0x78] sm:$0xff]  ;;  %v269_v20 = vld [vmem:[%s8612_s30 + $0x80] sm:$0xff] }
  0x23   : > { %v270_v21 = vld [vmem:[%s8612_s30 + $0x88] sm:$0xff]  ;;  %v296_v22 = vpack.c.bf16 %v268_v19, %v267_v18  ;;  %v273_v26 = vld [vmem:[%s8612_s30 + $0xa0] sm:$0xff]  ;;  %v840_v62 = vld [vmem:[%s8612_s30 + $0x32] sm:$0xff] }
  0x24   : > { %v297_v23 = vpack.c.bf16 %v270_v21, %v269_v20  ;;  %v274_v27 = vld [vmem:[%s8612_s30 + $0xa8] sm:$0xff]  ;;  %v277_v32 = vld [vmem:[%s8612_s30 + $0xc0] sm:$0xff] }
  0x25   : > { %7263 = vmatmul.mubr.msk.bf16.gmra.mrb[8].mxu0 %vm364_vm1, %v349_v24  ;;  %v271_v24 = vld [vmem:[%s8612_s30 + $0x90] sm:$0xff]  ;;  %v299_v29 = vpack.c.bf16 %v274_v27, %v273_v26  ;;  %v278_v33 = vld [vmem:[%s8612_s30 + $0xc8] sm:$0xff]  ;;  %v281_v38 = vld [vmem:[%s8612_s30 + $0xe0] sm:$0xff] }
  0x26   : > { %7266 = vmatprep.mubr.msk.bf16.mxu0 %vm364_vm1, %v350_v25  ;;  %v272_v25 = vld [vmem:[%s8612_s30 + $0x98] sm:$0xff]  ;;  %v301_v35 = vpack.c.bf16 %v278_v33, %v277_v32  ;;  %v282_v39 = vld [vmem:[%s8612_s30 + $0xe8] sm:$0xff]  ;;  %v285_v44 = vld [vmem:[%s8612_s30 + $0x100] sm:$0xff] }
  0x27   : > { %v298_v28 = vpack.c.bf16 %v272_v25, %v271_v24  ;;  %v303_v41 = vpack.c.bf16 %v282_v39, %v281_v38  ;;  %v286_v45 = vld [vmem:[%s8612_s30 + $0x108] sm:$0xff]  ;;  %v841_v63 = vld [vmem:[%s8612_s30 + $0x3a] sm:$0xff] }
  0x28   : > { %v305_v47 = vpack.c.bf16 %v286_v45, %v285_v44  ;;  %v834_v50 = vld [vmem:[%s8612_s30 + $0x2] sm:$0xff]  ;;  %v835_v51 = vld [vmem:[%s8612_s30 + $0xa] sm:$0xff]  ;;  %v1193_v45 = vld [vmem:[%s8612_s30 + $0x11a] sm:$0xff] }
  0x29   : > { %v870_v53 = vpack.c.bf16 %v835_v51, %v834_v50  ;;  %v838_v56 = vld [vmem:[%s8612_s30 + $0x22] sm:$0xff]  ;;  %v839_v57 = vld [vmem:[%s8612_s30 + $0x2a] sm:$0xff] }
  0x2a   : > { %v8748_v59 = vpack.c.bf16 %v839_v57, %v838_v56  ;;  %v842_v0 = vld [vmem:[%s8612_s30 + $0x42] sm:$0xff]  ;;  %v843_v1 = vld [vmem:[%s8612_s30 + $0x4a] sm:$0xff] }
  0x2b   : > { %v846_v6 = vld [vmem:[%s8612_s30 + $0x62] sm:$0xff]  ;;  %v847_v7 = vld [vmem:[%s8612_s30 + $0x6a] sm:$0xff] }
  0x2c   : > { %v876_v9 = vpack.c.bf16 %v847_v7, %v846_v6  ;;  %v850_v12 = vld [vmem:[%s8612_s30 + $0x82] sm:$0xff]  ;;  %v851_v13 = vld [vmem:[%s8612_s30 + $0x8a] sm:$0xff] }
  0x2d   : > { %7267 = vmatmul.mubr.msk.bf16.gmra.mrb[12].mxu0 %vm364_vm1, %v351_v30  ;;  %v275_v30 = vld [vmem:[%s8612_s30 + $0xb0] sm:$0xff]  ;;  %v878_v15 = vpack.c.bf16 %v851_v13, %v850_v12  ;;  %v854_v18 = vld [vmem:[%s8612_s30 + $0xa2] sm:$0xff]  ;;  %v6660_v44 = vld [vmem:[%s9791_s1 + $0xa] sm:$0x3] }
  0x2e   : > { %7270 = vmatprep.mubr.msk.bf16.mxu0 %vm364_vm1, %v352_v31  ;;  %v276_v31 = vld [vmem:[%s8612_s30 + $0xb8] sm:$0xff]  ;;  %v855_v19 = vld [vmem:[%s8612_s30 + $0xaa] sm:$0xff]  ;;  %v858_v24 = vld [vmem:[%s8612_s30 + $0xc2] sm:$0xff] }
  0x2f   : > { %v300_v34 = vpack.c.bf16 %v276_v31, %v275_v30  ;;  %v880_v21 = vpack.c.bf16 %v855_v19, %v854_v18  ;;  %v859_v25 = vld [vmem:[%s8612_s30 + $0xca] sm:$0xff]  ;;  %v862_v30 = vld [vmem:[%s8612_s30 + $0xe2] sm:$0xff] }
  0x30   : > { %v882_v27 = vpack.c.bf16 %v859_v25, %v858_v24  ;;  %v863_v31 = vld [vmem:[%s8612_s30 + $0xea] sm:$0xff]  ;;  %v1487_v50 = vld [vmem:[%s8612_s30 + $0x1b] sm:$0xff] }
  0x31   : > { %v884_v33 = vpack.c.bf16 %v863_v31, %v862_v30  ;;  %v1491_v56 = vld [vmem:[%s8612_s30 + $0x3b] sm:$0xff] }
  0x32   : > { %v1499_v6 = vld [vmem:[%s8612_s30 + $0x7b] sm:$0xff] }
  0x33   : > { %v1503_v12 = vld [vmem:[%s8612_s30 + $0x9b] sm:$0xff] }
  0x34   : > { %v1507_v18 = vld [vmem:[%s8612_s30 + $0xbb] sm:$0xff] }
  0x35   : > { %7271 = vmatmul.mubr.msk.bf16.gmra.mrb[16].mxu0 %vm364_vm1, %v353_v36  ;;  %v279_v36 = vld [vmem:[%s8612_s30 + $0xd0] sm:$0xff]  ;;  %v1511_v24 = vld [vmem:[%s8612_s30 + $0xdb] sm:$0xff] }
  0x36   : > { %7274 = vmatprep.mubr.msk.bf16.mxu0 %vm364_vm1, %v354_v37  ;;  %v280_v37 = vld [vmem:[%s8612_s30 + $0xd8] sm:$0xff] }
  0x37   : > { %v302_v40 = vpack.c.bf16 %v280_v37, %v279_v36  ;;  %v866_v36 = vld [vmem:[%s8612_s30 + $0x102] sm:$0xff]  ;;  %v867_v37 = vld [vmem:[%s8612_s30 + $0x10a] sm:$0xff] }
  0x38   : > { %v886_v39 = vpack.c.bf16 %v867_v37, %v866_v36  ;;  %v1515_v30 = vld [vmem:[%s8612_s30 + $0xfb] sm:$0xff] }
  0x39   : > { %v1519_v36 = vld [vmem:[%s8612_s30 + $0x11b] sm:$0xff] }
  0x3d   : > { %7275 = vmatmul.mubr.msk.bf16.gmra.mrb[20].mxu0 %vm364_vm1, %v355_v42  ;;  %v283_v42 = vld [vmem:[%s8612_s30 + $0xf0] sm:$0xff] }
  0x3e   : > { %7278 = vmatprep.mubr.msk.bf16.mxu0 %vm364_vm1, %v356_v43  ;;  %v284_v43 = vld [vmem:[%s8612_s30 + $0xf8] sm:$0xff] }
  0x3f   : > { %v304_v46 = vpack.c.bf16 %v284_v43, %v283_v42 }
  0x45   : > { %7279 = vmatmul.mubr.msk.bf16.gmra.mrb[24].mxu0 %vm364_vm1, %v357_v48  ;;  %v287_v48 = vld [vmem:[%s8612_s30 + $0x110] sm:$0xff] }
  0x46   : > { %7282 = vmatprep.mubr.msk.bf16.mxu0 %vm364_vm1, %v358_v49  ;;  %v288_v49 = vld [vmem:[%s8612_s30 + $0x118] sm:$0x3f] }
  0x47   : > { %v306_v52 = vpack.c.bf16 %v288_v49, %v287_v48  ;;  %v1195_v48 = vld [vmem:[%s8612_s30 + $0x12a] sm:$0x3f]  ;;  %v1486_v49 = vld [vmem:[%s8612_s30 + $0x13] sm:$0xff] }
  0x4d   : > { %7283 = vmatmul.mubr.msk.bf16.gmra.mrb[28].mxu0 %vm364_vm1, %v359_v54  ;;  %v836_v54 = vld [vmem:[%s8612_s30 + $0x12] sm:$0xff] }
  0x4e   : > { %7286 = vmatprep.mubr.msk.bf16.mxu0 %vm364_vm1, %v360_v55  ;;  %v837_v55 = vld [vmem:[%s8612_s30 + $0x1a] sm:$0xff] }
  0x4f   : > { %v8746_v58 = vpack.c.bf16 %v837_v55, %v836_v54  ;;  %v1489_v54 = vld [vmem:[%s8612_s30 + $0x2b] sm:$0xff]  ;;  %v1490_v55 = vld [vmem:[%s8612_s30 + $0x33] sm:$0xff] }
  0x55   : > { %7287 = vmatmul.mubr.msk.bf16.gmra.mrb[32].mxu0 %vm364_vm1, %v361_v60  ;;  %v1271_v60 = vsel %vm419_vm0, %v8688_v5, 0 }
  0x56   : > { %7292 = vmatprep.mubr.msk.bf16.mxu0 %vm364_vm1, %v289_v61  ;;  %v8755_v61 = vld [vmem:[%s9791_s1 + $0x8] sm:$0x3] }
  0x57   : > { %v1597_v43 = vsel %vm419_vm0, %v8755_v61, 0 }
  0x5d   : > { %7293 = vmatmul.mubr.msk.bf16.vlgmr.msra.gmra.mrb[0].mxu0 %vm364_vm1, %v290_v2  ;;  %v873_v2 = vpack.c.bf16 %v841_v63, %v840_v62  ;;  %v1493_v62 = vld [vmem:[%s8612_s30 + $0x4b] sm:$0xff]  ;;  %v1494_v63 = vld [vmem:[%s8612_s30 + $0x53] sm:$0xff] }
  0x5e   : > { %7329 = vmatpush3.bf16.msra.mxu0 %v945_v4  ;;  %7296 = vmatprep.mubr.msk.bf16.mxu0 %vm364_vm1, %v291_v3  ;;  %v874_v3 = vpack.c.bf16 %v843_v1, %v842_v0  ;;  %v844_v4 = vld [vmem:[%s8612_s30 + $0x52] sm:$0xff]  ;;  %v1495_v0 = vld [vmem:[%s8612_s30 + $0x5b] sm:$0xff] }
  0x5f   : > { %8515 = vmatprep.subr.msk.bf16.mxu0 %vm419_vm0, %v8688_v5  ;;  %v845_v5 = vld [vmem:[%s8612_s30 + $0x5a] sm:$0xff] }
  0x60   : > { %v875_v8 = vpack.c.bf16 %v845_v5, %v844_v4  ;;  %v1497_v4 = vld [vmem:[%s8612_s30 + $0x6b] sm:$0xff]  ;;  %v1498_v5 = vld [vmem:[%s8612_s30 + $0x73] sm:$0xff] }
  0x65   : > { %7297 = vmatmul.mubr.msk.bf16.gmra.mrb[4].mxu0 %vm364_vm1, %v292_v10  ;;  %v848_v10 = vld [vmem:[%s8612_s30 + $0x72] sm:$0xff] }
  0x66   : > { %7300 = vmatprep.mubr.msk.bf16.mxu0 %vm364_vm1, %v293_v11  ;;  %v849_v11 = vld [vmem:[%s8612_s30 + $0x7a] sm:$0xff] }
  0x67   : > { %v877_v14 = vpack.c.bf16 %v849_v11, %v848_v10  ;;  %v1501_v10 = vld [vmem:[%s8612_s30 + $0x8b] sm:$0xff]  ;;  %v1502_v11 = vld [vmem:[%s8612_s30 + $0x93] sm:$0xff] }
  0x6d   : > { %7301 = vmatmul.mubr.msk.bf16.gmra.mrb[8].mxu0 %vm364_vm1, %v294_v16  ;;  %v852_v16 = vld [vmem:[%s8612_s30 + $0x92] sm:$0xff] }
  0x6e   : > { %7304 = vmatprep.mubr.msk.bf16.mxu0 %vm364_vm1, %v295_v17  ;;  %v853_v17 = vld [vmem:[%s8612_s30 + $0x9a] sm:$0xff] }
  0x6f   : > { %v879_v20 = vpack.c.bf16 %v853_v17, %v852_v16  ;;  %v1505_v16 = vld [vmem:[%s8612_s30 + $0xab] sm:$0xff]  ;;  %v1506_v17 = vld [vmem:[%s8612_s30 + $0xb3] sm:$0xff] }
  0x75   : > { %7305 = vmatmul.mubr.msk.bf16.gmra.mrb[12].mxu0 %vm364_vm1, %v296_v22  ;;  %v856_v22 = vld [vmem:[%s8612_s30 + $0xb2] sm:$0xff] }
  0x76   : > { %7308 = vmatprep.mubr.msk.bf16.mxu0 %vm364_vm1, %v297_v23  ;;  %v857_v23 = vld [vmem:[%s8612_s30 + $0xba] sm:$0xff] }
  0x77   : > { %v881_v26 = vpack.c.bf16 %v857_v23, %v856_v22  ;;  %v1509_v22 = vld [vmem:[%s8612_s30 + $0xcb] sm:$0xff]  ;;  %v1510_v23 = vld [vmem:[%s8612_s30 + $0xd3] sm:$0xff] }
  0x7d   : > { %7309 = vmatmul.mubr.msk.bf16.gmra.mrb[16].mxu0 %vm364_vm1, %v298_v28  ;;  %v860_v28 = vld [vmem:[%s8612_s30 + $0xd2] sm:$0xff] }
  0x7e   : > { %7312 = vmatprep.mubr.msk.bf16.mxu0 %vm364_vm1, %v299_v29  ;;  %v861_v29 = vld [vmem:[%s8612_s30 + $0xda] sm:$0xff] }
  0x7f   : > { %v883_v32 = vpack.c.bf16 %v861_v29, %v860_v28  ;;  %v1513_v28 = vld [vmem:[%s8612_s30 + $0xeb] sm:$0xff]  ;;  %v1514_v29 = vld [vmem:[%s8612_s30 + $0xf3] sm:$0xff] }
  0x85   : > { %7313 = vmatmul.mubr.msk.bf16.gmra.mrb[20].mxu0 %vm364_vm1, %v300_v34  ;;  %v864_v34 = vld [vmem:[%s8612_s30 + $0xf2] sm:$0xff] }
  0x86   : > { %7316 = vmatprep.mubr.msk.bf16.mxu0 %vm364_vm1, %v301_v35  ;;  %v865_v35 = vld [vmem:[%s8612_s30 + $0xfa] sm:$0xff] }
  0x87   : > { %v885_v38 = vpack.c.bf16 %v865_v35, %v864_v34  ;;  %v1517_v34 = vld [vmem:[%s8612_s30 + $0x10b] sm:$0xff]  ;;  %v1518_v35 = vld [vmem:[%s8612_s30 + $0x113] sm:$0xff] }
  0x8d   : > { %7317 = vmatmul.mubr.msk.bf16.gmra.mrb[24].mxu0 %vm364_vm1, %v302_v40  ;;  %v868_v40 = vld [vmem:[%s8612_s30 + $0x112] sm:$0xff] }
  0x8e   : > { %7320 = vmatprep.mubr.msk.bf16.mxu0 %vm364_vm1, %v303_v41  ;;  %v869_v41 = vld [vmem:[%s8612_s30 + $0x11a] sm:$0x3f] }
  0x8f   : > { %v887_v42 = vpack.c.bf16 %v869_v41, %v868_v40  ;;  %v1812_v41 = vld [vmem:[%s8612_s30 + $0x14] sm:$0xff] }
  0x95   : > { %7321 = vmatmul.mubr.msk.bf16.gmra.mrb[28].mxu0 %vm364_vm1, %v304_v46  ;;  %v1212_v46 = vpack.c.bf16 %v1193_v45, %v868_v40  ;;  %v1521_v40 = vld [vmem:[%s8612_s30 + $0x12b] sm:$0x3f] }
  0x96   : > { %7324 = vmatprep.mubr.msk.bf16.mxu0 %vm364_vm1, %v305_v47  ;;  %v1194_v47 = vld [vmem:[%s8612_s30 + $0x122] sm:$0xff] }
  0x97   : > { %v1213_v51 = vpack.c.bf16 %v1195_v48, %v1194_v47  ;;  %v1814_v45 = vld [vmem:[%s8612_s30 + $0x24] sm:$0xff]  ;;  %v1816_v47 = vld [vmem:[%s8612_s30 + $0x34] sm:$0xff]  ;;  %v1817_v48 = vld [vmem:[%s8612_s30 + $0x3c] sm:$0xff] }
  0x9d   : > { %7325 = vmatmul.mubr.msk.bf16.gmra.mrb[32].mxu0 %vm364_vm1, %v306_v52  ;;  %v1522_v52 = vpack.c.bf16 %v1487_v50, %v1486_v49  ;;  %v8908_v50 = vpack.c.bf16 %v1817_v48, %v1816_v47  ;;  %v3204_v47 = vld [vmem:[%s9795_s5 + $0x48] sm:$0xff]  ;;  %v3205_v48 = vld [vmem:[%s9795_s5 + $0x50] sm:$0xff] }
  0x9e   : > { %7330 = vmatprep.mubr.msk.bf16.mxu0 %vm364_vm1, %v870_v53  ;;  %v1488_v53 = vld [vmem:[%s8612_s30 + $0x23] sm:$0xff] }
  0x9f   : > { %v1523_v57 = vpack.c.bf16 %v1489_v54, %v1488_v53  ;;  %v1818_v53 = vld [vmem:[%s8612_s30 + $0x44] sm:$0xff]  ;;  %v1819_v54 = vld [vmem:[%s8612_s30 + $0x4c] sm:$0xff] }
  0xa5   : > { %7331 = vmatmul.mubr.msk.bf16.vlgmr.msra.gmra.mrb[0].mxu0 %vm364_vm1, %v8746_v58 }
  0xa6   : > { %7367 = vmatpush3.bf16.msra.mxu0 %v1271_v60  ;;  %7334 = vmatprep.mubr.msk.bf16.mxu0 %vm364_vm1, %v8748_v59  ;;  %v8848_v60 = vld [vmem:[%s9791_s1 + $0xc] sm:$0x3] }
  0xa7   : > { %8516 = vmatprep.subr.msk.bf16.mxu0 %vm419_vm0, %v8755_v61  ;;  %v1492_v61 = vld [vmem:[%s8612_s30 + $0x43] sm:$0xff] }
  0xa8   : > { %v1525_v1 = vpack.c.bf16 %v1493_v62, %v1492_v61  ;;  %v1824_v61 = vld [vmem:[%s8612_s30 + $0x74] sm:$0xff]  ;;  %v1825_v62 = vld [vmem:[%s8612_s30 + $0x7c] sm:$0xff] }
  0xad   : > { %7335 = vmatmul.mubr.msk.bf16.gmra.mrb[4].mxu0 %vm364_vm1, %v873_v2 }
  0xae   : > { %7338 = vmatprep.mubr.msk.bf16.mxu0 %vm364_vm1, %v874_v3 }
  0xb5   : > { %7339 = vmatmul.mubr.msk.bf16.gmra.mrb[8].mxu0 %vm364_vm1, %v875_v8 }
  0xb6   : > { %7342 = vmatprep.mubr.msk.bf16.mxu0 %vm364_vm1, %v876_v9 }
  0xbd   : > { %7343 = vmatmul.mubr.msk.bf16.gmra.mrb[12].mxu0 %vm364_vm1, %v877_v14 }
  0xbe   : > { %7346 = vmatprep.mubr.msk.bf16.mxu0 %vm364_vm1, %v878_v15 }
  0xc5   : > { %7347 = vmatmul.mubr.msk.bf16.gmra.mrb[16].mxu0 %vm364_vm1, %v879_v20 }
  0xc6   : > { %7350 = vmatprep.mubr.msk.bf16.mxu0 %vm364_vm1, %v880_v21 }
  0xcd   : > { %7351 = vmatmul.mubr.msk.bf16.gmra.mrb[20].mxu0 %vm364_vm1, %v881_v26 }
  0xce   : > { %7354 = vmatprep.mubr.msk.bf16.mxu0 %vm364_vm1, %v882_v27 }
  0xd5   : > { %7355 = vmatmul.mubr.msk.bf16.gmra.mrb[24].mxu0 %vm364_vm1, %v883_v32 }
  0xd6   : > { %7358 = vmatprep.mubr.msk.bf16.mxu0 %vm364_vm1, %v884_v33 }
  0xdd   : > { %7359 = vmatmul.mubr.msk.bf16.gmra.mrb[28].mxu0 %vm364_vm1, %v885_v38 }
  0xde   : > { %7362 = vmatprep.mubr.msk.bf16.mxu0 %vm364_vm1, %v886_v39 }
  0xe5   : > { %7363 = vmatmul.mubr.msk.bf16.gmra.mrb[32].mxu0 %vm364_vm1, %v887_v42  ;;  %v1813_v42 = vld [vmem:[%s8612_s30 + $0x1c] sm:$0xff] }
  0xe6   : > { %7368 = vmatprep.mubr.msk.bf16.mxu0 %vm364_vm1, %v8746_v58  ;;  %v1524_v58 = vpack.c.bf16 %v1491_v56, %v1490_v55  ;;  %v1820_v55 = vld [vmem:[%s8612_s30 + $0x54] sm:$0xff]  ;;  %v1821_v56 = vld [vmem:[%s8612_s30 + $0x5c] sm:$0xff] }
  0xed   : > { %7369 = vmatmul.mubr.msk.bf16.vlgmr.msra.gmra.mrb[0].mxu0 %vm364_vm1, %v8748_v59  ;;  %v1923_v59 = vsel %vm419_vm0, %v6660_v44, 0 }
  0xee   : > { %7405 = vmatpush3.bf16.msra.mxu0 %v1597_v43  ;;  %7372 = vmatprep.mubr.msk.bf16.mxu0 %vm364_vm1, %v873_v2  ;;  %v1526_v2 = vpack.c.bf16 %v1495_v0, %v1494_v63  ;;  %v1854_v0 = vpack.c.bf16 %v1825_v62, %v1824_v61  ;;  %v3211_v61 = vld [vmem:[%s9795_s5 + $0x80] sm:$0xff]  ;;  %v2466_v62 = vld [vmem:[%s8612_s30 + $0x35] sm:$0xff] }
  0xef   : > { %8517 = vmatprep.subr.msk.bf16.mxu0 %vm419_vm0, %v6660_v44  ;;  %v1848_v44 = vpack.c.bf16 %v1813_v42, %v1812_v41  ;;  %v3199_v41 = vld [vmem:[%s9795_s5 + $0x20] sm:$0xff]  ;;  %v3200_v42 = vld [vmem:[%s9795_s5 + $0x28] sm:$0xff] }
  0xf5   : > { %7373 = vmatmul.mubr.msk.bf16.gmra.mrb[4].mxu0 %vm364_vm1, %v874_v3  ;;  %v1496_v3 = vld [vmem:[%s8612_s30 + $0x63] sm:$0xff] }
  0xf6   : > { %7376 = vmatprep.mubr.msk.bf16.mxu0 %vm364_vm1, %v875_v8  ;;  %v1527_v7 = vpack.c.bf16 %v1497_v4, %v1496_v3  ;;  %v1528_v8 = vpack.c.bf16 %v1499_v6, %v1498_v5  ;;  %v1828_v3 = vld [vmem:[%s8612_s30 + $0x94] sm:$0xff]  ;;  %v1829_v4 = vld [vmem:[%s8612_s30 + $0x9c] sm:$0xff] }
  0xf7   : > { %v1856_v6 = vpack.c.bf16 %v1829_v4, %v1828_v3  ;;  %v3213_v3 = vld [vmem:[%s9795_s5 + $0x90] sm:$0xff] }
  0xfd   : > { %7377 = vmatmul.mubr.msk.bf16.gmra.mrb[8].mxu0 %vm364_vm1, %v876_v9  ;;  %v1500_v9 = vld [vmem:[%s8612_s30 + $0x83] sm:$0xff] }
  0xfe   : > { %7380 = vmatprep.mubr.msk.bf16.mxu0 %vm364_vm1, %v877_v14  ;;  %v1529_v13 = vpack.c.bf16 %v1501_v10, %v1500_v9  ;;  %v1530_v14 = vpack.c.bf16 %v1503_v12, %v1502_v11  ;;  %v1832_v9 = vld [vmem:[%s8612_s30 + $0xb4] sm:$0xff]  ;;  %v1833_v10 = vld [vmem:[%s8612_s30 + $0xbc] sm:$0xff] }
  0xff   : > { %v1858_v12 = vpack.c.bf16 %v1833_v10, %v1832_v9  ;;  %v2470_v9 = vld [vmem:[%s8612_s30 + $0x55] sm:$0xff]  ;;  %v2471_v10 = vld [vmem:[%s8612_s30 + $0x5d] sm:$0xff] }
 0x105   : > { %7381 = vmatmul.mubr.msk.bf16.gmra.mrb[12].mxu0 %vm364_vm1, %v878_v15  ;;  %v1504_v15 = vld [vmem:[%s8612_s30 + $0xa3] sm:$0xff] }
 0x106   : > { %7384 = vmatprep.mubr.msk.bf16.mxu0 %vm364_vm1, %v879_v20  ;;  %v1531_v19 = vpack.c.bf16 %v1505_v16, %v1504_v15  ;;  %v1532_v20 = vpack.c.bf16 %v1507_v18, %v1506_v17  ;;  %v1836_v15 = vld [vmem:[%s8612_s30 + $0xd4] sm:$0xff]  ;;  %v1837_v16 = vld [vmem:[%s8612_s30 + $0xdc] sm:$0xff] }
 0x107   : > { %v1860_v18 = vpack.c.bf16 %v1837_v16, %v1836_v15  ;;  %v2503_v15 = vpack.c.bf16 %v2471_v10, %v2470_v9  ;;  %v2793_v9 = vld [vmem:[%s8612_s30 + $0x3e] sm:$0xff]  ;;  %v2794_v10 = vld [vmem:[%s8612_s30 + $0x46] sm:$0xff] }
 0x10d   : > { %7385 = vmatmul.mubr.msk.bf16.gmra.mrb[16].mxu0 %vm364_vm1, %v880_v21  ;;  %v1508_v21 = vld [vmem:[%s8612_s30 + $0xc3] sm:$0xff] }
 0x10e   : > { %7388 = vmatprep.mubr.msk.bf16.mxu0 %vm364_vm1, %v881_v26  ;;  %v1533_v25 = vpack.c.bf16 %v1509_v22, %v1508_v21  ;;  %v1534_v26 = vpack.c.bf16 %v1511_v24, %v1510_v23  ;;  %v1840_v21 = vld [vmem:[%s8612_s30 + $0xf4] sm:$0xff]  ;;  %v1841_v22 = vld [vmem:[%s8612_s30 + $0xfc] sm:$0xff] }
 0x10f   : > { %v1862_v24 = vpack.c.bf16 %v1841_v22, %v1840_v21  ;;  %v2476_v21 = vld [vmem:[%s8612_s30 + $0x85] sm:$0xff]  ;;  %v2477_v22 = vld [vmem:[%s8612_s30 + $0x8d] sm:$0xff] }
 0x115   : > { %7389 = vmatmul.mubr.msk.bf16.gmra.mrb[20].mxu0 %vm364_vm1, %v882_v27  ;;  %v1512_v27 = vld [vmem:[%s8612_s30 + $0xe3] sm:$0xff] }
 0x116   : > { %7392 = vmatprep.mubr.msk.bf16.mxu0 %vm364_vm1, %v883_v32  ;;  %v1535_v31 = vpack.c.bf16 %v1513_v28, %v1512_v27  ;;  %v1536_v32 = vpack.c.bf16 %v1515_v30, %v1514_v29  ;;  %v1844_v27 = vld [vmem:[%s8612_s30 + $0x114] sm:$0xff]  ;;  %v1845_v28 = vld [vmem:[%s8612_s30 + $0x11c] sm:$0xff] }
 0x117   : > { %v1864_v30 = vpack.c.bf16 %v1845_v28, %v1844_v27  ;;  %v3222_v27 = vld [vmem:[%s9795_s5 + $0xd8] sm:$0xff]  ;;  %v3223_v28 = vld [vmem:[%s9795_s5 + $0xe0] sm:$0xff] }
 0x11d   : > { %7393 = vmatmul.mubr.msk.bf16.gmra.mrb[24].mxu0 %vm364_vm1, %v884_v33  ;;  %v1516_v33 = vld [vmem:[%s8612_s30 + $0x103] sm:$0xff] }
 0x11e   : > { %7396 = vmatprep.mubr.msk.bf16.mxu0 %vm364_vm1, %v885_v38  ;;  %v1537_v37 = vpack.c.bf16 %v1517_v34, %v1516_v33  ;;  %v1538_v38 = vpack.c.bf16 %v1519_v36, %v1518_v35  ;;  %v8975_v35 = vld [vmem:[%s9791_s1 + $0x10] sm:$0x3]  ;;  %v3195_v36 = vld [vmem:[%s9795_s5] sm:$0xff] }
 0x125   : > { %7397 = vmatmul.mubr.msk.bf16.gmra.mrb[28].mxu0 %vm364_vm1, %v886_v39  ;;  %v1520_v39 = vld [vmem:[%s8612_s30 + $0x123] sm:$0xff] }
 0x126   : > { %7400 = vmatprep.mubr.msk.bf16.mxu0 %vm364_vm1, %v1212_v46  ;;  %v1539_v43 = vpack.c.bf16 %v1521_v40, %v1520_v39  ;;  %v1815_v46 = vld [vmem:[%s8612_s30 + $0x2c] sm:$0xff]  ;;  %v3198_v40 = vld [vmem:[%s9795_s5 + $0x18] sm:$0xff] }
 0x127   : > { %v8906_v49 = vpack.c.bf16 %v1815_v46, %v1814_v45  ;;  %v3196_v39 = vld [vmem:[%s9795_s5 + $0x8] sm:$0xff]  ;;  %v3203_v45 = vld [vmem:[%s9795_s5 + $0x40] sm:$0xff] }
 0x128   : > { %v2171_v46 = vld [vmem:[%s8612_s30 + $0x12c] sm:$0xff] }
 0x12d   : > { %7401 = vmatmul.mubr.msk.bf16.gmra.mrb[32].mxu0 %vm364_vm1, %v1213_v51  ;;  %v2249_v51 = vsel %vm419_vm0, %v8848_v60, 0 }
 0x12e   : > { %7406 = vmatprep.mubr.msk.bf16.mxu0 %vm364_vm1, %v1522_v52  ;;  %v8915_v52 = vld [vmem:[%s9791_s1 + $0xe] sm:$0x3] }
 0x12f   : > { %v2575_v34 = vsel %vm419_vm0, %v8915_v52, 0 }
 0x135   : > { %7407 = vmatmul.mubr.msk.bf16.vlgmr.msra.gmra.mrb[0].mxu0 %vm364_vm1, %v1523_v57  ;;  %v1851_v57 = vpack.c.bf16 %v1819_v54, %v1818_v53  ;;  %v2173_v53 = vld [vmem:[%s8612_s30 + $0x13c] sm:$0x3f]  ;;  %v2464_v54 = vld [vmem:[%s8612_s30 + $0x25] sm:$0xff] }
 0x136   : > { %7443 = vmatpush3.bf16.msra.mxu0 %v1923_v59  ;;  %7410 = vmatprep.mubr.msk.bf16.mxu0 %vm364_vm1, %v1524_v58  ;;  %v1852_v58 = vpack.c.bf16 %v1821_v56, %v1820_v55  ;;  %v1822_v59 = vld [vmem:[%s8612_s30 + $0x64] sm:$0xff]  ;;  %v2465_v55 = vld [vmem:[%s8612_s30 + $0x2d] sm:$0xff] }
 0x137   : > { %8518 = vmatprep.subr.msk.bf16.mxu0 %vm419_vm0, %v8848_v60  ;;  %v1823_v60 = vld [vmem:[%s8612_s30 + $0x6c] sm:$0xff] }
 0x138   : > { %v1853_v63 = vpack.c.bf16 %v1823_v60, %v1822_v59  ;;  %v3208_v56 = vld [vmem:[%s9795_s5 + $0x68] sm:$0xff]  ;;  %v2500_v59 = vpack.c.bf16 %v2465_v55, %v2464_v54  ;;  %v3210_v60 = vld [vmem:[%s9795_s5 + $0x78] sm:$0xff] }
 0x139   : > { %v2490_v54 = vld [vmem:[%s8612_s30 + $0xf5] sm:$0xff]  ;;  %v2491_v55 = vld [vmem:[%s8612_s30 + $0xfd] sm:$0xff] }
 0x13d   : > { %7411 = vmatmul.mubr.msk.bf16.gmra.mrb[4].mxu0 %vm364_vm1, %v1525_v1  ;;  %v1826_v1 = vld [vmem:[%s8612_s30 + $0x84] sm:$0xff] }
 0x13e   : > { %7414 = vmatprep.mubr.msk.bf16.mxu0 %vm364_vm1, %v1526_v2  ;;  %v1827_v2 = vld [vmem:[%s8612_s30 + $0x8c] sm:$0xff] }
 0x13f   : > { %v1855_v5 = vpack.c.bf16 %v1827_v2, %v1826_v1  ;;  %v2469_v1 = vld [vmem:[%s8612_s30 + $0x4d] sm:$0xff] }
 0x140   : > { %v3212_v2 = vld [vmem:[%s9795_s5 + $0x88] sm:$0xff] }
 0x145   : > { %7415 = vmatmul.mubr.msk.bf16.gmra.mrb[8].mxu0 %vm364_vm1, %v1527_v7  ;;  %v1830_v7 = vld [vmem:[%s8612_s30 + $0xa4] sm:$0xff] }
 0x146   : > { %7418 = vmatprep.mubr.msk.bf16.mxu0 %vm364_vm1, %v1528_v8  ;;  %v1831_v8 = vld [vmem:[%s8612_s30 + $0xac] sm:$0xff] }
 0x147   : > { %v1857_v11 = vpack.c.bf16 %v1831_v8, %v1830_v7  ;;  %v3214_v7 = vld [vmem:[%s9795_s5 + $0x98] sm:$0xff]  ;;  %v3215_v8 = vld [vmem:[%s9795_s5 + $0xa0] sm:$0xff] }
 0x14d   : > { %7419 = vmatmul.mubr.msk.bf16.gmra.mrb[12].mxu0 %vm364_vm1, %v1529_v13  ;;  %v1834_v13 = vld [vmem:[%s8612_s30 + $0xc4] sm:$0xff] }
 0x14e   : > { %7422 = vmatprep.mubr.msk.bf16.mxu0 %vm364_vm1, %v1530_v14  ;;  %v1835_v14 = vld [vmem:[%s8612_s30 + $0xcc] sm:$0xff] }
 0x14f   : > { %v1859_v17 = vpack.c.bf16 %v1835_v14, %v1834_v13  ;;  %v3216_v13 = vld [vmem:[%s9795_s5 + $0xa8] sm:$0xff]  ;;  %v3217_v14 = vld [vmem:[%s9795_s5 + $0xb0] sm:$0xff] }
 0x155   : > { %7423 = vmatmul.mubr.msk.bf16.gmra.mrb[16].mxu0 %vm364_vm1, %v1531_v19  ;;  %v1838_v19 = vld [vmem:[%s8612_s30 + $0xe4] sm:$0xff] }
 0x156   : > { %7426 = vmatprep.mubr.msk.bf16.mxu0 %vm364_vm1, %v1532_v20  ;;  %v1839_v20 = vld [vmem:[%s8612_s30 + $0xec] sm:$0xff] }
 0x157   : > { %v1861_v23 = vpack.c.bf16 %v1839_v20, %v1838_v19  ;;  %v2474_v19 = vld [vmem:[%s8612_s30 + $0x75] sm:$0xff]  ;;  %v2475_v20 = vld [vmem:[%s8612_s30 + $0x7d] sm:$0xff] }
 0x15d   : > { %7427 = vmatmul.mubr.msk.bf16.gmra.mrb[20].mxu0 %vm364_vm1, %v1533_v25  ;;  %v1842_v25 = vld [vmem:[%s8612_s30 + $0x104] sm:$0xff] }
 0x15e   : > { %7430 = vmatprep.mubr.msk.bf16.mxu0 %vm364_vm1, %v1534_v26  ;;  %v1843_v26 = vld [vmem:[%s8612_s30 + $0x10c] sm:$0xff] }
 0x15f   : > { %v1863_v29 = vpack.c.bf16 %v1843_v26, %v1842_v25  ;;  %v2505_v25 = vpack.c.bf16 %v2475_v20, %v2474_v19  ;;  %v2506_v26 = vpack.c.bf16 %v2477_v22, %v2476_v21  ;;  %v2800_v20 = vld [vmem:[%s8612_s30 + $0x76] sm:$0xff]  ;;  %v2801_v21 = vld [vmem:[%s8612_s30 + $0x7e] sm:$0xff]  ;;  %v2802_v22 = vld [vmem:[%s8612_s30 + $0x86] sm:$0xff] }
 0x165   : > { %7431 = vmatmul.mubr.msk.bf16.gmra.mrb[24].mxu0 %vm364_vm1, %v1535_v31  ;;  %v1846_v31 = vld [vmem:[%s8612_s30 + $0x124] sm:$0xff] }
 0x166   : > { %7434 = vmatprep.mubr.msk.bf16.mxu0 %vm364_vm1, %v1536_v32  ;;  %v1847_v32 = vld [vmem:[%s8612_s30 + $0x12c] sm:$0x3f] }
 0x167   : > { %v1865_v33 = vpack.c.bf16 %v1847_v32, %v1846_v31  ;;  %v2481_v32 = vld [vmem:[%s8612_s30 + $0xad] sm:$0xff] }
 0x16d   : > { %7435 = vmatmul.mubr.msk.bf16.gmra.mrb[28].mxu0 %vm364_vm1, %v1537_v37  ;;  %v3197_v37 = vld [vmem:[%s9795_s5 + $0x10] sm:$0xff] }
 0x16e   : > { %7438 = vmatprep.mubr.msk.bf16.mxu0 %vm364_vm1, %v1538_v38  ;;  %v8552_v38 = vmov 0  }
 0x16f   : > { %8542 = vset.pattern.permute.xlu0 %v8552_v38  ;;  %8543 = vset.pattern.permute.xlu1 %v8552_v38  ;;  %v3227_v38 = vld [vmem:[%s9795_s5 + $0x100] sm:$0xff] }
 0x170   : > { %3233 = vperm.xlu0 %8542, %v3195_v36   ;;  %3243 = vperm.xlu1 %8543, %v3197_v37   ;;  %v3226_v37 = vld [vmem:[%s9795_s5 + $0xf8] sm:$0xff] }
 0x174   : > { %3238 = vperm.xlu0 %8542, %v3196_v39   ;;  %3248 = vperm.xlu1 %8543, %v3198_v40   ;;  %v2482_v39 = vld [vmem:[%s8612_s30 + $0xb5] sm:$0xff]  ;;  %v2483_v40 = vld [vmem:[%s8612_s30 + $0xbd] sm:$0xff] }
 0x175   : > { %7439 = vmatmul.mubr.msk.bf16.gmra.mrb[32].mxu0 %vm364_vm1, %v1539_v43  ;;  %v3201_v43 = vld [vmem:[%s9795_s5 + $0x30] sm:$0xff] }
 0x176   : > { %7444 = vmatprep.mubr.msk.bf16.mxu0 %vm364_vm1, %v1848_v44  ;;  %v3202_v44 = vld [vmem:[%s9795_s5 + $0x38] sm:$0xff] }
 0x178   : > { %3253 = vperm.xlu0 %8542, %v3199_v41   ;;  %3258 = vperm.xlu1 %8543, %v3200_v42   ;;  %v2484_v41 = vld [vmem:[%s8612_s30 + $0xc5] sm:$0xff]  ;;  %v2485_v42 = vld [vmem:[%s8612_s30 + $0xcd] sm:$0xff] }
 0x17c   : > { %3263 = vperm.xlu0 %8542, %v3201_v43   ;;  %3268 = vperm.xlu1 %8543, %v3202_v44   ;;  %v3228_v43 = vld [vmem:[%s9795_s5 + $0x108] sm:$0xff]  ;;  %v3229_v44 = vld [vmem:[%s9795_s5 + $0x110] sm:$0xff] }
 0x17d   : > { %7445 = vmatmul.mubr.msk.bf16.vlgmr.msra.gmra.mrb[0].mxu0 %vm364_vm1, %v8906_v49 }
 0x17e   : > { %7481 = vmatpush3.bf16.msra.mxu0 %v2249_v51  ;;  %7448 = vmatprep.mubr.msk.bf16.mxu0 %vm364_vm1, %v8908_v50  ;;  %v3207_v51 = vld [vmem:[%s9795_s5 + $0x60] sm:$0xff] }
 0x17f   : > { %8519 = vmatprep.subr.msk.bf16.mxu0 %vm419_vm0, %v8915_v52  ;;  %v2172_v52 = vld [vmem:[%s8612_s30 + $0x134] sm:$0xff] }
 0x180   : > { %3273 = vperm.xlu0 %8542, %v3203_v45   ;;  %3278 = vperm.xlu1 %8543, %v3204_v47   ;;  %v2509_v45 = vpack.c.bf16 %v2483_v40, %v2482_v39  ;;  %v3230_v47 = vld [vmem:[%s9795_s5 + $0x118] sm:$0x3f]  ;;  %v2813_v39 = vld [vmem:[%s8612_s30 + $0xde] sm:$0xff]  ;;  %v2814_v40 = vld [vmem:[%s8612_s30 + $0xe6] sm:$0xff] }
 0x184   : > { %3283 = vperm.xlu0 %8542, %v3205_v48   ;;  %v2486_v48 = vld [vmem:[%s8612_s30 + $0xd5] sm:$0xff] }
 0x185   : > { %7449 = vmatmul.mubr.msk.bf16.gmra.mrb[4].mxu0 %vm364_vm1, %v1851_v57 }
 0x186   : > { %7452 = vmatprep.mubr.msk.bf16.mxu0 %vm364_vm1, %v1852_v58 }
 0x188   : > { %3293 = vperm.xlu0 %8542, %v3207_v51   ;;  %v2489_v51 = vld [vmem:[%s8612_s30 + $0xed] sm:$0xff] }
 0x18d   : > { %7453 = vmatmul.mubr.msk.bf16.gmra.mrb[8].mxu0 %vm364_vm1, %v1853_v63 }
 0x18e   : > { %7456 = vmatprep.mubr.msk.bf16.mxu0 %vm364_vm1, %v1854_v0 }
 0x195   : > { %7457 = vmatmul.mubr.msk.bf16.gmra.mrb[12].mxu0 %vm364_vm1, %v1855_v5 }
 0x196   : > { %7460 = vmatprep.mubr.msk.bf16.mxu0 %vm364_vm1, %v1856_v6 }
 0x19d   : > { %7461 = vmatmul.mubr.msk.bf16.gmra.mrb[16].mxu0 %vm364_vm1, %v1857_v11 }
 0x19e   : > { %7464 = vmatprep.mubr.msk.bf16.mxu0 %vm364_vm1, %v1858_v12 }
 0x1a5   : > { %7465 = vmatmul.mubr.msk.bf16.gmra.mrb[20].mxu0 %vm364_vm1, %v1859_v17 }
 0x1a6   : > { %7468 = vmatprep.mubr.msk.bf16.mxu0 %vm364_vm1, %v1860_v18 }
 0x1ad   : > { %7469 = vmatmul.mubr.msk.bf16.gmra.mrb[24].mxu0 %vm364_vm1, %v1861_v23 }
 0x1ae   : > { %7472 = vmatprep.mubr.msk.bf16.mxu0 %vm364_vm1, %v1862_v24 }
 0x1b5   : > { %7473 = vmatmul.mubr.msk.bf16.gmra.mrb[28].mxu0 %vm364_vm1, %v1863_v29 }
 0x1b6   : > { %7476 = vmatprep.mubr.msk.bf16.mxu0 %vm364_vm1, %v1864_v30 }
 0x1bd   : > { %7477 = vmatmul.mubr.msk.bf16.gmra.mrb[32].mxu0 %vm364_vm1, %v1865_v33  ;;  %v3224_v33 = vld [vmem:[%s9795_s5 + $0xe8] sm:$0xff] }
 0x1be   : > { %7482 = vmatprep.mubr.msk.bf16.mxu0 %vm364_vm1, %v8906_v49  ;;  %v2190_v49 = vpack.c.bf16 %v2171_v46, %v1846_v31  ;;  %v2480_v31 = vld [vmem:[%s8612_s30 + $0xa5] sm:$0xff]  ;;  %v2510_v46 = vpack.c.bf16 %v2485_v42, %v2484_v41  ;;  %v2815_v41 = vld [vmem:[%s8612_s30 + $0xee] sm:$0xff] }
 0x1bf   : > { %v2508_v36 = vpack.c.bf16 %v2481_v32, %v2480_v31  ;;  %v2808_v32 = vld [vmem:[%s8612_s30 + $0xb6] sm:$0xff] }
 0x1c5   : > { %7483 = vmatmul.mubr.msk.bf16.vlgmr.msra.gmra.mrb[0].mxu0 %vm364_vm1, %v8908_v50  ;;  %v3206_v50 = vld [vmem:[%s9795_s5 + $0x58] sm:$0xff] }
 0x1c6   : > { %7519 = vmatpush3.bf16.msra.mxu0 %v2575_v34  ;;  %7486 = vmatprep.mubr.msk.bf16.mxu0 %vm364_vm1, %v1851_v57  ;;  %v3209_v57 = vld [vmem:[%s9795_s5 + $0x70] sm:$0xff] }
 0x1c7   : > { %8520 = vmatprep.subr.msk.bf16.mxu0 %vm419_vm0, %v8975_v35  ;;  %3288 = vperm.xlu1 %8543, %v3206_v50   ;;  %v3225_v34 = vld [vmem:[%s9795_s5 + $0xf0] sm:$0xff]  ;;  %v2488_v50 = vld [vmem:[%s8612_s30 + $0xe5] sm:$0xff] }
 0x1c8   : > { %3303 = vperm.xlu0 %8542, %v3209_v57   ;;  %v2493_v57 = vld [vmem:[%s8612_s30 + $0x10d] sm:$0xff] }
 0x1cb   : > { %3298 = vperm.xlu1 %8543, %v3208_v56   ;;  %v2492_v56 = vld [vmem:[%s8612_s30 + $0x105] sm:$0xff] }
 0x1cc   : > { %3313 = vperm.xlu0 %8542, %v3211_v61   ;;  %v2495_v61 = vld [vmem:[%s8612_s30 + $0x11d] sm:$0xff] }
 0x1cd   : > { %7487 = vmatmul.mubr.msk.bf16.gmra.mrb[4].mxu0 %vm364_vm1, %v1852_v58  ;;  %v2191_v58 = vpack.c.bf16 %v2173_v53, %v2172_v52  ;;  %v2512_v53 = vpack.c.bf16 %v2489_v51, %v2488_v50  ;;  %v2820_v50 = vld [vmem:[%s8612_s30 + $0x116] sm:$0xff]  ;;  %v2821_v51 = vld [vmem:[%s8612_s30 + $0x11e] sm:$0xff] }
 0x1ce   : > { %7490 = vmatprep.mubr.msk.bf16.mxu0 %vm364_vm1, %v1853_v63  ;;  %v2467_v63 = vld [vmem:[%s8612_s30 + $0x3d] sm:$0xff] }
 0x1cf   : > { %3308 = vperm.xlu1 %8543, %v3210_v60   ;;  %v2501_v4 = vpack.c.bf16 %v2467_v63, %v2466_v62  ;;  %v2494_v60 = vld [vmem:[%s8612_s30 + $0x115] sm:$0xff]  ;;  %v2496_v62 = vld [vmem:[%s8612_s30 + $0x125] sm:$0xff]  ;;  %v2497_v63 = vld [vmem:[%s8612_s30 + $0x12d] sm:$0xff] }
 0x1d0   : > { %3323 = vperm.xlu0 %8542, %v3213_v3   ;;  %v2499_v3 = vld [vmem:[%s8612_s30 + $0x13d] sm:$0x3f] }
 0x1d3   : > { %3318 = vperm.xlu1 %8543, %v3212_v2   ;;  %v2498_v2 = vld [vmem:[%s8612_s30 + $0x135] sm:$0xff] }
 0x1d4   : > { %3333 = vperm.xlu0 %8542, %v3215_v8   ;;  %v2792_v8 = vld [vmem:[%s8612_s30 + $0x36] sm:$0xff] }
 0x1d5   : > { %7491 = vmatmul.mubr.msk.bf16.gmra.mrb[8].mxu0 %vm364_vm1, %v1854_v0  ;;  %v2468_v0 = vld [vmem:[%s8612_s30 + $0x45] sm:$0xff] }
 0x1d6   : > { %7494 = vmatprep.mubr.msk.bf16.mxu0 %vm364_vm1, %v1855_v5  ;;  %v2502_v5 = vpack.c.bf16 %v2469_v1, %v2468_v0  ;;  %v2515_v0 = vpack.c.bf16 %v2495_v61, %v2494_v60  ;;  %v2516_v1 = vpack.c.bf16 %v2497_v63, %v2496_v62  ;;  %v6737_v60 = vld [vmem:[%s9793_s3 + $0x4] sm:$0xf] }
 0x1d7   : > { %3328 = vperm.xlu1 %8543, %v3214_v7   ;;  %8521 = vmatprep.subr.msk.bf16.mxu1 %vm3692_vm3, %v6737_v60  ;;  %v3694_v61 = vsel %vm3692_vm3, %v6737_v60, 0 }
 0x1d8   : > { %3343 = vperm.xlu0 %8542, %v3217_v14   ;;  %v2796_v14 = vld [vmem:[%s8612_s30 + $0x56] sm:$0xff]  ;;  %7595 = vmatpush3.bf16.msra.mxu1 %v3694_v61 }
 0x1db   : > { %3338 = vperm.xlu1 %8543, %v3216_v13  }
 0x1dd   : > { %7495 = vmatmul.mubr.msk.bf16.gmra.mrb[12].mxu0 %vm364_vm1, %v1856_v6  ;;  %v2901_v6 = vsel %vm419_vm0, %v8975_v35, 0 }
 0x1de   : > { %7498 = vmatprep.mubr.msk.bf16.mxu0 %vm364_vm1, %v1857_v11  ;;  %v2472_v11 = vld [vmem:[%s8612_s30 + $0x65] sm:$0xff] }
 0x1e5   : > { %7499 = vmatmul.mubr.msk.bf16.gmra.mrb[16].mxu0 %vm364_vm1, %v1858_v12  ;;  %v2473_v12 = vld [vmem:[%s8612_s30 + $0x6d] sm:$0xff] }
 0x1e6   : > { %7502 = vmatprep.mubr.msk.bf16.mxu0 %vm364_vm1, %v1859_v17  ;;  %v2504_v16 = vpack.c.bf16 %v2473_v12, %v2472_v11  ;;  %v3218_v17 = vld [vmem:[%s9795_s5 + $0xb8] sm:$0xff]  ;;  %v2795_v11 = vld [vmem:[%s8612_s30 + $0x4e] sm:$0xff]  ;;  %v2827_v12 = vpack.c.bf16 %v2793_v9, %v2792_v8 }
 0x1e7   : > { %3348 = vperm.xlu1 %8543, %v3218_v17   ;;  %v2828_v13 = vpack.c.bf16 %v2795_v11, %v2794_v10  ;;  %v2799_v17 = vld [vmem:[%s8612_s30 + $0x6e] sm:$0xff] }
 0x1ed   : > { %7503 = vmatmul.mubr.msk.bf16.gmra.mrb[20].mxu0 %vm364_vm1, %v1860_v18  ;;  %v3219_v18 = vld [vmem:[%s9795_s5 + $0xc0] sm:$0xff] }
 0x1ee   : > { %7506 = vmatprep.mubr.msk.bf16.mxu0 %vm364_vm1, %v1861_v23  ;;  %3353 = vperm.xlu0 %8542, %v3219_v18   ;;  %v3220_v23 = vld [vmem:[%s9795_s5 + $0xc8] sm:$0xff] }
 0x1ef   : > { %3358 = vperm.xlu1 %8543, %v3220_v23   ;;  %v2803_v23 = vld [vmem:[%s8612_s30 + $0x8e] sm:$0xff] }
 0x1f3   : > { %3368 = vperm.xlu1 %8543, %v3222_v27   ;;  %v2805_v27 = vld [vmem:[%s8612_s30 + $0x9e] sm:$0xff] }
 0x1f5   : > { %7507 = vmatmul.mubr.msk.bf16.gmra.mrb[24].mxu0 %vm364_vm1, %v1862_v24  ;;  %v3221_v24 = vld [vmem:[%s9795_s5 + $0xd0] sm:$0xff] }
 0x1f6   : > { %7510 = vmatprep.mubr.msk.bf16.mxu0 %vm364_vm1, %v1863_v29  ;;  %3363 = vperm.xlu0 %8542, %v3221_v24   ;;  %v2478_v29 = vld [vmem:[%s8612_s30 + $0x95] sm:$0xff]  ;;  %v2831_v24 = vpack.c.bf16 %v2801_v21, %v2800_v20 }
 0x1f7   : > { %3378 = vperm.xlu1 %8543, %v3224_v33   ;;  %v2809_v33 = vld [vmem:[%s8612_s30 + $0xbe] sm:$0xff] }
 0x1fa   : > { %3373 = vperm.xlu0 %8542, %v3223_v28   ;;  %v2806_v28 = vld [vmem:[%s8612_s30 + $0xa6] sm:$0xff] }
 0x1fb   : > { %3388 = vperm.xlu1 %8543, %v3226_v37  }
 0x1fd   : > { %7511 = vmatmul.mubr.msk.bf16.gmra.mrb[28].mxu0 %vm364_vm1, %v1864_v30  ;;  %v2479_v30 = vld [vmem:[%s8612_s30 + $0x9d] sm:$0xff] }
 0x1fe   : > { %7514 = vmatprep.mubr.msk.bf16.mxu0 %vm364_vm1, %v2190_v49  ;;  %v2507_v35 = vpack.c.bf16 %v2479_v30, %v2478_v29  ;;  %3383 = vperm.xlu0 %8542, %v3225_v34   ;;  %v2487_v49 = vld [vmem:[%s8612_s30 + $0xdd] sm:$0xff]  ;;  %v2807_v29 = vld [vmem:[%s8612_s30 + $0xae] sm:$0xff]  ;;  %v2810_v34 = vld [vmem:[%s8612_s30 + $0xc6] sm:$0xff] }
 0x1ff   : > { %3398 = vperm.xlu1 %8543, %v3228_v43   ;;  %v2511_v52 = vpack.c.bf16 %v2487_v49, %v2486_v48  ;;  %v2834_v31 = vpack.c.bf16 %v2807_v29, %v2806_v28  ;;  %v2838_v43 = vpack.c.bf16 %v2815_v41, %v2814_v40 }
 0x202   : > { %3393 = vperm.xlu0 %8542, %v3227_v38   ;;  %v2812_v38 = vld [vmem:[%s8612_s30 + $0xd6] sm:$0xff] }
 0x203   : > { %3408 = vperm.xlu1 %8543, %v3230_v47   ;;  %v2837_v42 = vpack.c.bf16 %v2813_v39, %v2812_v38  ;;  %v2819_v47 = vld [vmem:[%s8612_s30 + $0x10e] sm:$0xff] }
 0x205   : > { %7515 = vmatmul.mubr.msk.bf16.gmra.mrb[32].mxu0 %vm364_vm1, %v2191_v58  ;;  %v2513_v58 = vpack.c.bf16 %v2491_v55, %v2490_v54  ;;  %v2841_v54 = vpack.c.bf16 %v2821_v51, %v2820_v50 }
 0x206   : > { %7520 = vmatprep.mubr.msk.bf16.mxu0 %vm364_vm1, %v2500_v59  ;;  %3403 = vperm.xlu0 %8542, %v3229_v44   ;;  %v2514_v59 = vpack.c.bf16 %v2493_v57, %v2492_v56  ;;  %v2816_v44 = vld [vmem:[%s8612_s30 + $0xf6] sm:$0xff]  ;;  %v2825_v57 = vld [vmem:[%s8612_s30 + $0x13e] sm:$0x3f] }
 0x207   : > { %v2824_v56 = vld [vmem:[%s8612_s30 + $0x136] sm:$0xff] }
 0x20d   : > { %7521 = vmatmul.mubr.msk.bf16.vlgmr.msra.gmra.mrb[0].mxu0 %vm364_vm1, %v2501_v4  ;;  %v2790_v4 = vld [vmem:[%s8612_s30 + $0x26] sm:$0xff] }
 0x20e   : > { %7557 = vmatpush3.bf16.msra.mxu0 %v2901_v6  ;;  %7524 = vmatprep.mubr.msk.bf16.mxu0 %vm364_vm1, %v2502_v5  ;;  %v2791_v5 = vld [vmem:[%s8612_s30 + $0x2e] sm:$0xff]  ;;  %v2517_v6 = vpack.c.bf16 %v2499_v3, %v2498_v2  ;;  %v3234_v2 = vpop.permute.xlu0 %3233  ;;  %v3244_v3 = vpop.permute.xlu1 %3243 }
 0x20f   : > { %v2826_v7 = vpack.c.bf16 %v2791_v5, %v2790_v4 }
 0x212   : > { %v3239_v4 = vpop.permute.xlu0 %3238  ;;  %v3249_v5 = vpop.permute.xlu1 %3248 }
 0x215   : > { %7525 = vmatmul.mubr.msk.bf16.gmra.mrb[4].mxu0 %vm364_vm1, %v2503_v15  ;;  %v2797_v15 = vld [vmem:[%s8612_s30 + $0x5e] sm:$0xff] }
 0x216   : > { %7528 = vmatprep.mubr.msk.bf16.mxu0 %vm364_vm1, %v2504_v16  ;;  %v2798_v16 = vld [vmem:[%s8612_s30 + $0x66] sm:$0xff]  ;;  %v2829_v18 = vpack.c.bf16 %v2797_v15, %v2796_v14  ;;  %v9322_v14 = vld [vmem:[%s9792_s2] ss:$0 sm:$0xff] }
 0x217   : > { %v2830_v19 = vpack.c.bf16 %v2799_v17, %v2798_v16 }
 0x21d   : > { %7529 = vmatmul.mubr.msk.bf16.gmra.mrb[8].mxu0 %vm364_vm1, %v2505_v25  ;;  %v2832_v25 = vpack.c.bf16 %v2803_v23, %v2802_v22 }
 0x21e   : > { %7532 = vmatprep.mubr.msk.bf16.mxu0 %vm364_vm1, %v2506_v26  ;;  %v2804_v26 = vld [vmem:[%s8612_s30 + $0x96] sm:$0xff] }
 0x21f   : > { %v2833_v30 = vpack.c.bf16 %v2805_v27, %v2804_v26 }
 0x225   : > { %7533 = vmatmul.mubr.msk.bf16.gmra.mrb[12].mxu0 %vm364_vm1, %v2507_v35  ;;  %v2811_v35 = vld [vmem:[%s8612_s30 + $0xce] sm:$0xff] }
 0x226   : > { %7536 = vmatprep.mubr.msk.bf16.mxu0 %vm364_vm1, %v2508_v36  ;;  %v2835_v36 = vpack.c.bf16 %v2809_v33, %v2808_v32  ;;  %v2836_v37 = vpack.c.bf16 %v2811_v35, %v2810_v34 }
 0x22d   : > { %7537 = vmatmul.mubr.msk.bf16.gmra.mrb[16].mxu0 %vm364_vm1, %v2509_v45  ;;  %v2817_v45 = vld [vmem:[%s8612_s30 + $0xfe] sm:$0xff] }
 0x22e   : > { %7540 = vmatprep.mubr.msk.bf16.mxu0 %vm364_vm1, %v2510_v46  ;;  %v2818_v46 = vld [vmem:[%s8612_s30 + $0x106] sm:$0xff]  ;;  %v2839_v48 = vpack.c.bf16 %v2817_v45, %v2816_v44 }
 0x22f   : > { %v2840_v49 = vpack.c.bf16 %v2819_v47, %v2818_v46 }
 0x235   : > { %7541 = vmatmul.mubr.msk.bf16.gmra.mrb[20].mxu0 %vm364_vm1, %v2511_v52  ;;  %v2822_v52 = vld [vmem:[%s8612_s30 + $0x126] sm:$0xff] }
 0x236   : > { %7544 = vmatprep.mubr.msk.bf16.mxu0 %vm364_vm1, %v2512_v53  ;;  %v2823_v53 = vld [vmem:[%s8612_s30 + $0x12e] sm:$0xff] }
 0x237   : > { %v2842_v55 = vpack.c.bf16 %v2823_v53, %v2822_v52 }
 0x23d   : > { %7545 = vmatmul.mubr.msk.bf16.gmra.mrb[24].mxu0 %vm364_vm1, %v2513_v58  ;;  %v2843_v58 = vpack.c.bf16 %v2825_v57, %v2824_v56 }
 0x23e   : > { %7548 = vmatprep.mubr.msk.bf16.mxu0 %vm364_vm1, %v2514_v59  ;;  %v8553_v59 = vmov 0.0  }
 0x23f   : > { %3452 = vst.msk [vmem:[#allocation2 + $0x20] sm:$0xff] %vm3447_vm2, %v8553_v59  ;;  %3453 = vst.msk [vmem:[#allocation2 + $0x28] sm:$0xff] %vm3447_vm2, %v8553_v59 }
 0x240   : > { %3448 = vst.msk [vmem:[#allocation2] sm:$0xff] %vm3447_vm2, %v8553_v59  ;;  %3449 = vst.msk [vmem:[#allocation2 + $0x8] sm:$0xff] %vm3447_vm2, %v8553_v59 }
 0x241   : > { %3450 = vst.msk [vmem:[#allocation2 + $0x10] sm:$0xff] %vm3447_vm2, %v8553_v59  ;;  %3451 = vst.msk [vmem:[#allocation2 + $0x18] sm:$0xff] %vm3447_vm2, %v8553_v59 }
 0x242   : > { %3454 = vst.msk [vmem:[#allocation2 + $0x30] sm:$0xff] %vm3447_vm2, %v8553_v59  ;;  %3455 = vst.msk [vmem:[#allocation2 + $0x38] sm:$0xff] %vm3447_vm2, %v8553_v59 }
 0x243   : > { %3456 = vst.msk [vmem:[#allocation2 + $0x40] sm:$0xff] %vm3447_vm2, %v8553_v59  ;;  %3457 = vst.msk [vmem:[#allocation2 + $0x48] sm:$0xff] %vm3447_vm2, %v8553_v59 }
 0x244   : > { %3458 = vst.msk [vmem:[#allocation2 + $0x50] sm:$0xff] %vm3447_vm2, %v8553_v59  ;;  %3459 = vst.msk [vmem:[#allocation2 + $0x58] sm:$0xff] %vm3447_vm2, %v8553_v59 }
 0x245   : > { %7549 = vmatmul.mubr.msk.bf16.gmra.mrb[28].mxu0 %vm364_vm1, %v2515_v0  ;;  %3460 = vst.msk [vmem:[#allocation2 + $0x60] sm:$0xff] %vm3447_vm2, %v8553_v59  ;;  %3461 = vst.msk [vmem:[#allocation2 + $0x68] sm:$0xff] %vm3447_vm2, %v8553_v59 }
 0x246   : > { %7552 = vmatprep.mubr.msk.bf16.mxu0 %vm364_vm1, %v2516_v1  ;;  %3462 = vst.msk [vmem:[#allocation2 + $0x70] sm:$0xff] %vm3447_vm2, %v8553_v59  ;;  %3463 = vst.msk [vmem:[#allocation2 + $0x78] sm:$0xff] %vm3447_vm2, %v8553_v59  ;;  %v9307_v1 = vld [vmem:[%s9793_s3] sm:$0xf] }
 0x247   : > { %3464 = vst.msk [vmem:[#allocation2 + $0x80] sm:$0xff] %vm3447_vm2, %v8553_v59  ;;  %3465 = vst.msk [vmem:[#allocation2 + $0x88] sm:$0xff] %vm3447_vm2, %v8553_v59  ;;  %v3582_v62 = vld [vmem:[#allocation2 + $0x1] sm:$0xff]  ;;  %8522 = vmatprep.subr.msk.bf16.mxu1 %vm3692_vm3, %v9307_v1 }
 0x248   : > { %3466 = vst.msk [vmem:[#allocation2 + $0x90] sm:$0xff] %vm3447_vm2, %v8553_v59  ;;  %3467 = vst.msk [vmem:[#allocation2 + $0x98] sm:$0xff] %vm3447_vm2, %v8553_v59  ;;  %v3583_v63 = vld [vmem:[#allocation2 + $0x9] sm:$0xff] }
 0x249   : > { %3468 = vst.msk [vmem:[#allocation2 + $0xa0] sm:$0xff] %vm3447_vm2, %v8553_v59  ;;  %3469 = vst.msk [vmem:[#allocation2 + $0xa8] sm:$0xff] %vm3447_vm2, %v8553_v59  ;;  %v3618_v0 = vpack.c.bf16 %v3583_v63, %v3582_v62 }
 0x24a   : > { %3470 = vst.msk [vmem:[#allocation2 + $0xb0] sm:$0xff] %vm3447_vm2, %v8553_v59  ;;  %3471 = vst.msk [vmem:[#allocation2 + $0xb8] sm:$0xff] %vm3447_vm2, %v8553_v59 }
 0x24b   : > { %3472 = vst.msk [vmem:[#allocation2 + $0xc0] sm:$0xff] %vm3447_vm2, %v8553_v59  ;;  %3473 = vst.msk [vmem:[#allocation2 + $0xc8] sm:$0xff] %vm3447_vm2, %v8553_v59  ;;  %7596 = vmatprep.mubr.msk.bf16.mxu1 %vm3447_vm2, %v3618_v0  ;;  %v3928_v0 = vsel %vm3692_vm3, %v9307_v1, 0 }
 0x24c   : > { %3474 = vst.msk [vmem:[#allocation2 + $0xd0] sm:$0xff] %vm3447_vm2, %v8553_v59  ;;  %3475 = vst.msk [vmem:[#allocation2 + $0xd8] sm:$0xff] %vm3447_vm2, %v8553_v59 }
 0x24d   : > { %7553 = vmatmul.mubr.msk.bf16.gmra.mrb[32].mxu0 %vm364_vm1, %v2517_v6  ;;  %3476 = vst.msk [vmem:[#allocation2 + $0xe0] sm:$0xff] %vm3447_vm2, %v8553_v59  ;;  %3477 = vst.msk [vmem:[#allocation2 + $0xe8] sm:$0xff] %vm3447_vm2, %v8553_v59  ;;  %v3254_v6 = vpop.permute.xlu0 %3253 }
 0x24e   : > { %7558 = vmatprep.mubr.msk.bf16.mxu0 %vm364_vm1, %v2826_v7  ;;  %3478 = vst.msk [vmem:[#allocation2 + $0xf0] sm:$0xff] %vm3447_vm2, %v8553_v59  ;;  %3479 = vst.msk [vmem:[#allocation2 + $0xf8] sm:$0xff] %vm3447_vm2, %v8553_v59  ;;  %v3259_v7 = vpop.permute.xlu1 %3258 }
 0x24f   : > { %3480 = vst.msk [vmem:[#allocation2 + $0x100] sm:$0xff] %vm3447_vm2, %v8553_v59  ;;  %3481 = vst.msk [vmem:[#allocation2 + $0x108] sm:$0xff] %vm3447_vm2, %v8553_v59 }
 0x250   : > { %3482 = vst.msk [vmem:[#allocation2 + $0x110] sm:$0xff] %vm3447_vm2, %v8553_v59  ;;  %3483 = vst.msk [vmem:[#allocation2 + $0x118] sm:$0xff] %vm3447_vm2, %v8553_v59 }
 0x251   : > { %3484 = vst.msk [vmem:[#allocation2 + $0x120] sm:$0xff] %vm3447_vm2, %v8553_v59  ;;  %3485 = vst.msk [vmem:[#allocation2 + $0x128] sm:$0xff] %vm3447_vm2, %v8553_v59  ;;  %v3264_v8 = vpop.permute.xlu0 %3263 }
 0x252   : > { %3486 = vst.msk [vmem:[#allocation2 + $0x130] sm:$0xff] %vm3447_vm2, %v8553_v59  ;;  %3487 = vst.msk [vmem:[#allocation2 + $0x138] sm:$0xff] %vm3447_vm2, %v8553_v59  ;;  %v3269_v9 = vpop.permute.xlu1 %3268 }
 0x253   : > { %3489 = vst.msk [vmem:[#allocation2 + $0x140] sm:$0xf] %vm3488_vm5, %v8553_v59 }
 0x255   : > { %7559 = vmatmul.mubr.msk.bf16.vlgmr.msra.gmra.mrb[0].mxu0 %vm364_vm1, %v2827_v12  ;;  %v9311_v10 = vpop.permute.xlu0 %3273 }
 0x256   : > { %7562 = vmatprep.mubr.msk.bf16.mxu0 %vm364_vm1, %v2828_v13  ;;  %v9313_v11 = vpop.permute.xlu1 %3278 }
 0x259   : > { %v9315_v12 = vpop.permute.xlu0 %3283 }
 0x25a   : > { %v9317_v13 = vpop.permute.xlu1 %3288 }
 0x25d   : > { %7563 = vmatmul.mubr.msk.bf16.gmra.mrb[4].mxu0 %vm364_vm1, %v2829_v18  ;;  %v9325_v18 = vpop.permute.xlu0 %3293 }
 0x25e   : > { %7566 = vmatprep.mubr.msk.bf16.mxu0 %vm364_vm1, %v2830_v19 }
 0x261   : > { %v9333_v32 = vpop.permute.xlu0 %3303 }
 0x265   : > { %7567 = vmatmul.mubr.msk.bf16.gmra.mrb[8].mxu0 %vm364_vm1, %v2831_v24  ;;  %v9329_v24 = vpop.permute.xlu1 %3298  ;;  %v9344_v47 = vpop.permute.xlu0 %3313 }
 0x266   : > { %7570 = vmatprep.mubr.msk.bf16.mxu0 %vm364_vm1, %v2832_v25 }
 0x26d   : > { %7571 = vmatmul.mubr.msk.bf16.gmra.mrb[12].mxu0 %vm364_vm1, %v2833_v30 }
 0x26e   : > { %7574 = vmatprep.mubr.msk.bf16.mxu0 %vm364_vm1, %v2834_v31 }
 0x275   : > { %7575 = vmatmul.mubr.msk.bf16.gmra.mrb[16].mxu0 %vm364_vm1, %v2835_v36 }
 0x276   : > { %7578 = vmatprep.mubr.msk.bf16.mxu0 %vm364_vm1, %v2836_v37  ;;  %v9338_v37 = vpop.permute.xlu1 %3308 }
 0x27a   : > { %v9347_v51 = vpop.permute.xlu1 %3318 }
 0x27d   : > { %7579 = vmatmul.mubr.msk.bf16.gmra.mrb[20].mxu0 %vm364_vm1, %v2837_v42 }
 0x27e   : > { %7582 = vmatprep.mubr.msk.bf16.mxu0 %vm364_vm1, %v2838_v43 }
 0x285   : > { %7583 = vmatmul.mubr.msk.bf16.gmra.mrb[24].mxu0 %vm364_vm1, %v2839_v48 }
 0x286   : > { %7586 = vmatprep.mubr.msk.bf16.mxu0 %vm364_vm1, %v2840_v49 }
 0x28d   : > { %7587 = vmatmul.mubr.msk.bf16.gmra.mrb[28].mxu0 %vm364_vm1, %v2841_v54 }
 0x28e   : > { %7590 = vmatprep.mubr.msk.bf16.mxu0 %vm364_vm1, %v2842_v55 }
 0x295   : > { %7591 = vmatmul.mubr.msk.bf16.gmra.mrb[32].mxu0 %vm364_vm1, %v2843_v58 }
 0x328   : > { %v7560_v15 = vpop.f32.mrb[0].mxu0 }
 0x329   : > { %v3125_v16 = vadd.f32 %v7560_v15, %v9322_v14  ;;  %v2937_v17 = vpop.f32.mrb[1].mxu0 }
 0x32a   : > { %v3123_v19 = vadd.f32 %v9322_v14, %v2937_v17  ;;  %v7561_v20 = vpop.f32.mrb[2].mxu0 }
 0x32b   : > { %v3161_v21 = vmax.f32 %v3125_v16, 0.0  ;;  %v3126_v22 = vadd.f32 %v7561_v20, %v9322_v14  ;;  %v2940_v23 = vpop.f32.mrb[3].mxu0  ;;  %v9368_v16 = vpop.permute.xlu1 %3328 }
 0x32c   : > { %v3159_v25 = vmax.f32 %v3123_v19, 0.0  ;;  %v3124_v26 = vadd.f32 %v9322_v14, %v2940_v23 }
 0x32d   : > { %v3413_v27 = vmul.f32 %v3244_v3, %v3161_v21  ;;  %v3162_v28 = vmax.f32 %v3126_v22, 0.0 }
 0x32e   : > { %v3411_v29 = vmul.f32 %v3234_v2, %v3159_v25  ;;  %v3160_v30 = vmax.f32 %v3124_v26, 0.0 }
 0x32f   : > { %3492 = vst.msk [vmem:[#allocation2 + $0x23] sm:$0xff] %vm3447_vm2, %v3413_v27  ;;  %v3414_v31 = vmul.f32 %v3249_v5, %v3162_v28 }
 0x330   : > { %3490 = vst.msk [vmem:[#allocation2 + $0x13] sm:$0xff] %vm3447_vm2, %v3411_v29  ;;  %v3412_v33 = vmul.f32 %v3239_v4, %v3160_v30  ;;  %v7564_v34 = vpop.f32.mrb[4].mxu0 }
 0x331   : > { %3493 = vst.msk [vmem:[#allocation2 + $0x2b] sm:$0xff] %vm3447_vm2, %v3414_v31  ;;  %v3129_v35 = vadd.f32 %v7564_v34, %v9322_v14  ;;  %v2953_v36 = vpop.f32.mrb[5].mxu0 }
 0x332   : > { %3491 = vst.msk [vmem:[#allocation2 + $0x1b] sm:$0xff] %vm3447_vm2, %v3412_v33  ;;  %v3127_v38 = vadd.f32 %v9322_v14, %v2953_v36  ;;  %v7565_v39 = vpop.f32.mrb[6].mxu0 }
 0x333   : > { %v3165_v40 = vmax.f32 %v3129_v35, 0.0  ;;  %v3130_v41 = vadd.f32 %v7565_v39, %v9322_v14  ;;  %v2956_v42 = vpop.f32.mrb[7].mxu0  ;;  %v9384_v35 = vpop.permute.xlu1 %3338 }
 0x334   : > { %v3163_v43 = vmax.f32 %v3127_v38, 0.0  ;;  %v3128_v44 = vadd.f32 %v9322_v14, %v2956_v42 }
 0x335   : > { %v3417_v45 = vmul.f32 %v3264_v8, %v3165_v40  ;;  %v3166_v46 = vmax.f32 %v3130_v41, 0.0 }
 0x336   : > { %v3415_v48 = vmul.f32 %v3254_v6, %v3163_v43  ;;  %v3164_v49 = vmax.f32 %v3128_v44, 0.0  ;;  %v9360_v6 = vld [vmem:[%s9793_s3 + $0x8] sm:$0xf] }
 0x337   : > { %3496 = vst.msk [vmem:[#allocation2 + $0x43] sm:$0xff] %vm3447_vm2, %v3417_v45  ;;  %v3418_v50 = vmul.f32 %v3269_v9, %v3166_v46  ;;  %v3584_v57 = vld [vmem:[#allocation2 + $0x11] sm:$0xff] }
 0x338   : > { %3494 = vst.msk [vmem:[#allocation2 + $0x33] sm:$0xff] %vm3447_vm2, %v3415_v48  ;;  %v3416_v52 = vmul.f32 %v3259_v7, %v3164_v49  ;;  %v7568_v53 = vpop.f32.mrb[8].mxu0  ;;  %v3587_v54 = vld [vmem:[#allocation2 + $0x29] sm:$0xff]  ;;  %v9362_v7 = vpop.permute.xlu0 %3323 }
 0x339   : > { %3497 = vst.msk [vmem:[#allocation2 + $0x4b] sm:$0xff] %vm3447_vm2, %v3418_v50  ;;  %v3133_v55 = vadd.f32 %v7568_v53, %v9322_v14  ;;  %v2969_v56 = vpop.f32.mrb[9].mxu0  ;;  %v3585_v58 = vld [vmem:[#allocation2 + $0x19] sm:$0xff]  ;;  %v3586_v60 = vld [vmem:[#allocation2 + $0x21] sm:$0xff]  ;;  %v3349_v53 = vpop.permute.xlu1 %3348 }
 0x33a   : > { %3495 = vst.msk [vmem:[#allocation2 + $0x3b] sm:$0xff] %vm3447_vm2, %v3416_v52  ;;  %v3131_v61 = vadd.f32 %v9322_v14, %v2969_v56  ;;  %v7569_v62 = vpop.f32.mrb[10].mxu0  ;;  %v3619_v63 = vpack.c.bf16 %v3585_v58, %v3584_v57  ;;  %v3620_v2 = vpack.c.bf16 %v3587_v54, %v3586_v60 }
 0x33b   : > { %v3169_v3 = vmax.f32 %v3133_v55, 0.0  ;;  %v3134_v4 = vadd.f32 %v7569_v62, %v9322_v14  ;;  %v2972_v5 = vpop.f32.mrb[11].mxu0 }
 0x33c   : > { %v3167_v8 = vmax.f32 %v3131_v61, 0.0  ;;  %v3132_v9 = vadd.f32 %v9322_v14, %v2972_v5  ;;  %7597 = vmatmul.mubr.msk.bf16.vlgmr.msra.gmra.mrb[0].mxu1 %vm3447_vm2, %v3619_v63  ;;  %v9379_v28 = vpop.permute.xlu0 %3333 }
 0x33d   : > { %v3421_v15 = vmul.f32 %v9315_v12, %v3169_v3  ;;  %v3170_v1 = vmax.f32 %v3134_v4, 0.0  ;;  %7633 = vmatpush3.bf16.msra.mxu1 %v3928_v0  ;;  %7600 = vmatprep.mubr.msk.bf16.mxu1 %vm3447_vm2, %v3620_v2  ;;  %v9407_v5 = vpop.permute.xlu1 %3358 }
 0x33e   : > { %v3419_v17 = vmul.f32 %v9311_v10, %v3167_v8  ;;  %v3168_v19 = vmax.f32 %v3132_v9, 0.0  ;;  %8523 = vmatprep.subr.msk.bf16.mxu1 %vm3692_vm3, %v9360_v6 }
 0x33f   : > { %3500 = vst.msk [vmem:[#allocation2 + $0x63] sm:$0xff] %vm3447_vm2, %v3421_v15  ;;  %v3422_v20 = vmul.f32 %v9317_v13, %v3170_v1  ;;  %v3588_v10 = vld [vmem:[#allocation2 + $0x31] sm:$0xff] }
 0x340   : > { %3498 = vst.msk [vmem:[#allocation2 + $0x53] sm:$0xff] %vm3447_vm2, %v3419_v17  ;;  %v3420_v12 = vmul.f32 %v9313_v11, %v3168_v19  ;;  %v7572_v21 = vpop.f32.mrb[12].mxu0  ;;  %v3591_v22 = vld [vmem:[#allocation2 + $0x49] sm:$0xff]  ;;  %v3344_v44 = vpop.permute.xlu0 %3343 }
 0x341   : > { %3501 = vst.msk [vmem:[#allocation2 + $0x6b] sm:$0xff] %vm3447_vm2, %v3422_v20  ;;  %v3137_v23 = vadd.f32 %v7572_v21, %v9322_v14  ;;  %v2985_v25 = vpop.f32.mrb[13].mxu0  ;;  %v3589_v26 = vld [vmem:[#allocation2 + $0x39] sm:$0xff]  ;;  %v3590_v27 = vld [vmem:[#allocation2 + $0x41] sm:$0xff] }
 0x342   : > { %3499 = vst.msk [vmem:[#allocation2 + $0x5b] sm:$0xff] %vm3447_vm2, %v3420_v12  ;;  %v3135_v13 = vadd.f32 %v9322_v14, %v2985_v25  ;;  %v7573_v29 = vpop.f32.mrb[14].mxu0  ;;  %v3621_v30 = vpack.c.bf16 %v3589_v26, %v3588_v10  ;;  %v3622_v31 = vpack.c.bf16 %v3591_v22, %v3590_v27 }
 0x343   : > { %v3173_v11 = vmax.f32 %v3137_v23, 0.0  ;;  %v3138_v33 = vadd.f32 %v7573_v29, %v9322_v14  ;;  %v2988_v34 = vpop.f32.mrb[15].mxu0  ;;  %v3369_v29 = vpop.permute.xlu1 %3368 }
 0x344   : > { %v3171_v36 = vmax.f32 %v3135_v13, 0.0  ;;  %v3136_v38 = vadd.f32 %v9322_v14, %v2988_v34  ;;  %7601 = vmatmul.mubr.msk.bf16.gmra.mrb[4].mxu1 %vm3447_vm2, %v3621_v30  ;;  %v3354_v0 = vpop.permute.xlu0 %3353 }
 0x345   : > { %v3425_v39 = vmul.f32 %v9333_v32, %v3173_v11  ;;  %v3174_v40 = vmax.f32 %v3138_v33, 0.0  ;;  %7604 = vmatprep.mubr.msk.bf16.mxu1 %vm3447_vm2, %v3622_v31 }
 0x346   : > { %v3423_v41 = vmul.f32 %v9325_v18, %v3171_v36  ;;  %v3172_v42 = vmax.f32 %v3136_v38, 0.0 }
 0x347   : > { %3504 = vst.msk [vmem:[#allocation2 + $0x83] sm:$0xff] %vm3447_vm2, %v3425_v39  ;;  %v3426_v43 = vmul.f32 %v9338_v37, %v3174_v40  ;;  %v3592_v50 = vld [vmem:[#allocation2 + $0x51] sm:$0xff] }
 0x348   : > { %3502 = vst.msk [vmem:[#allocation2 + $0x73] sm:$0xff] %vm3447_vm2, %v3423_v41  ;;  %v3424_v45 = vmul.f32 %v9329_v24, %v3172_v42  ;;  %v7576_v46 = vpop.f32.mrb[16].mxu0  ;;  %v3595_v48 = vld [vmem:[#allocation2 + $0x69] sm:$0xff]  ;;  %v3364_v25 = vpop.permute.xlu0 %3363 }
 0x349   : > { %3505 = vst.msk [vmem:[#allocation2 + $0x8b] sm:$0xff] %vm3447_vm2, %v3426_v43  ;;  %v3141_v32 = vadd.f32 %v7576_v46, %v9322_v14  ;;  %v3001_v49 = vpop.f32.mrb[17].mxu0  ;;  %v3593_v52 = vld [vmem:[#allocation2 + $0x59] sm:$0xff]  ;;  %v3594_v18 = vld [vmem:[#allocation2 + $0x61] sm:$0xff] }
 0x34a   : > { %3503 = vst.msk [vmem:[#allocation2 + $0x7b] sm:$0xff] %vm3447_vm2, %v3424_v45  ;;  %v3139_v37 = vadd.f32 %v9322_v14, %v3001_v49  ;;  %v7577_v54 = vpop.f32.mrb[18].mxu0  ;;  %v3623_v55 = vpack.c.bf16 %v3593_v52, %v3592_v50  ;;  %v3624_v56 = vpack.c.bf16 %v3595_v48, %v3594_v18  ;;  %v3379_v49 = vpop.permute.xlu1 %3378 }
 0x34b   : > { %v3177_v57 = vmax.f32 %v3141_v32, 0.0  ;;  %v3142_v24 = vadd.f32 %v7577_v54, %v9322_v14  ;;  %v3004_v58 = vpop.f32.mrb[19].mxu0 }
 0x34c   : > { %v3175_v60 = vmax.f32 %v3139_v37, 0.0  ;;  %v3140_v61 = vadd.f32 %v9322_v14, %v3004_v58  ;;  %7605 = vmatmul.mubr.msk.bf16.gmra.mrb[8].mxu1 %vm3447_vm2, %v3623_v55  ;;  %v3374_v43 = vpop.permute.xlu0 %3373 }
 0x34d   : > { %v3429_v62 = vmul.f32 %v9362_v7, %v3177_v57  ;;  %v3178_v63 = vmax.f32 %v3142_v24, 0.0  ;;  %7608 = vmatprep.mubr.msk.bf16.mxu1 %vm3447_vm2, %v3624_v56 }
 0x34e   : > { %v3427_v2 = vmul.f32 %v9344_v47, %v3175_v60  ;;  %v3176_v3 = vmax.f32 %v3140_v61, 0.0 }
 0x34f   : > { %3508 = vst.msk [vmem:[#allocation2 + $0xa3] sm:$0xff] %vm3447_vm2, %v3429_v62  ;;  %v3430_v4 = vmul.f32 %v9368_v16, %v3178_v63  ;;  %v3596_v17 = vld [vmem:[#allocation2 + $0x71] sm:$0xff] }
 0x350   : > { %3506 = vst.msk [vmem:[#allocation2 + $0x93] sm:$0xff] %vm3447_vm2, %v3427_v2  ;;  %v3428_v8 = vmul.f32 %v9347_v51, %v3176_v3  ;;  %v7580_v9 = vpop.f32.mrb[20].mxu0  ;;  %v3599_v15 = vld [vmem:[#allocation2 + $0x89] sm:$0xff]  ;;  %v3384_v56 = vpop.permute.xlu0 %3383 }
 0x351   : > { %3509 = vst.msk [vmem:[#allocation2 + $0xab] sm:$0xff] %vm3447_vm2, %v3430_v4  ;;  %v3145_v7 = vadd.f32 %v7580_v9, %v9322_v14  ;;  %v3017_v1 = vpop.f32.mrb[21].mxu0  ;;  %v3597_v47 = vld [vmem:[#allocation2 + $0x79] sm:$0xff]  ;;  %v3598_v19 = vld [vmem:[#allocation2 + $0x81] sm:$0xff] }
 0x352   : > { %3507 = vst.msk [vmem:[#allocation2 + $0x9b] sm:$0xff] %vm3447_vm2, %v3428_v8  ;;  %v3143_v16 = vadd.f32 %v9322_v14, %v3017_v1  ;;  %v7581_v20 = vpop.f32.mrb[22].mxu0  ;;  %v3625_v12 = vpack.c.bf16 %v3597_v47, %v3596_v17  ;;  %v3626_v21 = vpack.c.bf16 %v3599_v15, %v3598_v19 }
 0x353   : > { %v3181_v22 = vmax.f32 %v3145_v7, 0.0  ;;  %v3146_v51 = vadd.f32 %v7581_v20, %v9322_v14  ;;  %v3020_v23 = vpop.f32.mrb[23].mxu0 }
 0x354   : > { %v3179_v10 = vmax.f32 %v3143_v16, 0.0  ;;  %v3144_v26 = vadd.f32 %v9322_v14, %v3020_v23  ;;  %7609 = vmatmul.mubr.msk.bf16.gmra.mrb[12].mxu1 %vm3447_vm2, %v3625_v12  ;;  %v3394_v16 = vpop.permute.xlu0 %3393 }
 0x355   : > { %v3433_v27 = vmul.f32 %v3344_v44, %v3181_v22  ;;  %v3182_v13 = vmax.f32 %v3146_v51, 0.0  ;;  %7612 = vmatprep.mubr.msk.bf16.mxu1 %vm3447_vm2, %v3626_v21 }
 0x356   : > { %v3431_v30 = vmul.f32 %v9379_v28, %v3179_v10  ;;  %v3180_v31 = vmax.f32 %v3144_v26, 0.0 }
 0x357   : > { %3512 = vst.msk [vmem:[#allocation2 + $0xc3] sm:$0xff] %vm3447_vm2, %v3433_v27  ;;  %v3434_v11 = vmul.f32 %v3349_v53, %v3182_v13  ;;  %v3600_v40 = vld [vmem:[#allocation2 + $0x91] sm:$0xff] }
 0x358   : > { %3510 = vst.msk [vmem:[#allocation2 + $0xb3] sm:$0xff] %vm3447_vm2, %v3431_v30  ;;  %v3432_v33 = vmul.f32 %v9384_v35, %v3180_v31  ;;  %v7584_v34 = vpop.f32.mrb[24].mxu0  ;;  %v3603_v36 = vld [vmem:[#allocation2 + $0xa9] sm:$0xff] }
 0x359   : > { %3513 = vst.msk [vmem:[#allocation2 + $0xcb] sm:$0xff] %vm3447_vm2, %v3434_v11  ;;  %v3149_v38 = vadd.f32 %v7584_v34, %v9322_v14  ;;  %v3033_v39 = vpop.f32.mrb[25].mxu0  ;;  %v3601_v41 = vld [vmem:[#allocation2 + $0x99] sm:$0xff]  ;;  %v3602_v42 = vld [vmem:[#allocation2 + $0xa1] sm:$0xff]  ;;  %v5100_v59 = vld [vmem:[#allocation2 + $0x8c] sm:$0xff] }
 0x35a   : > { %3511 = vst.msk [vmem:[#allocation2 + $0xbb] sm:$0xff] %vm3447_vm2, %v3432_v33  ;;  %v3147_v28 = vadd.f32 %v9322_v14, %v3033_v39  ;;  %v7585_v44 = vpop.f32.mrb[26].mxu0  ;;  %v3627_v45 = vpack.c.bf16 %v3601_v41, %v3600_v40  ;;  %v3628_v46 = vpack.c.bf16 %v3603_v36, %v3602_v42  ;;  %v3404_v39 = vpop.permute.xlu0 %3403 }
 0x35b   : > { %v3185_v48 = vmax.f32 %v3149_v38, 0.0  ;;  %v3150_v35 = vadd.f32 %v7585_v44, %v9322_v14  ;;  %v3036_v32 = vpop.f32.mrb[27].mxu0 }
 0x35c   : > { %v3183_v50 = vmax.f32 %v3147_v28, 0.0  ;;  %v3148_v52 = vadd.f32 %v9322_v14, %v3036_v32  ;;  %7613 = vmatmul.mubr.msk.bf16.gmra.mrb[16].mxu1 %vm3447_vm2, %v3627_v45 }
 0x35d   : > { %v3437_v18 = vmul.f32 %v3364_v25, %v3185_v48  ;;  %v3186_v53 = vmax.f32 %v3150_v35, 0.0  ;;  %7616 = vmatprep.mubr.msk.bf16.mxu1 %vm3447_vm2, %v3628_v46 }
 0x35e   : > { %v3435_v37 = vmul.f32 %v3354_v0, %v3183_v50  ;;  %v3184_v54 = vmax.f32 %v3148_v52, 0.0  ;;  %v3389_v0 = vpop.permute.xlu1 %3388 }
 0x35f   : > { %3516 = vst.msk [vmem:[#allocation2 + $0xe3] sm:$0xff] %vm3447_vm2, %v3437_v18  ;;  %v3438_v55 = vmul.f32 %v3369_v29, %v3186_v53  ;;  %v3604_v62 = vld [vmem:[#allocation2 + $0xb1] sm:$0xff]  ;;  %v3527_v18 = vld [vmem:[#allocation2] sm:$0xff]  ;;  %v3528_v53 = vld [vmem:[#allocation2 + $0x8] sm:$0xff] }
 0x360   : > { %3514 = vst.msk [vmem:[#allocation2 + $0xd3] sm:$0xff] %vm3447_vm2, %v3435_v37  ;;  %v3436_v57 = vmul.f32 %v9407_v5, %v3184_v54  ;;  %v7588_v24 = vpop.f32.mrb[28].mxu0  ;;  %v3607_v58 = vld [vmem:[#allocation2 + $0xc9] sm:$0xff] }
 0x361   : > { %3517 = vst.msk [vmem:[#allocation2 + $0xeb] sm:$0xff] %vm3447_vm2, %v3438_v55  ;;  %v3153_v60 = vadd.f32 %v7588_v24, %v9322_v14  ;;  %v3049_v61 = vpop.f32.mrb[29].mxu0  ;;  %v3605_v63 = vld [vmem:[#allocation2 + $0xb9] sm:$0xff]  ;;  %v3606_v2 = vld [vmem:[#allocation2 + $0xc1] sm:$0xff]  ;;  %v3563_v55 = vpack.c.bf16 %v3528_v53, %v3527_v18  ;;  %v4112_v53 = vld [vmem:[#allocation2 + $0x2a] sm:$0xff] }
 0x362   : > { %3515 = vst.msk [vmem:[#allocation2 + $0xdb] sm:$0xff] %vm3447_vm2, %v3436_v57  ;;  %v3151_v3 = vadd.f32 %v9322_v14, %v3049_v61  ;;  %v7589_v4 = vpop.f32.mrb[30].mxu0  ;;  %v3629_v8 = vpack.c.bf16 %v3605_v63, %v3604_v62  ;;  %v3630_v9 = vpack.c.bf16 %v3607_v58, %v3606_v2  ;;  %v3399_v22 = vpop.permute.xlu1 %3398  ;;  %v3530_v57 = vld [vmem:[#allocation2 + $0x18] sm:$0xff]  ;;  %v3531_v24 = vld [vmem:[#allocation2 + $0x20] sm:$0xff]  ;;  %v3532_v58 = vld [vmem:[#allocation2 + $0x28] sm:$0xff]  ;;  %v4218_v62 = vsel %vm3692_vm3, %v9360_v6, 0 }
 0x363   : > { %v3189_v15 = vmax.f32 %v3153_v60, 0.0  ;;  %v3154_v5 = vadd.f32 %v7589_v4, %v9322_v14  ;;  %v3052_v7 = vpop.f32.mrb[31].mxu0  ;;  %v3529_v60 = vld [vmem:[#allocation2 + $0x10] sm:$0xff]  ;;  %v3565_v63 = vpack.c.bf16 %v3532_v58, %v3531_v24  ;;  %v9465_v2 = vld [vmem:[%s9793_s3 + $0xc] sm:$0xf]  ;;  %v4111_v18 = vld [vmem:[#allocation2 + $0x22] sm:$0xff] }
 0x364   : > { %v3187_v1 = vmax.f32 %v3151_v3, 0.0  ;;  %v3152_v17 = vadd.f32 %v9322_v14, %v3052_v7  ;;  %7617 = vmatmul.mubr.msk.bf16.gmra.mrb[20].mxu1 %vm3447_vm2, %v3629_v8  ;;  %v3564_v61 = vpack.c.bf16 %v3530_v57, %v3529_v60  ;;  %v3535_v3 = vld [vmem:[#allocation2 + $0x40] sm:$0xff]  ;;  %v3536_v4 = vld [vmem:[#allocation2 + $0x48] sm:$0xff]  ;;  %v3533_v8 = vld [vmem:[#allocation2 + $0x30] sm:$0xff] }
 0x365   : > { %v3441_v47 = vmul.f32 %v3384_v56, %v3189_v15  ;;  %v3190_v19 = vmax.f32 %v3154_v5, 0.0  ;;  %7620 = vmatprep.mubr.msk.bf16.mxu1 %vm3447_vm2, %v3630_v9  ;;  %v3567_v6 = vpack.c.bf16 %v3536_v4, %v3535_v3  ;;  %v3538_v15 = vld [vmem:[#allocation2 + $0x58] sm:$0xff]  ;;  %v3539_v5 = vld [vmem:[#allocation2 + $0x60] sm:$0xff]  ;;  %v3540_v7 = vld [vmem:[#allocation2 + $0x68] sm:$0xff] }
 0x366   : > { %v3439_v20 = vmul.f32 %v3374_v43, %v3187_v1  ;;  %v3188_v12 = vmax.f32 %v3152_v17, 0.0  ;;  %v3409_v28 = vpop.permute.xlu1 %3408  ;;  %v3537_v1 = vld [vmem:[#allocation2 + $0x50] sm:$0xff]  ;;  %v4114_v24 = vld [vmem:[#allocation2 + $0x3a] sm:$0xff]  ;;  %v4115_v58 = vld [vmem:[#allocation2 + $0x42] sm:$0xff] }
 0x367   : > { %3520 = vst.msk [vmem:[#allocation2 + $0x103] sm:$0xff] %vm3447_vm2, %v3441_v47  ;;  %v3442_v21 = vmul.f32 %v3389_v0, %v3190_v19  ;;  %v3608_v27 = vld [vmem:[#allocation2 + $0xd1] sm:$0xff]  ;;  %v3568_v17 = vpack.c.bf16 %v3538_v15, %v3537_v1  ;;  %v3569_v47 = vpack.c.bf16 %v3540_v7, %v3539_v5  ;;  %v4123_v15 = vld [vmem:[#allocation2 + $0x82] sm:$0xff] }
 0x368   : > { %3518 = vst.msk [vmem:[#allocation2 + $0xf3] sm:$0xff] %vm3447_vm2, %v3439_v20  ;;  %v3440_v51 = vmul.f32 %v3379_v49, %v3188_v12  ;;  %v7592_v23 = vpop.f32.mrb[32].mxu0  ;;  %v3611_v25 = vld [vmem:[#allocation2 + $0xe9] sm:$0xff]  ;;  %v3534_v0 = vld [vmem:[#allocation2 + $0x38] sm:$0xff] }
 0x369   : > { %3521 = vst.msk [vmem:[#allocation2 + $0x10b] sm:$0xff] %vm3447_vm2, %v3442_v21  ;;  %v3157_v10 = vadd.f32 %v7592_v23, %v9322_v14  ;;  %v3065_v26 = vpop.f32.mrb[33].mxu0  ;;  %v3609_v13 = vld [vmem:[#allocation2 + $0xd9] sm:$0xff]  ;;  %v3610_v29 = vld [vmem:[#allocation2 + $0xe1] sm:$0xff]  ;;  %v3566_v9 = vpack.c.bf16 %v3534_v0, %v3533_v8  ;;  %v3541_v12 = vld [vmem:[#allocation2 + $0x70] sm:$0xff] }
 0x36a   : > { %3519 = vst.msk [vmem:[#allocation2 + $0xfb] sm:$0xff] %vm3447_vm2, %v3440_v51  ;;  %v3155_v30 = vadd.f32 %v9322_v14, %v3065_v26  ;;  %v7593_v31 = vpop.f32.mrb[34].mxu0  ;;  %v3631_v11 = vpack.c.bf16 %v3609_v13, %v3608_v27  ;;  %v3632_v33 = vpack.c.bf16 %v3611_v25, %v3610_v29  ;;  %v3542_v19 = vld [vmem:[#allocation2 + $0x78] sm:$0xff]  ;;  %v3544_v20 = vld [vmem:[#allocation2 + $0x88] sm:$0xff]  ;;  %v3547_v23 = vld [vmem:[#allocation2 + $0xa0] sm:$0xff] }
 0x36b   : > { %v3193_v34 = vmax.f32 %v3157_v10, 0.0  ;;  %v3158_v36 = vadd.f32 %v7593_v31, %v9322_v14  ;;  %v3068_v38 = vpop.f32.mrb[35].mxu0  ;;  %v3570_v21 = vpack.c.bf16 %v3542_v19, %v3541_v12  ;;  %v3546_v51 = vld [vmem:[#allocation2 + $0x98] sm:$0xff]  ;;  %v3548_v25 = vld [vmem:[#allocation2 + $0xa8] sm:$0xff]  ;;  %v3545_v10 = vld [vmem:[#allocation2 + $0x90] sm:$0xff] }
 0x36c   : > { %v3191_v40 = vmax.f32 %v3155_v30, 0.0  ;;  %v3156_v41 = vadd.f32 %v9322_v14, %v3068_v38  ;;  %7621 = vmatmul.mubr.msk.bf16.gmra.mrb[24].mxu1 %vm3447_vm2, %v3631_v11  ;;  %v3572_v26 = vpack.c.bf16 %v3546_v51, %v3545_v10  ;;  %v3573_v27 = vpack.c.bf16 %v3548_v25, %v3547_v23  ;;  %v3550_v13 = vld [vmem:[#allocation2 + $0xb8] sm:$0xff]  ;;  %v3551_v29 = vld [vmem:[#allocation2 + $0xc0] sm:$0xff]  ;;  %v3552_v30 = vld [vmem:[#allocation2 + $0xc8] sm:$0xff] }
 0x36d   : > { %v3445_v42 = vmul.f32 %v3404_v39, %v3193_v34  ;;  %v3194_v43 = vmax.f32 %v3158_v36, 0.0  ;;  %7624 = vmatprep.mubr.msk.bf16.mxu1 %vm3447_vm2, %v3632_v33  ;;  %v3549_v31 = vld [vmem:[#allocation2 + $0xb0] sm:$0xff]  ;;  %v3575_v33 = vpack.c.bf16 %v3552_v30, %v3551_v29  ;;  %v3554_v34 = vld [vmem:[#allocation2 + $0xd8] sm:$0xff]  ;;  %v3555_v36 = vld [vmem:[#allocation2 + $0xe0] sm:$0xff] }
 0x36e   : > { %v3443_v44 = vmul.f32 %v3394_v16, %v3191_v40  ;;  %v3192_v45 = vmax.f32 %v3156_v41, 0.0  ;;  %v3543_v16 = vld [vmem:[#allocation2 + $0x80] sm:$0xff]  ;;  %v3574_v11 = vpack.c.bf16 %v3550_v13, %v3549_v31  ;;  %v3556_v38 = vld [vmem:[#allocation2 + $0xe8] sm:$0xff]  ;;  %v3553_v39 = vld [vmem:[#allocation2 + $0xd0] sm:$0xff] }
 0x36f   : > { %3524 = vst.msk [vmem:[#allocation2 + $0x123] sm:$0xff] %vm3447_vm2, %v3445_v42  ;;  %v3446_v46 = vmul.f32 %v3409_v28, %v3194_v43  ;;  %v3612_v14 = vld [vmem:[#allocation2 + $0xf1] sm:$0xff]  ;;  %v3576_v40 = vpack.c.bf16 %v3554_v34, %v3553_v39  ;;  %v3577_v41 = vpack.c.bf16 %v3556_v38, %v3555_v36  ;;  %v4119_v0 = vld [vmem:[#allocation2 + $0x62] sm:$0xff] }
 0x370   : > { %3522 = vst.msk [vmem:[#allocation2 + $0x113] sm:$0xff] %vm3447_vm2, %v3443_v44  ;;  %v3444_v48 = vmul.f32 %v3399_v22, %v3192_v45  ;;  %v3615_v35 = vld [vmem:[#allocation2 + $0x109] sm:$0xff]  ;;  %v3571_v22 = vpack.c.bf16 %v3544_v20, %v3543_v16  ;;  %v4117_v4 = vld [vmem:[#allocation2 + $0x52] sm:$0xff] }
 0x371   : > { %3526 = vst.msk [vmem:[#allocation2 + $0x12b] sm:$0x3f] %vm3525_vm4, %v3446_v46  ;;  %v3613_v32 = vld [vmem:[#allocation2 + $0xf9] sm:$0xff]  ;;  %v3614_v49 = vld [vmem:[#allocation2 + $0x101] sm:$0xff]  ;;  %v3557_v44 = vld [vmem:[#allocation2 + $0xf0] sm:$0xff] }
 0x372   : > { %3523 = vst.msk [vmem:[#allocation2 + $0x11b] sm:$0xff] %vm3447_vm2, %v3444_v48  ;;  %v3633_v50 = vpack.c.bf16 %v3613_v32, %v3612_v14  ;;  %v3634_v52 = vpack.c.bf16 %v3615_v35, %v3614_v49  ;;  %v3558_v42 = vld [vmem:[#allocation2 + $0xf8] sm:$0xff]  ;;  %v3559_v43 = vld [vmem:[#allocation2 + $0x100] sm:$0xff]  ;;  %v3560_v28 = vld [vmem:[#allocation2 + $0x108] sm:$0xff] }
 0x373   : > { %v3578_v45 = vpack.c.bf16 %v3558_v42, %v3557_v44  ;;  %v3579_v46 = vpack.c.bf16 %v3560_v28, %v3559_v43  ;;  %v4107_v48 = vld [vmem:[#allocation2 + $0x2] sm:$0xff]  ;;  %v4108_v35 = vld [vmem:[#allocation2 + $0xa] sm:$0xff]  ;;  %v4121_v7 = vld [vmem:[#allocation2 + $0x72] sm:$0xff] }
 0x374   : > { %7625 = vmatmul.mubr.msk.bf16.gmra.mrb[28].mxu1 %vm3447_vm2, %v3633_v50  ;;  %v4143_v49 = vpack.c.bf16 %v4108_v35, %v4107_v48  ;;  %v9496_v57 = vld [vmem:[%s9793_s3 + $0x10] sm:$0xf]  ;;  %v4127_v19 = vld [vmem:[#allocation2 + $0xa2] sm:$0xff]  ;;  %v6831_v44 = vld [vmem:[%s9793_s3 + $0x14] sm:$0xf] }
 0x375   : > { %7628 = vmatprep.mubr.msk.bf16.mxu1 %vm3447_vm2, %v3634_v52  ;;  %v4110_v52 = vld [vmem:[#allocation2 + $0x1a] sm:$0xff]  ;;  %v4116_v60 = vld [vmem:[#allocation2 + $0x4a] sm:$0xff]  ;;  %v4125_v20 = vld [vmem:[#allocation2 + $0x92] sm:$0xff]  ;;  %v4870_v28 = vsel %vm3692_vm3, %v9496_v57, 0 }
 0x376   : > { %v4120_v3 = vld [vmem:[#allocation2 + $0x6a] sm:$0xff]  ;;  %v4131_v51 = vld [vmem:[#allocation2 + $0xc2] sm:$0xff]  ;;  %v4129_v25 = vld [vmem:[#allocation2 + $0xb2] sm:$0xff] }
 0x377   : > { %v3616_v37 = vld [vmem:[#allocation2 + $0x111] sm:$0xff]  ;;  %v4135_v13 = vld [vmem:[#allocation2 + $0xe2] sm:$0xff] }
 0x378   : > { %v3561_v32 = vld [vmem:[#allocation2 + $0x110] sm:$0xff]  ;;  %v4139_v34 = vld [vmem:[#allocation2 + $0x102] sm:$0xff]  ;;  %v4468_v35 = vld [vmem:[#allocation2 + $0x12a] sm:$0x3f] }
 0x379   : > { %v3617_v54 = vld [vmem:[#allocation2 + $0x119] sm:$0x3f]  ;;  %v4124_v5 = vld [vmem:[#allocation2 + $0x8a] sm:$0xff]  ;;  %v4467_v48 = vld [vmem:[#allocation2 + $0x122] sm:$0xff] }
 0x37a   : > { %v3635_v56 = vpack.c.bf16 %v3617_v54, %v3616_v37  ;;  %v3562_v14 = vld [vmem:[#allocation2 + $0x118] sm:$0x3f]  ;;  %v4128_v16 = vld [vmem:[#allocation2 + $0xaa] sm:$0xff] }
 0x37b   : > { %v3580_v50 = vpack.c.bf16 %v3562_v14, %v3561_v32  ;;  %v4109_v37 = vld [vmem:[#allocation2 + $0x12] sm:$0xff]  ;;  %v4132_v23 = vld [vmem:[#allocation2 + $0xca] sm:$0xff]  ;;  %v4760_v14 = vld [vmem:[#allocation2 + $0x1b] sm:$0xff]  ;;  %v4486_v32 = vpack.c.bf16 %v4468_v35, %v4467_v48 }
 0x37c   : > { %7629 = vmatmul.mubr.msk.bf16.gmra.mrb[32].mxu1 %vm3447_vm2, %v3635_v56  ;;  %v9487_v54 = vpack.c.bf16 %v4110_v52, %v4109_v37  ;;  %v9491_v56 = vpack.c.bf16 %v4112_v53, %v4111_v18  ;;  %v4136_v29 = vld [vmem:[#allocation2 + $0xea] sm:$0xff]  ;;  %v4133_v30 = vld [vmem:[#allocation2 + $0xd2] sm:$0xff]  ;;  %v4764_v18 = vld [vmem:[#allocation2 + $0x3b] sm:$0xff] }
 0x37d   : > { %7634 = vmatprep.mubr.msk.bf16.mxu1 %vm3447_vm2, %v3563_v55  ;;  %v4544_v55 = vsel %vm3692_vm3, %v9465_v2, 0  ;;  %v4140_v36 = vld [vmem:[#allocation2 + $0x10a] sm:$0xff]  ;;  %v4137_v38 = vld [vmem:[#allocation2 + $0xf2] sm:$0xff]  ;;  %v5090_v35 = vld [vmem:[#allocation2 + $0x3c] sm:$0xff] }
 0x37e   : > { %v4141_v42 = vld [vmem:[#allocation2 + $0x112] sm:$0xff]  ;;  %v4761_v53 = vld [vmem:[#allocation2 + $0x23] sm:$0xff] }
 0x37f   : > { %v4762_v52 = vld [vmem:[#allocation2 + $0x2b] sm:$0xff]  ;;  %v5089_v48 = vld [vmem:[#allocation2 + $0x34] sm:$0xff] }
 0x380   : > { %v4796_v37 = vpack.c.bf16 %v4762_v52, %v4761_v53  ;;  %v9581_v52 = vld [vmem:[%s9793_s3 + $0x1c] sm:$0xf]  ;;  %v5093_v53 = vld [vmem:[#allocation2 + $0x54] sm:$0xff] }
 0x384   : > { %7635 = vmatmul.mubr.msk.bf16.vlgmr.msra.gmra.mrb[0].mxu1 %vm3447_vm2, %v3564_v61  ;;  %v4113_v61 = vld [vmem:[#allocation2 + $0x32] sm:$0xff] }
 0x385   : > { %7671 = vmatpush3.bf16.msra.mxu1 %v4218_v62  ;;  %7638 = vmatprep.mubr.msk.bf16.mxu1 %vm3447_vm2, %v3565_v63  ;;  %v4146_v62 = vpack.c.bf16 %v4114_v24, %v4113_v61  ;;  %v4147_v63 = vpack.c.bf16 %v4116_v60, %v4115_v58  ;;  %v4766_v24 = vld [vmem:[#allocation2 + $0x4b] sm:$0xff]  ;;  %v4768_v58 = vld [vmem:[#allocation2 + $0x5b] sm:$0xff]  ;;  %v4765_v60 = vld [vmem:[#allocation2 + $0x43] sm:$0xff] }
 0x386   : > { %8524 = vmatprep.subr.msk.bf16.mxu1 %vm3692_vm3, %v9465_v2  ;;  %v4118_v2 = vld [vmem:[#allocation2 + $0x5a] sm:$0xff]  ;;  %v4798_v61 = vpack.c.bf16 %v4766_v24, %v4765_v60  ;;  %v5095_v60 = vld [vmem:[#allocation2 + $0x64] sm:$0xff] }
 0x387   : > { %v4148_v8 = vpack.c.bf16 %v4118_v2, %v4117_v4  ;;  %v4770_v2 = vld [vmem:[#allocation2 + $0x6b] sm:$0xff]  ;;  %v5097_v24 = vld [vmem:[#allocation2 + $0x74] sm:$0xff] }
 0x38c   : > { %7639 = vmatmul.mubr.msk.bf16.gmra.mrb[4].mxu1 %vm3447_vm2, %v3566_v9  ;;  %v4149_v9 = vpack.c.bf16 %v4120_v3, %v4119_v0  ;;  %v4772_v0 = vld [vmem:[#allocation2 + $0x7b] sm:$0xff]  ;;  %v4769_v3 = vld [vmem:[#allocation2 + $0x63] sm:$0xff] }
 0x38d   : > { %7642 = vmatprep.mubr.msk.bf16.mxu1 %vm3447_vm2, %v3567_v6  ;;  %v4122_v6 = vld [vmem:[#allocation2 + $0x7a] sm:$0xff]  ;;  %v4800_v4 = vpack.c.bf16 %v4770_v2, %v4769_v3 }
 0x38e   : > { %v4150_v1 = vpack.c.bf16 %v4122_v6, %v4121_v7  ;;  %v4774_v6 = vld [vmem:[#allocation2 + $0x8b] sm:$0xff]  ;;  %v5102_v2 = vld [vmem:[#allocation2 + $0x9c] sm:$0xff] }
 0x394   : > { %7643 = vmatmul.mubr.msk.bf16.gmra.mrb[8].mxu1 %vm3447_vm2, %v3568_v17  ;;  %v4151_v17 = vpack.c.bf16 %v4124_v5, %v4123_v15  ;;  %v4776_v15 = vld [vmem:[#allocation2 + $0x9b] sm:$0xff]  ;;  %v4773_v5 = vld [vmem:[#allocation2 + $0x83] sm:$0xff] }
 0x395   : > { %7646 = vmatprep.mubr.msk.bf16.mxu1 %vm3447_vm2, %v3569_v47  ;;  %v4126_v47 = vld [vmem:[#allocation2 + $0x9a] sm:$0xff]  ;;  %v4802_v7 = vpack.c.bf16 %v4774_v6, %v4773_v5 }
 0x396   : > { %v4152_v12 = vpack.c.bf16 %v4126_v47, %v4125_v20  ;;  %v4778_v47 = vld [vmem:[#allocation2 + $0xab] sm:$0xff]  ;;  %v5106_v6 = vld [vmem:[#allocation2 + $0xbc] sm:$0xff] }
 0x39c   : > { %7647 = vmatmul.mubr.msk.bf16.gmra.mrb[12].mxu1 %vm3447_vm2, %v3570_v21  ;;  %v4153_v21 = vpack.c.bf16 %v4128_v16, %v4127_v19  ;;  %v4780_v19 = vld [vmem:[#allocation2 + $0xbb] sm:$0xff]  ;;  %v4777_v16 = vld [vmem:[#allocation2 + $0xa3] sm:$0xff] }
 0x39d   : > { %7650 = vmatprep.mubr.msk.bf16.mxu1 %vm3447_vm2, %v3571_v22  ;;  %v4130_v22 = vld [vmem:[#allocation2 + $0xba] sm:$0xff]  ;;  %v4804_v20 = vpack.c.bf16 %v4778_v47, %v4777_v16 }
 0x39e   : > { %v4154_v10 = vpack.c.bf16 %v4130_v22, %v4129_v25  ;;  %v4782_v22 = vld [vmem:[#allocation2 + $0xcb] sm:$0xff]  ;;  %v5110_v47 = vld [vmem:[#allocation2 + $0xdc] sm:$0xff] }
 0x3a4   : > { %7651 = vmatmul.mubr.msk.bf16.gmra.mrb[16].mxu1 %vm3447_vm2, %v3572_v26  ;;  %v4155_v26 = vpack.c.bf16 %v4132_v23, %v4131_v51  ;;  %v4784_v51 = vld [vmem:[#allocation2 + $0xdb] sm:$0xff]  ;;  %v4781_v23 = vld [vmem:[#allocation2 + $0xc3] sm:$0xff] }
 0x3a5   : > { %7654 = vmatprep.mubr.msk.bf16.mxu1 %vm3447_vm2, %v3573_v27  ;;  %v4134_v27 = vld [vmem:[#allocation2 + $0xda] sm:$0xff]  ;;  %v4806_v25 = vpack.c.bf16 %v4782_v22, %v4781_v23 }
 0x3a6   : > { %v4156_v31 = vpack.c.bf16 %v4134_v27, %v4133_v30  ;;  %v4786_v27 = vld [vmem:[#allocation2 + $0xeb] sm:$0xff]  ;;  %v5114_v22 = vld [vmem:[#allocation2 + $0xfc] sm:$0xff] }
 0x3ac   : > { %7655 = vmatmul.mubr.msk.bf16.gmra.mrb[20].mxu1 %vm3447_vm2, %v3574_v11  ;;  %v4157_v11 = vpack.c.bf16 %v4136_v29, %v4135_v13  ;;  %v4788_v13 = vld [vmem:[#allocation2 + $0xfb] sm:$0xff]  ;;  %v4785_v29 = vld [vmem:[#allocation2 + $0xe3] sm:$0xff] }
 0x3ad   : > { %7658 = vmatprep.mubr.msk.bf16.mxu1 %vm3447_vm2, %v3575_v33  ;;  %v4138_v33 = vld [vmem:[#allocation2 + $0xfa] sm:$0xff]  ;;  %v4808_v30 = vpack.c.bf16 %v4786_v27, %v4785_v29 }
 0x3ae   : > { %v4158_v39 = vpack.c.bf16 %v4138_v33, %v4137_v38  ;;  %v4790_v33 = vld [vmem:[#allocation2 + $0x10b] sm:$0xff]  ;;  %v5118_v27 = vld [vmem:[#allocation2 + $0x11c] sm:$0xff] }
 0x3b4   : > { %7659 = vmatmul.mubr.msk.bf16.gmra.mrb[24].mxu1 %vm3447_vm2, %v3576_v40  ;;  %v4159_v40 = vpack.c.bf16 %v4140_v36, %v4139_v34  ;;  %v4792_v34 = vld [vmem:[#allocation2 + $0x11b] sm:$0xff]  ;;  %v4789_v36 = vld [vmem:[#allocation2 + $0x103] sm:$0xff] }
 0x3b5   : > { %7662 = vmatprep.mubr.msk.bf16.mxu1 %vm3447_vm2, %v3577_v41  ;;  %v4142_v41 = vld [vmem:[#allocation2 + $0x11a] sm:$0x3f]  ;;  %v4810_v38 = vpack.c.bf16 %v4790_v33, %v4789_v36  ;;  %v6888_v36 = vld [vmem:[%s9793_s3 + $0x20] sm:$0xf] }
 0x3b6   : > { %v4160_v43 = vpack.c.bf16 %v4142_v41, %v4141_v42  ;;  %v4794_v41 = vld [vmem:[#allocation2 + $0x12b] sm:$0x3f] }
 0x3bc   : > { %7663 = vmatmul.mubr.msk.bf16.gmra.mrb[28].mxu1 %vm3447_vm2, %v3578_v45  ;;  %v4466_v45 = vld [vmem:[#allocation2 + $0x11a] sm:$0xff] }
 0x3bd   : > { %7666 = vmatprep.mubr.msk.bf16.mxu1 %vm3447_vm2, %v3579_v46  ;;  %v4485_v46 = vpack.c.bf16 %v4466_v45, %v4141_v42  ;;  %v5085_v42 = vld [vmem:[#allocation2 + $0x14] sm:$0xff] }
 0x3c4   : > { %7667 = vmatmul.mubr.msk.bf16.gmra.mrb[32].mxu1 %vm3447_vm2, %v3580_v50 }
 0x3c5   : > { %7672 = vmatprep.mubr.msk.bf16.mxu1 %vm3447_vm2, %v4143_v49  ;;  %v4759_v49 = vld [vmem:[#allocation2 + $0x13] sm:$0xff] }
 0x3c6   : > { %v4795_v50 = vpack.c.bf16 %v4760_v14, %v4759_v49  ;;  %v5087_v14 = vld [vmem:[#allocation2 + $0x24] sm:$0xff] }
 0x3cc   : > { %7673 = vmatmul.mubr.msk.bf16.vlgmr.msra.gmra.mrb[0].mxu1 %vm3447_vm2, %v9487_v54 }
 0x3cd   : > { %7709 = vmatpush3.bf16.msra.mxu1 %v4544_v55  ;;  %7676 = vmatprep.mubr.msk.bf16.mxu1 %vm3447_vm2, %v9491_v56  ;;  %v4763_v55 = vld [vmem:[#allocation2 + $0x33] sm:$0xff] }
 0x3ce   : > { %8525 = vmatprep.subr.msk.bf16.mxu1 %vm3692_vm3, %v9496_v57  ;;  %v9550_v57 = vld [vmem:[%s9793_s3 + $0x18] sm:$0xf] }
 0x3cf   : > { %v5522_v49 = vsel %vm3692_vm3, %v9550_v57, 0 }
 0x3d4   : > { %7677 = vmatmul.mubr.msk.bf16.gmra.mrb[4].mxu1 %vm3447_vm2, %v4146_v62 }
 0x3d5   : > { %7680 = vmatprep.mubr.msk.bf16.mxu1 %vm3447_vm2, %v4147_v63 }
 0x3dc   : > { %7681 = vmatmul.mubr.msk.bf16.gmra.mrb[8].mxu1 %vm3447_vm2, %v4148_v8 }
 0x3dd   : > { %7684 = vmatprep.mubr.msk.bf16.mxu1 %vm3447_vm2, %v4149_v9 }
 0x3e4   : > { %7685 = vmatmul.mubr.msk.bf16.gmra.mrb[12].mxu1 %vm3447_vm2, %v4150_v1 }
 0x3e5   : > { %7688 = vmatprep.mubr.msk.bf16.mxu1 %vm3447_vm2, %v4151_v17 }
 0x3ec   : > { %7689 = vmatmul.mubr.msk.bf16.gmra.mrb[16].mxu1 %vm3447_vm2, %v4152_v12 }
 0x3ed   : > { %7692 = vmatprep.mubr.msk.bf16.mxu1 %vm3447_vm2, %v4153_v21 }
 0x3f4   : > { %7693 = vmatmul.mubr.msk.bf16.gmra.mrb[20].mxu1 %vm3447_vm2, %v4154_v10 }
 0x3f5   : > { %7696 = vmatprep.mubr.msk.bf16.mxu1 %vm3447_vm2, %v4155_v26 }
 0x3fc   : > { %7697 = vmatmul.mubr.msk.bf16.gmra.mrb[24].mxu1 %vm3447_vm2, %v4156_v31 }
 0x3fd   : > { %7700 = vmatprep.mubr.msk.bf16.mxu1 %vm3447_vm2, %v4157_v11 }
 0x404   : > { %7701 = vmatmul.mubr.msk.bf16.gmra.mrb[28].mxu1 %vm3447_vm2, %v4158_v39 }
 0x405   : > { %7704 = vmatprep.mubr.msk.bf16.mxu1 %vm3447_vm2, %v4159_v40 }
 0x40c   : > { %7705 = vmatmul.mubr.msk.bf16.gmra.mrb[32].mxu1 %vm3447_vm2, %v4160_v43  ;;  %v5086_v43 = vld [vmem:[#allocation2 + $0x1c] sm:$0xff] }
 0x40d   : > { %7710 = vmatprep.mubr.msk.bf16.mxu1 %vm3447_vm2, %v9487_v54  ;;  %v5196_v54 = vsel %vm3692_vm3, %v6831_v44, 0  ;;  %v5121_v45 = vpack.c.bf16 %v5086_v43, %v5085_v42  ;;  %v5738_v43 = vld [vmem:[#allocation2 + $0x2d] sm:$0xff] }
 0x414   : > { %7711 = vmatmul.mubr.msk.bf16.vlgmr.msra.gmra.mrb[0].mxu1 %vm3447_vm2, %v9491_v56  ;;  %v4797_v56 = vpack.c.bf16 %v4764_v18, %v4763_v55  ;;  %v5092_v18 = vld [vmem:[#allocation2 + $0x4c] sm:$0xff] }
 0x415   : > { %7747 = vmatpush3.bf16.msra.mxu1 %v4870_v28  ;;  %7714 = vmatprep.mubr.msk.bf16.mxu1 %vm3447_vm2, %v4146_v62  ;;  %v4767_v62 = vld [vmem:[#allocation2 + $0x53] sm:$0xff]  ;;  %v4793_v28 = vld [vmem:[#allocation2 + $0x123] sm:$0xff] }
 0x416   : > { %8526 = vmatprep.subr.msk.bf16.mxu1 %vm3692_vm3, %v6831_v44  ;;  %v4812_v44 = vpack.c.bf16 %v4794_v41, %v4793_v28  ;;  %v5446_v41 = vld [vmem:[#allocation2 + $0x13c] sm:$0x3f]  ;;  %v5737_v28 = vld [vmem:[#allocation2 + $0x25] sm:$0xff] }
 0x41c   : > { %7715 = vmatmul.mubr.msk.bf16.gmra.mrb[4].mxu1 %vm3447_vm2, %v4147_v63  ;;  %v4799_v63 = vpack.c.bf16 %v4768_v58, %v4767_v62  ;;  %v5098_v58 = vld [vmem:[#allocation2 + $0x7c] sm:$0xff] }
 0x41d   : > { %7718 = vmatprep.mubr.msk.bf16.mxu1 %vm3447_vm2, %v4148_v8  ;;  %v4771_v8 = vld [vmem:[#allocation2 + $0x73] sm:$0xff]  ;;  %v5127_v62 = vpack.c.bf16 %v5098_v58, %v5097_v24  ;;  %v5749_v58 = vld [vmem:[#allocation2 + $0x85] sm:$0xff] }
 0x424   : > { %7719 = vmatmul.mubr.msk.bf16.gmra.mrb[8].mxu1 %vm3447_vm2, %v4149_v9  ;;  %v4801_v9 = vpack.c.bf16 %v4772_v0, %v4771_v8  ;;  %v5099_v0 = vld [vmem:[#allocation2 + $0x84] sm:$0xff]  ;;  %v5104_v8 = vld [vmem:[#allocation2 + $0xac] sm:$0xff] }
 0x425   : > { %7722 = vmatprep.mubr.msk.bf16.mxu1 %vm3447_vm2, %v4150_v1  ;;  %v4775_v1 = vld [vmem:[#allocation2 + $0x93] sm:$0xff]  ;;  %v5128_v3 = vpack.c.bf16 %v5100_v59, %v5099_v0 }
 0x426   : > { %v5754_v59 = vld [vmem:[#allocation2 + $0xad] sm:$0xff] }
 0x42c   : > { %7723 = vmatmul.mubr.msk.bf16.gmra.mrb[12].mxu1 %vm3447_vm2, %v4151_v17  ;;  %v4803_v17 = vpack.c.bf16 %v4776_v15, %v4775_v1  ;;  %v5103_v15 = vld [vmem:[#allocation2 + $0xa4] sm:$0xff]  ;;  %v5108_v1 = vld [vmem:[#allocation2 + $0xcc] sm:$0xff] }
 0x42d   : > { %7726 = vmatprep.mubr.msk.bf16.mxu1 %vm3447_vm2, %v4152_v12  ;;  %v4779_v12 = vld [vmem:[#allocation2 + $0xb3] sm:$0xff]  ;;  %v5130_v5 = vpack.c.bf16 %v5104_v8, %v5103_v15 }
 0x42e   : > { %v5758_v8 = vld [vmem:[#allocation2 + $0xcd] sm:$0xff] }
 0x434   : > { %7727 = vmatmul.mubr.msk.bf16.gmra.mrb[16].mxu1 %vm3447_vm2, %v4153_v21  ;;  %v4805_v21 = vpack.c.bf16 %v4780_v19, %v4779_v12  ;;  %v5107_v19 = vld [vmem:[#allocation2 + $0xc4] sm:$0xff]  ;;  %v5112_v12 = vld [vmem:[#allocation2 + $0xec] sm:$0xff] }
 0x435   : > { %7730 = vmatprep.mubr.msk.bf16.mxu1 %vm3447_vm2, %v4154_v10  ;;  %v4783_v10 = vld [vmem:[#allocation2 + $0xd3] sm:$0xff]  ;;  %v5132_v16 = vpack.c.bf16 %v5108_v1, %v5107_v19 }
 0x436   : > { %v5762_v1 = vld [vmem:[#allocation2 + $0xed] sm:$0xff] }
 0x43c   : > { %7731 = vmatmul.mubr.msk.bf16.gmra.mrb[20].mxu1 %vm3447_vm2, %v4155_v26  ;;  %v4807_v26 = vpack.c.bf16 %v4784_v51, %v4783_v10  ;;  %v5111_v51 = vld [vmem:[#allocation2 + $0xe4] sm:$0xff]  ;;  %v5116_v10 = vld [vmem:[#allocation2 + $0x10c] sm:$0xff] }
 0x43d   : > { %7734 = vmatprep.mubr.msk.bf16.mxu1 %vm3447_vm2, %v4156_v31  ;;  %v4787_v31 = vld [vmem:[#allocation2 + $0xf3] sm:$0xff]  ;;  %v5134_v23 = vpack.c.bf16 %v5112_v12, %v5111_v51 }
 0x43e   : > { %v5766_v12 = vld [vmem:[#allocation2 + $0x10d] sm:$0xff] }
 0x444   : > { %7735 = vmatmul.mubr.msk.bf16.gmra.mrb[24].mxu1 %vm3447_vm2, %v4157_v11  ;;  %v4809_v11 = vpack.c.bf16 %v4788_v13, %v4787_v31  ;;  %v5115_v13 = vld [vmem:[#allocation2 + $0x104] sm:$0xff] }
 0x445   : > { %7738 = vmatprep.mubr.msk.bf16.mxu1 %vm3447_vm2, %v4158_v39  ;;  %v4791_v39 = vld [vmem:[#allocation2 + $0x113] sm:$0xff]  ;;  %v5136_v29 = vpack.c.bf16 %v5116_v10, %v5115_v13  ;;  %v5119_v31 = vld [vmem:[#allocation2 + $0x124] sm:$0xff] }
 0x446   : > { %v5769_v10 = vld [vmem:[#allocation2 + $0x125] sm:$0xff] }
 0x44c   : > { %7739 = vmatmul.mubr.msk.bf16.gmra.mrb[28].mxu1 %vm3447_vm2, %v4159_v40  ;;  %v4811_v40 = vpack.c.bf16 %v4792_v34, %v4791_v39  ;;  %v5848_v34 = vsel %vm3692_vm3, %v9581_v52, 0 }
 0x44d   : > { %7742 = vmatprep.mubr.msk.bf16.mxu1 %vm3447_vm2, %v4485_v46  ;;  %v5088_v46 = vld [vmem:[#allocation2 + $0x2c] sm:$0xff] }
 0x454   : > { %7743 = vmatmul.mubr.msk.bf16.gmra.mrb[32].mxu1 %vm3447_vm2, %v4486_v32  ;;  %v9572_v32 = vpack.c.bf16 %v5088_v46, %v5087_v14  ;;  %v5740_v46 = vld [vmem:[#allocation2 + $0x3d] sm:$0xff]  ;;  %v6174_v14 = vsel %vm3692_vm3, %v6888_v36, 0 }
 0x455   : > { %7748 = vmatprep.mubr.msk.bf16.mxu1 %vm3447_vm2, %v4795_v50  ;;  %v9576_v50 = vpack.c.bf16 %v5090_v35, %v5089_v48  ;;  %v5742_v48 = vld [vmem:[#allocation2 + $0x4d] sm:$0xff] }
 0x45c   : > { %7749 = vmatmul.mubr.msk.bf16.vlgmr.msra.gmra.mrb[0].mxu1 %vm3447_vm2, %v4796_v37  ;;  %v5094_v37 = vld [vmem:[#allocation2 + $0x5c] sm:$0xff] }
 0x45d   : > { %7785 = vmatpush3.bf16.msra.mxu1 %v5196_v54  ;;  %7752 = vmatprep.mubr.msk.bf16.mxu1 %vm3447_vm2, %v4797_v56  ;;  %v5091_v54 = vld [vmem:[#allocation2 + $0x44] sm:$0xff]  ;;  %v5125_v56 = vpack.c.bf16 %v5094_v37, %v5093_v53 }
 0x45e   : > { %8527 = vmatprep.subr.msk.bf16.mxu1 %vm3692_vm3, %v9550_v57  ;;  %v5124_v55 = vpack.c.bf16 %v5092_v18, %v5091_v54  ;;  %v5096_v57 = vld [vmem:[#allocation2 + $0x6c] sm:$0xff] }
 0x45f   : > { %v5746_v18 = vld [vmem:[#allocation2 + $0x6d] sm:$0xff]  ;;  %v5745_v37 = vld [vmem:[#allocation2 + $0x65] sm:$0xff] }
 0x460   : > { %v5777_v54 = vpack.c.bf16 %v5746_v18, %v5745_v37  ;;  %v6077_v18 = vld [vmem:[#allocation2 + $0x96] sm:$0xff]  ;;  %v6080_v37 = vld [vmem:[#allocation2 + $0xae] sm:$0xff] }
 0x464   : > { %7753 = vmatmul.mubr.msk.bf16.gmra.mrb[4].mxu1 %vm3447_vm2, %v4798_v61  ;;  %v5126_v61 = vpack.c.bf16 %v5096_v57, %v5095_v60  ;;  %v5750_v57 = vld [vmem:[#allocation2 + $0x8d] sm:$0xff] }
 0x465   : > { %7756 = vmatprep.mubr.msk.bf16.mxu1 %vm3447_vm2, %v4799_v63  ;;  %v5101_v63 = vld [vmem:[#allocation2 + $0x94] sm:$0xff]  ;;  %v5779_v60 = vpack.c.bf16 %v5750_v57, %v5749_v58 }
 0x466   : > { %v6081_v57 = vld [vmem:[#allocation2 + $0xb6] sm:$0xff]  ;;  %v6084_v58 = vld [vmem:[#allocation2 + $0xce] sm:$0xff] }
 0x46c   : > { %7757 = vmatmul.mubr.msk.bf16.gmra.mrb[8].mxu1 %vm3447_vm2, %v4800_v4  ;;  %v5129_v4 = vpack.c.bf16 %v5102_v2, %v5101_v63  ;;  %v5753_v2 = vld [vmem:[#allocation2 + $0xa5] sm:$0xff] }
 0x46d   : > { %7760 = vmatprep.mubr.msk.bf16.mxu1 %vm3447_vm2, %v4801_v9  ;;  %v5105_v9 = vld [vmem:[#allocation2 + $0xb4] sm:$0xff]  ;;  %v5781_v0 = vpack.c.bf16 %v5754_v59, %v5753_v2 }
 0x46e   : > { %v6085_v59 = vld [vmem:[#allocation2 + $0xd6] sm:$0xff]  ;;  %v6088_v2 = vld [vmem:[#allocation2 + $0xee] sm:$0xff] }
 0x474   : > { %7761 = vmatmul.mubr.msk.bf16.gmra.mrb[12].mxu1 %vm3447_vm2, %v4802_v7  ;;  %v5131_v7 = vpack.c.bf16 %v5106_v6, %v5105_v9  ;;  %v5757_v6 = vld [vmem:[#allocation2 + $0xc5] sm:$0xff] }
 0x475   : > { %7764 = vmatprep.mubr.msk.bf16.mxu1 %vm3447_vm2, %v4803_v17  ;;  %v5109_v17 = vld [vmem:[#allocation2 + $0xd4] sm:$0xff]  ;;  %v5783_v15 = vpack.c.bf16 %v5758_v8, %v5757_v6 }
 0x476   : > { %v6089_v8 = vld [vmem:[#allocation2 + $0xf6] sm:$0xff]  ;;  %v6092_v6 = vld [vmem:[#allocation2 + $0x10e] sm:$0xff] }
 0x47c   : > { %7765 = vmatmul.mubr.msk.bf16.gmra.mrb[16].mxu1 %vm3447_vm2, %v4804_v20  ;;  %v5133_v20 = vpack.c.bf16 %v5110_v47, %v5109_v17  ;;  %v5761_v47 = vld [vmem:[#allocation2 + $0xe5] sm:$0xff] }
 0x47d   : > { %7768 = vmatprep.mubr.msk.bf16.mxu1 %vm3447_vm2, %v4805_v21  ;;  %v5113_v21 = vld [vmem:[#allocation2 + $0xf4] sm:$0xff]  ;;  %v5785_v19 = vpack.c.bf16 %v5762_v1, %v5761_v47  ;;  %v6095_v47 = vld [vmem:[#allocation2 + $0x126] sm:$0xff] }
 0x47e   : > { %v6093_v1 = vld [vmem:[#allocation2 + $0x116] sm:$0xff] }
 0x484   : > { %7769 = vmatmul.mubr.msk.bf16.gmra.mrb[20].mxu1 %vm3447_vm2, %v4806_v25  ;;  %v5135_v25 = vpack.c.bf16 %v5114_v22, %v5113_v21  ;;  %v5765_v22 = vld [vmem:[#allocation2 + $0x105] sm:$0xff] }
 0x485   : > { %7772 = vmatprep.mubr.msk.bf16.mxu1 %vm3447_vm2, %v4807_v26  ;;  %v5117_v26 = vld [vmem:[#allocation2 + $0x114] sm:$0xff]  ;;  %v5787_v51 = vpack.c.bf16 %v5766_v12, %v5765_v22 }
 0x486   : > { %v6097_v12 = vld [vmem:[#allocation2 + $0x136] sm:$0xff] }
 0x48c   : > { %7773 = vmatmul.mubr.msk.bf16.gmra.mrb[24].mxu1 %vm3447_vm2, %v4808_v30  ;;  %v5137_v30 = vpack.c.bf16 %v5118_v27, %v5117_v26  ;;  %v5770_v26 = vld [vmem:[#allocation2 + $0x12d] sm:$0xff] }
 0x48d   : > { %7776 = vmatprep.mubr.msk.bf16.mxu1 %vm3447_vm2, %v4809_v11  ;;  %v5120_v11 = vld [vmem:[#allocation2 + $0x12c] sm:$0x3f]  ;;  %v5789_v13 = vpack.c.bf16 %v5770_v26, %v5769_v10 }
 0x48e   : > { %v5138_v33 = vpack.c.bf16 %v5120_v11, %v5119_v31  ;;  %v6064_v11 = vld [vmem:[#allocation2 + $0x2e] sm:$0xff] }
 0x494   : > { %7777 = vmatmul.mubr.msk.bf16.gmra.mrb[28].mxu1 %vm3447_vm2, %v4810_v38  ;;  %v5444_v38 = vld [vmem:[#allocation2 + $0x12c] sm:$0xff] }
 0x495   : > { %7780 = vmatprep.mubr.msk.bf16.mxu1 %vm3447_vm2, %v4811_v40  ;;  %v5463_v39 = vpack.c.bf16 %v5444_v38, %v5119_v31  ;;  %v5445_v40 = vld [vmem:[#allocation2 + $0x134] sm:$0xff]  ;;  %v6066_v38 = vld [vmem:[#allocation2 + $0x3e] sm:$0xff] }
 0x496   : > { %v5464_v42 = vpack.c.bf16 %v5446_v41, %v5445_v40  ;;  %v6067_v41 = vld [vmem:[#allocation2 + $0x46] sm:$0xff] }
 0x49c   : > { %7781 = vmatmul.mubr.msk.bf16.gmra.mrb[32].mxu1 %vm3447_vm2, %v4812_v44  ;;  %v5773_v44 = vpack.c.bf16 %v5738_v43, %v5737_v28  ;;  %v6069_v43 = vld [vmem:[#allocation2 + $0x56] sm:$0xff]  ;;  %v6070_v28 = vld [vmem:[#allocation2 + $0x5e] sm:$0xff] }
 0x49d   : > { %7786 = vmatprep.mubr.msk.bf16.mxu1 %vm3447_vm2, %v5121_v45  ;;  %v5739_v45 = vld [vmem:[#allocation2 + $0x35] sm:$0xff] }
 0x49e   : > { %v5774_v35 = vpack.c.bf16 %v5740_v46, %v5739_v45  ;;  %v6102_v45 = vpack.c.bf16 %v6070_v28, %v6069_v43  ;;  %v6071_v46 = vld [vmem:[#allocation2 + $0x66] sm:$0xff] }
 0x4a4   : > { %7787 = vmatmul.mubr.msk.bf16.vlgmr.msra.gmra.mrb[0].mxu1 %vm3447_vm2, %v9572_v32 }
 0x4a5   : > { %7823 = vmatpush3.bf16.msra.mxu1 %v5522_v49  ;;  %7790 = vmatprep.mubr.msk.bf16.mxu1 %vm3447_vm2, %v9576_v50 }
 0x4a6   : > { %8528 = vmatprep.subr.msk.bf16.mxu1 %vm3692_vm3, %v9581_v52  ;;  %v5744_v52 = vld [vmem:[#allocation2 + $0x5d] sm:$0xff] }
 0x4ac   : > { %7791 = vmatmul.mubr.msk.bf16.gmra.mrb[4].mxu1 %vm3447_vm2, %v5124_v55 }
 0x4ad   : > { %7794 = vmatprep.mubr.msk.bf16.mxu1 %vm3447_vm2, %v5125_v56 }
 0x4b4   : > { %7795 = vmatmul.mubr.msk.bf16.gmra.mrb[8].mxu1 %vm3447_vm2, %v5126_v61 }
 0x4b5   : > { %7798 = vmatprep.mubr.msk.bf16.mxu1 %vm3447_vm2, %v5127_v62 }
 0x4bc   : > { %7799 = vmatmul.mubr.msk.bf16.gmra.mrb[12].mxu1 %vm3447_vm2, %v5128_v3 }
 0x4bd   : > { %7802 = vmatprep.mubr.msk.bf16.mxu1 %vm3447_vm2, %v5129_v4 }
 0x4c4   : > { %7803 = vmatmul.mubr.msk.bf16.gmra.mrb[16].mxu1 %vm3447_vm2, %v5130_v5 }
 0x4c5   : > { %7806 = vmatprep.mubr.msk.bf16.mxu1 %vm3447_vm2, %v5131_v7 }
 0x4cc   : > { %7807 = vmatmul.mubr.msk.bf16.gmra.mrb[20].mxu1 %vm3447_vm2, %v5132_v16 }
 0x4cd   : > { %7810 = vmatprep.mubr.msk.bf16.mxu1 %vm3447_vm2, %v5133_v20 }
 0x4d4   : > { %7811 = vmatmul.mubr.msk.bf16.gmra.mrb[24].mxu1 %vm3447_vm2, %v5134_v23 }
 0x4d5   : > { %7814 = vmatprep.mubr.msk.bf16.mxu1 %vm3447_vm2, %v5135_v25 }
 0x4dc   : > { %7815 = vmatmul.mubr.msk.bf16.gmra.mrb[28].mxu1 %vm3447_vm2, %v5136_v29 }
 0x4dd   : > { %7818 = vmatprep.mubr.msk.bf16.mxu1 %vm3447_vm2, %v5137_v30 }
 0x4e4   : > { %7819 = vmatmul.mubr.msk.bf16.gmra.mrb[32].mxu1 %vm3447_vm2, %v5138_v33  ;;  %v6063_v33 = vld [vmem:[#allocation2 + $0x26] sm:$0xff] }
 0x4e5   : > { %7824 = vmatprep.mubr.msk.bf16.mxu1 %vm3447_vm2, %v9572_v32  ;;  %v5741_v32 = vld [vmem:[#allocation2 + $0x45] sm:$0xff] }
 0x4e6   : > { %v5775_v49 = vpack.c.bf16 %v5742_v48, %v5741_v32  ;;  %v6076_v32 = vld [vmem:[#allocation2 + $0x8e] sm:$0xff] }
 0x4ec   : > { %7825 = vmatmul.mubr.msk.bf16.vlgmr.msra.gmra.mrb[0].mxu1 %vm3447_vm2, %v9576_v50  ;;  %v5743_v50 = vld [vmem:[#allocation2 + $0x55] sm:$0xff] }
 0x4ed   : > { %7861 = vmatpush3.bf16.msra.mxu1 %v5848_v34  ;;  %7828 = vmatprep.mubr.msk.bf16.mxu1 %vm3447_vm2, %v5124_v55  ;;  %v5776_v53 = vpack.c.bf16 %v5744_v52, %v5743_v50  ;;  %v5747_v55 = vld [vmem:[#allocation2 + $0x75] sm:$0xff]  ;;  %v6099_v34 = vpack.c.bf16 %v6064_v11, %v6063_v33  ;;  %v6075_v50 = vld [vmem:[#allocation2 + $0x86] sm:$0xff] }
 0x4ee   : > { %8529 = vmatprep.subr.msk.bf16.mxu1 %vm3692_vm3, %v6888_v36  ;;  %v6065_v36 = vld [vmem:[#allocation2 + $0x36] sm:$0xff]  ;;  %v6105_v52 = vpack.c.bf16 %v6076_v32, %v6075_v50 }
 0x4ef   : > { %v6100_v40 = vpack.c.bf16 %v6066_v38, %v6065_v36 }
 0x4f4   : > { %7829 = vmatmul.mubr.msk.bf16.gmra.mrb[4].mxu1 %vm3447_vm2, %v5125_v56  ;;  %v5748_v56 = vld [vmem:[#allocation2 + $0x7d] sm:$0xff] }
 0x4f5   : > { %7832 = vmatprep.mubr.msk.bf16.mxu1 %vm3447_vm2, %v5126_v61  ;;  %v5778_v24 = vpack.c.bf16 %v5748_v56, %v5747_v55  ;;  %v5751_v61 = vld [vmem:[#allocation2 + $0x95] sm:$0xff]  ;;  %v6079_v55 = vld [vmem:[#allocation2 + $0xa6] sm:$0xff] }
 0x4f6   : > { %v6107_v56 = vpack.c.bf16 %v6080_v37, %v6079_v55 }
 0x4fc   : > { %7833 = vmatmul.mubr.msk.bf16.gmra.mrb[8].mxu1 %vm3447_vm2, %v5127_v62  ;;  %v5752_v62 = vld [vmem:[#allocation2 + $0x9d] sm:$0xff] }
 0x4fd   : > { %7836 = vmatprep.mubr.msk.bf16.mxu1 %vm3447_vm2, %v5128_v3  ;;  %v5780_v63 = vpack.c.bf16 %v5752_v62, %v5751_v61  ;;  %v5755_v3 = vld [vmem:[#allocation2 + $0xb5] sm:$0xff]  ;;  %v6083_v61 = vld [vmem:[#allocation2 + $0xc6] sm:$0xff] }
 0x4fe   : > { %v6109_v62 = vpack.c.bf16 %v6084_v58, %v6083_v61 }
 0x504   : > { %7837 = vmatmul.mubr.msk.bf16.gmra.mrb[12].mxu1 %vm3447_vm2, %v5129_v4  ;;  %v5756_v4 = vld [vmem:[#allocation2 + $0xbd] sm:$0xff] }
 0x505   : > { %7840 = vmatprep.mubr.msk.bf16.mxu1 %vm3447_vm2, %v5130_v5  ;;  %v5782_v9 = vpack.c.bf16 %v5756_v4, %v5755_v3  ;;  %v5759_v5 = vld [vmem:[#allocation2 + $0xd5] sm:$0xff]  ;;  %v6087_v3 = vld [vmem:[#allocation2 + $0xe6] sm:$0xff] }
 0x506   : > { %v6111_v4 = vpack.c.bf16 %v6088_v2, %v6087_v3 }
 0x50c   : > { %7841 = vmatmul.mubr.msk.bf16.gmra.mrb[16].mxu1 %vm3447_vm2, %v5131_v7  ;;  %v5760_v7 = vld [vmem:[#allocation2 + $0xdd] sm:$0xff] }
 0x50d   : > { %7844 = vmatprep.mubr.msk.bf16.mxu1 %vm3447_vm2, %v5132_v16  ;;  %v5784_v17 = vpack.c.bf16 %v5760_v7, %v5759_v5  ;;  %v5763_v16 = vld [vmem:[#allocation2 + $0xf5] sm:$0xff]  ;;  %v6091_v5 = vld [vmem:[#allocation2 + $0x106] sm:$0xff] }
 0x50e   : > { %v6113_v7 = vpack.c.bf16 %v6092_v6, %v6091_v5 }
 0x514   : > { %7845 = vmatmul.mubr.msk.bf16.gmra.mrb[20].mxu1 %vm3447_vm2, %v5133_v20  ;;  %v5764_v20 = vld [vmem:[#allocation2 + $0xfd] sm:$0xff] }
 0x515   : > { %7848 = vmatprep.mubr.msk.bf16.mxu1 %vm3447_vm2, %v5134_v23  ;;  %v5786_v21 = vpack.c.bf16 %v5764_v20, %v5763_v16  ;;  %v5767_v23 = vld [vmem:[#allocation2 + $0x115] sm:$0xff] }
 0x51c   : > { %7849 = vmatmul.mubr.msk.bf16.gmra.mrb[24].mxu1 %vm3447_vm2, %v5135_v25  ;;  %v5768_v25 = vld [vmem:[#allocation2 + $0x11d] sm:$0xff] }
 0x51d   : > { %7852 = vmatprep.mubr.msk.bf16.mxu1 %vm3447_vm2, %v5136_v29  ;;  %v5788_v27 = vpack.c.bf16 %v5768_v25, %v5767_v23  ;;  %v5771_v29 = vld [vmem:[#allocation2 + $0x135] sm:$0xff] }
 0x524   : > { %7853 = vmatmul.mubr.msk.bf16.gmra.mrb[28].mxu1 %vm3447_vm2, %v5137_v30  ;;  %v5772_v30 = vld [vmem:[#allocation2 + $0x13d] sm:$0x3f] }
 0x525   : > { %7856 = vmatprep.mubr.msk.bf16.mxu1 %vm3447_vm2, %v5463_v39  ;;  %v5790_v31 = vpack.c.bf16 %v5772_v30, %v5771_v29  ;;  %v6068_v39 = vld [vmem:[#allocation2 + $0x4e] sm:$0xff] }
 0x52c   : > { %7857 = vmatmul.mubr.msk.bf16.gmra.mrb[32].mxu1 %vm3447_vm2, %v5464_v42  ;;  %v6101_v42 = vpack.c.bf16 %v6068_v39, %v6067_v41 }
 0x52d   : > { %7862 = vmatprep.mubr.msk.bf16.mxu1 %vm3447_vm2, %v5773_v44  ;;  %v6072_v44 = vld [vmem:[#allocation2 + $0x6e] sm:$0xff] }
 0x52e   : > { %v6103_v48 = vpack.c.bf16 %v6072_v44, %v6071_v46 }
 0x534   : > { %7863 = vmatmul.mubr.msk.bf16.vlgmr.msra.gmra.mrb[0].mxu1 %vm3447_vm2, %v5774_v35  ;;  %v6073_v35 = vld [vmem:[#allocation2 + $0x76] sm:$0xff] }
 0x535   : > { %7899 = vmatpush3.bf16.msra.mxu1 %v6174_v14  ;;  %7866 = vmatprep.mubr.msk.bf16.mxu1 %vm3447_vm2, %v5775_v49  ;;  %v6074_v14 = vld [vmem:[#allocation2 + $0x7e] sm:$0xff] }
 0x536   : > { %v6104_v49 = vpack.c.bf16 %v6074_v14, %v6073_v35 }
 0x53c   : > { %7867 = vmatmul.mubr.msk.bf16.gmra.mrb[4].mxu1 %vm3447_vm2, %v5776_v53  ;;  %v6078_v53 = vld [vmem:[#allocation2 + $0x9e] sm:$0xff] }
 0x53d   : > { %7870 = vmatprep.mubr.msk.bf16.mxu1 %vm3447_vm2, %v5777_v54  ;;  %v6106_v54 = vpack.c.bf16 %v6078_v53, %v6077_v18 }
 0x544   : > { %7871 = vmatmul.mubr.msk.bf16.gmra.mrb[8].mxu1 %vm3447_vm2, %v5778_v24  ;;  %v6082_v24 = vld [vmem:[#allocation2 + $0xbe] sm:$0xff] }
 0x545   : > { %7874 = vmatprep.mubr.msk.bf16.mxu1 %vm3447_vm2, %v5779_v60  ;;  %v6108_v60 = vpack.c.bf16 %v6082_v24, %v6081_v57 }
 0x54c   : > { %7875 = vmatmul.mubr.msk.bf16.gmra.mrb[12].mxu1 %vm3447_vm2, %v5780_v63  ;;  %v6086_v63 = vld [vmem:[#allocation2 + $0xde] sm:$0xff] }
 0x54d   : > { %7878 = vmatprep.mubr.msk.bf16.mxu1 %vm3447_vm2, %v5781_v0  ;;  %v6110_v0 = vpack.c.bf16 %v6086_v63, %v6085_v59 }
 0x554   : > { %7879 = vmatmul.mubr.msk.bf16.gmra.mrb[16].mxu1 %vm3447_vm2, %v5782_v9  ;;  %v6090_v9 = vld [vmem:[#allocation2 + $0xfe] sm:$0xff] }
 0x555   : > { %7882 = vmatprep.mubr.msk.bf16.mxu1 %vm3447_vm2, %v5783_v15  ;;  %v6112_v15 = vpack.c.bf16 %v6090_v9, %v6089_v8 }
 0x55c   : > { %7883 = vmatmul.mubr.msk.bf16.gmra.mrb[20].mxu1 %vm3447_vm2, %v5784_v17  ;;  %v6094_v17 = vld [vmem:[#allocation2 + $0x11e] sm:$0xff] }
 0x55d   : > { %7886 = vmatprep.mubr.msk.bf16.mxu1 %vm3447_vm2, %v5785_v19  ;;  %v6096_v19 = vld [vmem:[#allocation2 + $0x12e] sm:$0xff]  ;;  %v6114_v16 = vpack.c.bf16 %v6094_v17, %v6093_v1 }
 0x55e   : > { %v6115_v20 = vpack.c.bf16 %v6096_v19, %v6095_v47 }
 0x564   : > { %7887 = vmatmul.mubr.msk.bf16.gmra.mrb[24].mxu1 %vm3447_vm2, %v5786_v21  ;;  %v6098_v21 = vld [vmem:[#allocation2 + $0x13e] sm:$0x3f] }
 0x565   : > { %7890 = vmatprep.mubr.msk.bf16.mxu1 %vm3447_vm2, %v5787_v51  ;;  %v6116_v22 = vpack.c.bf16 %v6098_v21, %v6097_v12  ;;  %v9672_v51 = vld [vmem:[%s9794_s4] ss:$0 sm:$0xff] }
 0x56c   : > { %7891 = vmatmul.mubr.msk.bf16.gmra.mrb[28].mxu1 %vm3447_vm2, %v5788_v27 }
 0x56d   : > { %7894 = vmatprep.mubr.msk.bf16.mxu1 %vm3447_vm2, %v5789_v13 }
 0x574   : > { %7895 = vmatmul.mubr.msk.bf16.gmra.mrb[32].mxu1 %vm3447_vm2, %v5790_v31 }
 0x575   : > { %7900 = vmatprep.mubr.msk.bf16.mxu1 %vm3447_vm2, %v6099_v34 }
 0x57c   : > { %7901 = vmatmul.mubr.msk.bf16.vlgmr.msra.gmra.mrb[0].mxu1 %vm3447_vm2, %v6100_v40 }
 0x57d   : > { %7904 = vmatprep.mubr.msk.bf16.mxu1 %vm3447_vm2, %v6101_v42 }
 0x584   : > { %7905 = vmatmul.mubr.msk.bf16.gmra.mrb[4].mxu1 %vm3447_vm2, %v6102_v45 }
 0x585   : > { %7908 = vmatprep.mubr.msk.bf16.mxu1 %vm3447_vm2, %v6103_v48 }
 0x58c   : > { %7909 = vmatmul.mubr.msk.bf16.gmra.mrb[8].mxu1 %vm3447_vm2, %v6104_v49 }
 0x58d   : > { %7912 = vmatprep.mubr.msk.bf16.mxu1 %vm3447_vm2, %v6105_v52 }
 0x594   : > { %7913 = vmatmul.mubr.msk.bf16.gmra.mrb[12].mxu1 %vm3447_vm2, %v6106_v54 }
 0x595   : > { %7916 = vmatprep.mubr.msk.bf16.mxu1 %vm3447_vm2, %v6107_v56 }
 0x59c   : > { %7917 = vmatmul.mubr.msk.bf16.gmra.mrb[16].mxu1 %vm3447_vm2, %v6108_v60 }
 0x59d   : > { %7920 = vmatprep.mubr.msk.bf16.mxu1 %vm3447_vm2, %v6109_v62 }
 0x5a4   : > { %7921 = vmatmul.mubr.msk.bf16.gmra.mrb[20].mxu1 %vm3447_vm2, %v6110_v0 }
 0x5a5   : > { %7924 = vmatprep.mubr.msk.bf16.mxu1 %vm3447_vm2, %v6111_v4 }
 0x5ac   : > { %7925 = vmatmul.mubr.msk.bf16.gmra.mrb[24].mxu1 %vm3447_vm2, %v6112_v15 }
 0x5ad   : > { %7928 = vmatprep.mubr.msk.bf16.mxu1 %vm3447_vm2, %v6113_v7 }
 0x5b4   : > { %7929 = vmatmul.mubr.msk.bf16.gmra.mrb[28].mxu1 %vm3447_vm2, %v6114_v16 }
 0x5b5   : > { %7932 = vmatprep.mubr.msk.bf16.mxu1 %vm3447_vm2, %v6115_v20 }
 0x5bc   : > { %7933 = vmatmul.mubr.msk.bf16.gmra.mrb[32].mxu1 %vm3447_vm2, %v6116_v22 }
 0x64f   : > { %v7902_v23 = vpop.f32.mrb[0].mxu1 }
 0x650   : > { %v6398_v25 = vadd.f32 %v7902_v23, %v9672_v51  ;;  %v6210_v10 = vpop.f32.mrb[1].mxu1 }
 0x651   : > { %v6396_v26 = vadd.f32 %v9672_v51, %v6210_v10  ;;  %v7903_v27 = vpop.f32.mrb[2].mxu1 }
 0x652   : > { %v6434_v13 = vmax.f32 %v6398_v25, 0.0  ;;  %v6399_v29 = vadd.f32 %v7903_v27, %v9672_v51  ;;  %v6213_v30 = vpop.f32.mrb[3].mxu1 }
 0x653   : > { %v6432_v31 = vmax.f32 %v6396_v26, 0.0  ;;  %v6397_v11 = vadd.f32 %v9672_v51, %v6213_v30 }
 0x654   : > { %6470 = vst.msk [vmem:[%s9678_s11 + $0x10] sm:$0xff] %vm3447_vm2, %v6434_v13  ;;  %v6435_v33 = vmax.f32 %v6399_v29, 0.0 }
 0x655   : > { %6468 = vst.msk [vmem:[%s9678_s11] sm:$0xff] %vm3447_vm2, %v6432_v31  ;;  %v6433_v34 = vmax.f32 %v6397_v11, 0.0 }
 0x656   : > { %6471 = vst.msk [vmem:[%s9678_s11 + $0x18] sm:$0xff] %vm3447_vm2, %v6435_v33 }
 0x657   : > { %6469 = vst.msk [vmem:[%s9678_s11 + $0x8] sm:$0xff] %vm3447_vm2, %v6433_v34  ;;  %v7906_v36 = vpop.f32.mrb[4].mxu1 }
 0x658   : > { %v6402_v38 = vadd.f32 %v7906_v36, %v9672_v51  ;;  %v6226_v39 = vpop.f32.mrb[5].mxu1 }
 0x659   : > { %v6400_v40 = vadd.f32 %v9672_v51, %v6226_v39  ;;  %v7907_v41 = vpop.f32.mrb[6].mxu1 }
 0x65a   : > { %v6438_v42 = vmax.f32 %v6402_v38, 0.0  ;;  %v6403_v43 = vadd.f32 %v7907_v41, %v9672_v51  ;;  %v6229_v28 = vpop.f32.mrb[7].mxu1 }
 0x65b   : > { %v6436_v44 = vmax.f32 %v6400_v40, 0.0  ;;  %v6401_v45 = vadd.f32 %v9672_v51, %v6229_v28 }
 0x65c   : > { %6474 = vst.msk [vmem:[%s9678_s11 + $0x30] sm:$0xff] %vm3447_vm2, %v6438_v42  ;;  %v6439_v46 = vmax.f32 %v6403_v43, 0.0 }
 0x65d   : > { %6472 = vst.msk [vmem:[%s9678_s11 + $0x20] sm:$0xff] %vm3447_vm2, %v6436_v44  ;;  %v6437_v48 = vmax.f32 %v6401_v45, 0.0 }
 0x65e   : > { %6475 = vst.msk [vmem:[%s9678_s11 + $0x38] sm:$0xff] %vm3447_vm2, %v6439_v46 }
 0x65f   : > { %6473 = vst.msk [vmem:[%s9678_s11 + $0x28] sm:$0xff] %vm3447_vm2, %v6437_v48  ;;  %v7910_v35 = vpop.f32.mrb[8].mxu1 }
 0x660   : > { %v6406_v14 = vadd.f32 %v7910_v35, %v9672_v51  ;;  %v6242_v32 = vpop.f32.mrb[9].mxu1 }
 0x661   : > { %v6404_v49 = vadd.f32 %v9672_v51, %v6242_v32  ;;  %v7911_v50 = vpop.f32.mrb[10].mxu1 }
 0x662   : > { %v6442_v52 = vmax.f32 %v6406_v14, 0.0  ;;  %v6407_v18 = vadd.f32 %v7911_v50, %v9672_v51  ;;  %v6245_v53 = vpop.f32.mrb[11].mxu1 }
 0x663   : > { %v6440_v37 = vmax.f32 %v6404_v49, 0.0  ;;  %v6405_v54 = vadd.f32 %v9672_v51, %v6245_v53 }
 0x664   : > { %6478 = vst.msk [vmem:[%s9678_s11 + $0x50] sm:$0xff] %vm3447_vm2, %v6442_v52  ;;  %v6443_v55 = vmax.f32 %v6407_v18, 0.0 }
 0x665   : > { %6476 = vst.msk [vmem:[%s9678_s11 + $0x40] sm:$0xff] %vm3447_vm2, %v6440_v37  ;;  %v6441_v56 = vmax.f32 %v6405_v54, 0.0 }
 0x666   : > { %6479 = vst.msk [vmem:[%s9678_s11 + $0x58] sm:$0xff] %vm3447_vm2, %v6443_v55 }
 0x667   : > { %6477 = vst.msk [vmem:[%s9678_s11 + $0x48] sm:$0xff] %vm3447_vm2, %v6441_v56  ;;  %v7914_v57 = vpop.f32.mrb[12].mxu1 }
 0x668   : > { %v6410_v24 = vadd.f32 %v7914_v57, %v9672_v51  ;;  %v6258_v58 = vpop.f32.mrb[13].mxu1 }
 0x669   : > { %v6408_v60 = vadd.f32 %v9672_v51, %v6258_v58  ;;  %v7915_v61 = vpop.f32.mrb[14].mxu1 }
 0x66a   : > { %v6446_v62 = vmax.f32 %v6410_v24, 0.0  ;;  %v6411_v59 = vadd.f32 %v7915_v61, %v9672_v51  ;;  %v6261_v63 = vpop.f32.mrb[15].mxu1 }
 0x66b   : > { %v6444_v2 = vmax.f32 %v6408_v60, 0.0  ;;  %v6409_v0 = vadd.f32 %v9672_v51, %v6261_v63 }
 0x66c   : > { %6482 = vst.msk [vmem:[%s9678_s11 + $0x70] sm:$0xff] %vm3447_vm2, %v6446_v62  ;;  %v6447_v3 = vmax.f32 %v6411_v59, 0.0 }
 0x66d   : > { %6480 = vst.msk [vmem:[%s9678_s11 + $0x60] sm:$0xff] %vm3447_vm2, %v6444_v2  ;;  %v6445_v4 = vmax.f32 %v6409_v0, 0.0 }
 0x66e   : > { %6483 = vst.msk [vmem:[%s9678_s11 + $0x78] sm:$0xff] %vm3447_vm2, %v6447_v3 }
 0x66f   : > { %6481 = vst.msk [vmem:[%s9678_s11 + $0x68] sm:$0xff] %vm3447_vm2, %v6445_v4  ;;  %v7918_v8 = vpop.f32.mrb[16].mxu1 }
 0x670   : > { %v6414_v9 = vadd.f32 %v7918_v8, %v9672_v51  ;;  %v6274_v6 = vpop.f32.mrb[17].mxu1 }
 0x671   : > { %v6412_v15 = vadd.f32 %v9672_v51, %v6274_v6  ;;  %v7919_v5 = vpop.f32.mrb[18].mxu1 }
 0x672   : > { %v6450_v7 = vmax.f32 %v6414_v9, 0.0  ;;  %v6415_v1 = vadd.f32 %v7919_v5, %v9672_v51  ;;  %v6277_v17 = vpop.f32.mrb[19].mxu1 }
 0x673   : > { %v6448_v47 = vmax.f32 %v6412_v15, 0.0  ;;  %v6413_v19 = vadd.f32 %v9672_v51, %v6277_v17 }
 0x674   : > { %6486 = vst.msk [vmem:[%s9678_s11 + $0x90] sm:$0xff] %vm3447_vm2, %v6450_v7  ;;  %v6451_v16 = vmax.f32 %v6415_v1, 0.0 }
 0x675   : > { %6484 = vst.msk [vmem:[%s9678_s11 + $0x80] sm:$0xff] %vm3447_vm2, %v6448_v47  ;;  %v6449_v20 = vmax.f32 %v6413_v19, 0.0 }
 0x676   : > { %6487 = vst.msk [vmem:[%s9678_s11 + $0x98] sm:$0xff] %vm3447_vm2, %v6451_v16 }
 0x677   : > { %6485 = vst.msk [vmem:[%s9678_s11 + $0x88] sm:$0xff] %vm3447_vm2, %v6449_v20  ;;  %v7922_v12 = vpop.f32.mrb[20].mxu1 }
 0x678   : > { %v6418_v21 = vadd.f32 %v7922_v12, %v9672_v51  ;;  %v6290_v22 = vpop.f32.mrb[21].mxu1 }
 0x679   : > { %v6416_v23 = vadd.f32 %v9672_v51, %v6290_v22  ;;  %v7923_v25 = vpop.f32.mrb[22].mxu1 }
 0x67a   : > { %v6454_v10 = vmax.f32 %v6418_v21, 0.0  ;;  %v6419_v26 = vadd.f32 %v7923_v25, %v9672_v51  ;;  %v6293_v27 = vpop.f32.mrb[23].mxu1 }
 0x67b   : > { %v6452_v13 = vmax.f32 %v6416_v23, 0.0  ;;  %v6417_v29 = vadd.f32 %v9672_v51, %v6293_v27 }
 0x67c   : > { %6490 = vst.msk [vmem:[%s9678_s11 + $0xb0] sm:$0xff] %vm3447_vm2, %v6454_v10  ;;  %v6455_v30 = vmax.f32 %v6419_v26, 0.0 }
 0x67d   : > { %6488 = vst.msk [vmem:[%s9678_s11 + $0xa0] sm:$0xff] %vm3447_vm2, %v6452_v13  ;;  %v6453_v31 = vmax.f32 %v6417_v29, 0.0 }
 0x67e   : > { %6491 = vst.msk [vmem:[%s9678_s11 + $0xb8] sm:$0xff] %vm3447_vm2, %v6455_v30 }
 0x67f   : > { %6489 = vst.msk [vmem:[%s9678_s11 + $0xa8] sm:$0xff] %vm3447_vm2, %v6453_v31  ;;  %v7926_v11 = vpop.f32.mrb[24].mxu1 }
 0x680   : > { %v6422_v33 = vadd.f32 %v7926_v11, %v9672_v51  ;;  %v6306_v34 = vpop.f32.mrb[25].mxu1 }
 0x681   : > { %v6420_v36 = vadd.f32 %v9672_v51, %v6306_v34  ;;  %v7927_v38 = vpop.f32.mrb[26].mxu1 }
 0x682   : > { %v6458_v39 = vmax.f32 %v6422_v33, 0.0  ;;  %v6423_v40 = vadd.f32 %v7927_v38, %v9672_v51  ;;  %v6309_v41 = vpop.f32.mrb[27].mxu1 }
 0x683   : > { %v6456_v42 = vmax.f32 %v6420_v36, 0.0  ;;  %v6421_v43 = vadd.f32 %v9672_v51, %v6309_v41 }
 0x684   : > { %6494 = vst.msk [vmem:[%s9678_s11 + $0xd0] sm:$0xff] %vm3447_vm2, %v6458_v39  ;;  %v6459_v28 = vmax.f32 %v6423_v40, 0.0 }
 0x685   : > { %6492 = vst.msk [vmem:[%s9678_s11 + $0xc0] sm:$0xff] %vm3447_vm2, %v6456_v42  ;;  %v6457_v44 = vmax.f32 %v6421_v43, 0.0 }
 0x686   : > { %6495 = vst.msk [vmem:[%s9678_s11 + $0xd8] sm:$0xff] %vm3447_vm2, %v6459_v28 }
 0x687   : > { %6493 = vst.msk [vmem:[%s9678_s11 + $0xc8] sm:$0xff] %vm3447_vm2, %v6457_v44  ;;  %v7930_v45 = vpop.f32.mrb[28].mxu1 }
 0x688   : > { %v6426_v46 = vadd.f32 %v7930_v45, %v9672_v51  ;;  %v6322_v48 = vpop.f32.mrb[29].mxu1 }
 0x689   : > { %v6424_v35 = vadd.f32 %v9672_v51, %v6322_v48  ;;  %v7931_v14 = vpop.f32.mrb[30].mxu1 }
 0x68a   : > { %v6462_v32 = vmax.f32 %v6426_v46, 0.0  ;;  %v6427_v49 = vadd.f32 %v7931_v14, %v9672_v51  ;;  %v6325_v50 = vpop.f32.mrb[31].mxu1 }
 0x68b   : > { %v6460_v52 = vmax.f32 %v6424_v35, 0.0  ;;  %v6425_v18 = vadd.f32 %v9672_v51, %v6325_v50 }
 0x68c   : > { %6498 = vst.msk [vmem:[%s9678_s11 + $0xf0] sm:$0xff] %vm3447_vm2, %v6462_v32  ;;  %v6463_v53 = vmax.f32 %v6427_v49, 0.0 }
 0x68d   : > { %6496 = vst.msk [vmem:[%s9678_s11 + $0xe0] sm:$0xff] %vm3447_vm2, %v6460_v52  ;;  %v6461_v37 = vmax.f32 %v6425_v18, 0.0 }
 0x68e   : > { %6499 = vst.msk [vmem:[%s9678_s11 + $0xf8] sm:$0xff] %vm3447_vm2, %v6463_v53 }
 0x68f   : > { %6497 = vst.msk [vmem:[%s9678_s11 + $0xe8] sm:$0xff] %vm3447_vm2, %v6461_v37  ;;  %v7934_v54 = vpop.f32.mrb[32].mxu1 }
 0x690   : > { %v6430_v55 = vadd.f32 %v7934_v54, %v9672_v51  ;;  %v6338_v56 = vpop.f32.mrb[33].mxu1 }
 0x691   : > { %v6428_v57 = vadd.f32 %v9672_v51, %v6338_v56  ;;  %v7935_v24 = vpop.f32.mrb[34].mxu1 }
 0x692   : > { %v6466_v58 = vmax.f32 %v6430_v55, 0.0  ;;  %v6431_v60 = vadd.f32 %v7935_v24, %v9672_v51  ;;  %v6341_v61 = vpop.f32.mrb[35].mxu1 }
 0x693   : > { %v6464_v62 = vmax.f32 %v6428_v57, 0.0  ;;  %v6429_v59 = vadd.f32 %v9672_v51, %v6341_v61 }
 0x694   : > { %6502 = vst.msk [vmem:[%s9678_s11 + $0x110] sm:$0xff] %vm3447_vm2, %v6466_v58  ;;  %v6467_v63 = vmax.f32 %v6431_v60, 0.0 }
 0x695   : > { %6500 = vst.msk [vmem:[%s9678_s11 + $0x100] sm:$0xff] %vm3447_vm2, %v6464_v62  ;;  %v6465_v2 = vmax.f32 %v6429_v59, 0.0 }
 0x696   : > { %6503 = vst.msk [vmem:[%s9678_s11 + $0x118] sm:$0x3f] %vm3525_vm4, %v6467_v63 }
 0x697   : > { %6501 = vst.msk [vmem:[%s9678_s11 + $0x108] sm:$0xff] %vm3447_vm2, %v6465_v2 }
 0x698 PF: > { %s16_s21 = sadd.s32 1, %s8550_s21  }
 0x699   : > { %p13_p4 = scmp.ge.s32.totalorder %s16_s21, 4  }
 0x69b   :  { %15 = sbr.rel (!%p13_p4) target bundleno = 1 (0x1), region = 90 }

</bundles_post_ra>
